<compile_context>
chip_gen: v7x
topology: tpu7x:2x2x1
jax: 0.10.0
libtpu: 0.0.40
codegen_flags: <defaults>
</compile_context>

<pallas_src>
import jax
import jax.numpy as jnp
from jax.experimental import pallas as pl
from jax.experimental.pallas import tpu as pltpu

EPS = 1e-6


def ln_linear_kernel(x_ref, w_ref, b_ref, o_ref, y_scratch):
    # x_ref:  (Mp, C)  f32   (same block for every grid step)
    # w_ref:  (C, TN)  bf16  (gamma already folded in)
    # b_ref:  (1, TN)  f32   (beta @ W already folded in)
    # o_ref:  (Mp, TN) f32
    # y_scratch: (Mp, C) bf16 — normalized activations, computed once per
    # sequential sweep (j == 0) and reused for every N tile.
    @pl.when(pl.program_id(1) == 0)
    def _():
        x = x_ref[...].astype(jnp.float32)          # LN math stays f32 (v5e VPU)
        mean = jnp.mean(x, axis=-1, keepdims=True)
        xc = x - mean
        var = jnp.mean(xc * xc, axis=-1, keepdims=True)
        y_scratch[...] = (xc * jax.lax.rsqrt(var + EPS)).astype(y_scratch.dtype)

    # bf16 x bf16 -> f32 accumulate on the MXU (no f32 cast on the operands).
    acc = jnp.dot(y_scratch[...], w_ref[...], preferred_element_type=jnp.float32)
    o_ref[...] = (acc + b_ref[...]).astype(o_ref.dtype)


def layernorm_linear(x, gamma, beta, w, b, *, tn=768):
    """x: (B,H,W,C); gamma,beta: (C,); w: (C,N) [in,out]; b: (N,). -> (B,H,W,N)."""
    B, H, W, C = x.shape
    N = w.shape[1]
    M = B * H * W

    # Fold the LayerNorm affine into the linear (exact, done in f32 on host):
    #   (xn*gamma + beta) @ W + b == xn @ (gamma[:,None]*W) + (beta @ W + b)
    wf = w.astype(jnp.float32)
    w_folded = (gamma.astype(jnp.float32)[:, None] * wf).astype(jnp.bfloat16)
    b_folded = (b.astype(jnp.float32) + beta.astype(jnp.float32) @ wf).reshape(1, N)

    # Pad rows to a multiple of 8 so sublane tiles / output stores are unmasked.
    Mp = ((M + 7) // 8) * 8
    x2 = x.reshape(M, C)
    if Mp != M:
        x2 = jnp.pad(x2, ((0, Mp - M), (0, 0)))

    assert N % tn == 0
    n_tiles = N // tn
    # Split the N tiles over a leading "parallel" axis so v7x's two TensorCores
    # get an even share; the trailing axis is "arbitrary" so the LN scratch is
    # valid (it is re-initialized at j==0 of each core's sequential sweep).
    g_par = 2 if n_tiles % 2 == 0 else 1
    g_n = n_tiles // g_par

    def n_map(i, j):
        return (0, i * g_n + j)

    out = pl.pallas_call(
        ln_linear_kernel,
        out_shape=jax.ShapeDtypeStruct((Mp, N), x.dtype),
        grid_spec=pltpu.PrefetchScalarGridSpec(
            num_scalar_prefetch=0,
            grid=(g_par, g_n),
            in_specs=[
                pl.BlockSpec((Mp, C), lambda i, j: (0, 0)),   # x (fetched once)
                pl.BlockSpec((C, tn), n_map),                 # bf16 weight tile
                pl.BlockSpec((1, tn), n_map),                 # folded bias tile
            ],
            out_specs=pl.BlockSpec((Mp, tn), n_map),
            scratch_shapes=[pltpu.VMEM((Mp, C), jnp.bfloat16)],
        ),
        compiler_params=pltpu.CompilerParams(
            dimension_semantics=("parallel", "arbitrary")),
    )(x2, w_folded, b_folded)

    if Mp != M:
        out = out[:M]
    return out.reshape(B, H, W, N)


def reference(x, gamma, beta, w, b):
    xf = x.astype(jnp.float32)
    mean = jnp.mean(xf, axis=-1, keepdims=True)
    var = jnp.mean((xf - mean) ** 2, axis=-1, keepdims=True)
    xn = (xf - mean) * jax.lax.rsqrt(var + EPS)
    y = xn * gamma + beta
    return (y @ w.astype(jnp.float32) + b).astype(x.dtype)


if __name__ == "__main__":
    key = jax.random.PRNGKey(0)
    kx, kg, kb, kw, kbias = jax.random.split(key, 5)

    B, H, W, C, N = 1, 14, 14, 768, 3072
    x = jax.random.normal(kx, (B, H, W, C), dtype=jnp.float32)

    # Deterministic parameter init (synthetic; matches module shapes).
    gamma = 1.0 + 0.02 * jax.random.normal(kg, (C,), dtype=jnp.float32)
    beta = 0.02 * jax.random.normal(kb, (C,), dtype=jnp.float32)
    # PyTorch Linear weight is (out, in); store transposed (in, out) for the kernel.
    w = 0.02 * jax.random.normal(kw, (C, N), dtype=jnp.float32)
    b = 0.02 * jax.random.normal(kbias, (N,), dtype=jnp.float32)

    out = jax.block_until_ready(layernorm_linear(x, gamma, beta, w, b))
    ref = reference(x, gamma, beta, w, b)

    assert out.shape == (B, H, W, N), out.shape
    # Tolerance accounts for bf16 MXU operands (K=768 accumulation, f32 acc).
    max_err = float(jnp.max(jnp.abs(out - ref)))
    assert jnp.allclose(out, ref, atol=2e-2, rtol=2e-2), max_err
    print("KERNEL_OK")
</pallas_src>

<mosaic_0001>
module attributes {stable_mosaic.version = 11 : i64} {
  func.func @ln_linear_kernel(%arg0: i32, %arg1: i32, %arg2: memref<200x768xf32, #tpu.memory_space<vmem>>, %arg3: memref<768x768xbf16, #tpu.memory_space<vmem>>, %arg4: memref<1x768xf32, #tpu.memory_space<vmem>>, %arg5: memref<200x768xf32, #tpu.memory_space<vmem>>, %arg6: memref<200x768xbf16, #tpu.memory_space<vmem>>) attributes {dimension_semantics = [#tpu.dimension_semantics<parallel>, #tpu.dimension_semantics<arbitrary>], iteration_bounds = array<i64: 2, 2>, scalar_prefetch = 0 : i64, scratch_operands = 1 : i64, tpu.core_type = #tpu.core_type<tc>, window_params = [{pipeline_mode = #tpu.pipeline_mode<synchronous>, transform_indices = @transform_0, window_bounds = array<i64: 200, 768>}, {transform_indices = @transform_1, window_bounds = array<i64: 768, 768>}, {transform_indices = @transform_2, window_bounds = array<i64: 1, 768>}, {transform_indices = @transform_3, window_bounds = array<i64: 200, 768>}]} {
    %c0_i32 = arith.constant 0 : i32
    %0 = arith.cmpi eq, %arg1, %c0_i32 : i32
    %1 = arith.extui %0 : i1 to i32
    %c0_i32_0 = arith.constant 0 : i32
    %2 = arith.cmpi ne, %1, %c0_i32_0 : i32
    scf.if %2 {
      %c0_8 = arith.constant 0 : index
      %c0_9 = arith.constant 0 : index
      %10 = vector.load %arg2[%c0_8, %c0_9] : memref<200x768xf32, #tpu.memory_space<vmem>>, vector<200x768xf32>
      %cst_10 = arith.constant dense<0.000000e+00> : vector<200xf32>
      %11 = vector.multi_reduction <add>, %10, %cst_10 [1] : vector<200x768xf32> to vector<200xf32>
      %12 = vector.shape_cast %11 : vector<200xf32> to vector<200x1xf32>
      %cst_11 = arith.constant 7.680000e+02 : f32
      %13 = vector.broadcast %cst_11 : f32 to vector<200x1xf32>
      %14 = arith.divf %12, %13 : vector<200x1xf32>
      %15 = vector.broadcast %14 : vector<200x1xf32> to vector<200x768xf32>
      %16 = arith.subf %10, %15 : vector<200x768xf32>
      %17 = arith.mulf %16, %16 : vector<200x768xf32>
      %cst_12 = arith.constant dense<0.000000e+00> : vector<200xf32>
      %18 = vector.multi_reduction <add>, %17, %cst_12 [1] : vector<200x768xf32> to vector<200xf32>
      %19 = vector.shape_cast %18 : vector<200xf32> to vector<200x1xf32>
      %cst_13 = arith.constant 7.680000e+02 : f32
      %20 = vector.broadcast %cst_13 : f32 to vector<200x1xf32>
      %21 = arith.divf %19, %20 : vector<200x1xf32>
      %cst_14 = arith.constant 9.99999997E-7 : f32
      %22 = vector.broadcast %cst_14 : f32 to vector<200x1xf32>
      %23 = arith.addf %21, %22 : vector<200x1xf32>
      %24 = math.rsqrt %23 : vector<200x1xf32>
      %25 = vector.broadcast %24 : vector<200x1xf32> to vector<200x768xf32>
      %26 = arith.mulf %16, %25 : vector<200x768xf32>
      %27 = arith.truncf %26 : vector<200x768xf32> to vector<200x768xbf16>
      %c0_15 = arith.constant 0 : index
      %c0_16 = arith.constant 0 : index
      %28 = vector.load %arg6[%c0_15, %c0_16] : memref<200x768xbf16, #tpu.memory_space<vmem>>, vector<200x768xbf16>
      tpu.vector_store %arg6[%c0_15, %c0_16], %27 {strides = array<i32>} : memref<200x768xbf16, #tpu.memory_space<vmem>>, vector<200x768xbf16>,
    } else {
    }
    %c0 = arith.constant 0 : index
    %c0_1 = arith.constant 0 : index
    %3 = vector.load %arg6[%c0, %c0_1] : memref<200x768xbf16, #tpu.memory_space<vmem>>, vector<200x768xbf16>
    %c0_2 = arith.constant 0 : index
    %c0_3 = arith.constant 0 : index
    %4 = vector.load %arg3[%c0_2, %c0_3] : memref<768x768xbf16, #tpu.memory_space<vmem>>, vector<768x768xbf16>
    %cst = arith.constant dense<0.000000e+00> : vector<200x768xf32>
    %5 = tpu.matmul %3, %4, %cst {dimension_numbers = #tpu.dot_dimension_numbers<[1], [0], [0], [1], [0, 0, 1, 1], [], []>} : vector<200x768xbf16>, vector<768x768xbf16>, vector<200x768xf32> -> vector<200x768xf32>
    %c0_4 = arith.constant 0 : index
    %c0_5 = arith.constant 0 : index
    %6 = vector.load %arg4[%c0_4, %c0_5] : memref<1x768xf32, #tpu.memory_space<vmem>>, vector<1x768xf32>
    %7 = vector.broadcast %6 : vector<1x768xf32> to vector<200x768xf32>
    %8 = arith.addf %5, %7 : vector<200x768xf32>
    %c0_6 = arith.constant 0 : index
    %c0_7 = arith.constant 0 : index
    %9 = vector.load %arg5[%c0_6, %c0_7] : memref<200x768xf32, #tpu.memory_space<vmem>>, vector<200x768xf32>
    tpu.vector_store %arg5[%c0_6, %c0_7], %8 {strides = array<i32>} : memref<200x768xf32, #tpu.memory_space<vmem>>, vector<200x768xf32>,
    return
  }
  func.func @transform_0(%arg0: i32, %arg1: i32) -> (i32, i32) {
    %c0_i32 = arith.constant 0 : i32
    %c0_i32_0 = arith.constant 0 : i32
    %c0_i32_1 = arith.constant 0 : i32
    return %c0_i32, %c0_i32_0 : i32, i32
  }
  func.func @transform_1(%arg0: i32, %arg1: i32) -> (i32, i32) {
    %c2_i32 = arith.constant 2 : i32
    %0 = arith.muli %arg0, %c2_i32 : i32
    %1 = arith.addi %0, %arg1 : i32
    %c0_i32 = arith.constant 0 : i32
    %c0_i32_0 = arith.constant 0 : i32
    return %c0_i32, %1 : i32, i32
  }
  func.func @transform_2(%arg0: i32, %arg1: i32) -> (i32, i32) {
    %c2_i32 = arith.constant 2 : i32
    %0 = arith.muli %arg0, %c2_i32 : i32
    %1 = arith.addi %0, %arg1 : i32
    %c0_i32 = arith.constant 0 : i32
    %c0_i32_0 = arith.constant 0 : i32
    return %c0_i32, %1 : i32, i32
  }
  func.func @transform_3(%arg0: i32, %arg1: i32) -> (i32, i32) {
    %c2_i32 = arith.constant 2 : i32
    %0 = arith.muli %arg0, %c2_i32 : i32
    %1 = arith.addi %0, %arg1 : i32
    %c0_i32 = arith.constant 0 : i32
    %c0_i32_0 = arith.constant 0 : i32
    return %c0_i32, %1 : i32, i32
  }
}

</mosaic_0001>

<bundles_post_ra>
// kernel: tpu_custom_call.1
= control target key start
LH: loop header
LB: loop body
LE: loop exit
PB: predicated region body
PF: predicated region fallthrough
CT: control target
= control target key end

     0   :  { %s10793_s0 = inlined_call_operand.hbm [shape: f32[200,768], index: 0, kind: input, shape index: {}]   ;;  %s10794_s1 = inlined_call_operand.hbm [shape: bf16[768,3072], index: 1, kind: input, shape index: {}]   ;;  %s10795_s2 = inlined_call_operand.hbm [shape: f32[1,3072], index: 2, kind: input, shape index: {}]   ;;  %s10796_s3 = inlined_call_operand.hbm [shape: f32[200,3072], index: 3, kind: output, shape index: {}]  }
   0x1   :  { %11036 = sst [smem:[#allocation168_spill]] %s10794_s1 }
   0x2   :  { %8 = vsyncpa [#allocation4], 0 }
   0x3   :  { %9 = vsyncpa [#allocation7], 0 }
   0x4   :  { %11 = vsyncpa [#allocation7 + $0x1], 0 }
   0x5   :  { %12 = vsyncpa [#allocation5], 0 }
   0x6   :  { %14 = vsyncpa [#allocation5 + $0x1], 0  ;;  %s7846_s12 = smov 0   ;;  %s7848_s13 = smov 0  }
   0x7   :  { %s7850_s14 = smov 0   ;;  %s7852_s15 = smov 0  }
   0x8   :  { %s7854_s16 = smov 0   ;;  %s7856_s17 = smov 0  }
   0x9   :  { %s7858_s18 = smov 0   ;;  %s7860_s19 = smov 0  }
   0xa LB: > { %11037 = sst [smem:[#allocation13_spill]] %s7804_s17  ;;  %s29_s20 = sadd.s32 1, %s7804_s17  ;;  %s7812_s19 = sphi %s7860_s19, %s20_s19   ;;  %s7808_s18 = sphi %s7858_s18, %s11543_s18   ;;  %s7804_s17 = sphi %s7856_s17, %s11542_s17   ;;  %s7800_s16 = sphi %s7854_s16, %s11541_s16   ;;  %s7796_s15 = sphi %s7852_s15, %s11540_s15   ;;  %s7792_s14 = sphi %s7850_s14, %s11546_s14   ;;  %s7788_s13 = sphi %s7848_s13, %s11545_s13   ;;  %s7784_s12 = sphi %s7846_s12, %s11544_s12  }
   0xb   : > { %11038 = sst [smem:[#allocation14_spill]] %s7808_s18  ;;  %s32_s21 = sadd.s32 1, %s7808_s18 }
   0xc   : > { %p30_p0 = scmp.ge.s32.totalorder %s29_s20, 2  ;;  %s5817_s22 = sshll.u32 %s7808_s18, 1 }
   0xd   : > { %s7890_s23 = sadd.s32 %s7804_s17, %s5817_s22  ;;  %s64_s24 = sadd.s32 1, %s7792_s14 }
   0xe   : > { %s11548_s20 = smov (%p30_p0, %s29_s20), 0  ;;  %s11550_s21 = smov (!%p30_p0, %s32_s21), %s7808_s18 }
   0xf   : > { %11039 = sst [smem:[#allocation15_spill]] %s11548_s20  ;;  %p71_p1 = scmp.ne.s32.totalorder %s7792_s14, %s7788_s13 }
  0x10   : > { %p72_p2 = scmp.eq.s32.totalorder %s7812_s19, 0  ;;  %p34_p3 = scmp.ge.s32.totalorder %s11550_s21, 2 }
  0x11   : > { %p6877_p5 = scmp.lt.s32.totalorder %s7812_s19, 4  ;;  %s174_s26 = sand.u32 1, %s7812_s19  }
  0x12   : > { %p7902_p4 = por %p72_p2, %p71_p1  ;;  %s11552_s21 = smov (%p34_p3, %s11550_s21), 0 }
  0x13   : > { %11041 = sst [smem:[#allocation16_spill]] %s11552_s21  ;;  %s176_s27 = sand.u32 1, %s7792_s14  }
  0x14   : > { %s5818_s28 = sshll.u32 %s11552_s21, 1  ;;  %s6846_s30 = smul.u32 2304, %s176_s27 }
  0x15   : > { %s60_s29 = sadd.s32 %s5818_s28, %s11548_s20  ;;  %s6278_s5 = smul.u32 384, %s7890_s23 }
  0x16   : > { %s61_s4 = ssub.s32 %s7890_s23, %s60_s29  ;;  %s11042_s1 = sld [smem:[#allocation168_spill]] }
  0x17   : > { %p62_p6 = scmp.eq.s32.totalorder %s61_s4, 0  ;;  %s178_s9 = scalar_lea.vmem [#allocation6], %s6846_s30 }
  0x18   : > { %s187_s10 = sshll.u32 %s178_s9, 4  ;;  %p7931_p7 = pnand %p6877_p5, %p7902_p4  ;;  %s7925_s10 = int_to_ptr.vmem [resolvable:$true] %s187_s10 }
  0x19   : > { %s7923_s11 = scalar_select %p62_p6, %s7792_s14, %s64_s24  }
  0x1a   : > { %s11043_s22 = scalar_select %p7931_p7, 1, 0 }
  0x1b   : > { %s7935_s28 = scalar_lea.sflag [#allocation7], %s174_s26  ;;  %p10802_p9 = pneg %p7931_p7 }
  0x1c   : > { %s7920_s8 = scalar_lea.hbm %s11042_s1, %s6278_s5  ;;  %s7627_s25 = scalar_lea.hbm %s11042_s1, 147456 }
  0x1d   : > { %s7622_s29 = scalar_lea.hbm %s7920_s8, 36864  ;;  %p7628_p12 = scmp.lt.u32.totalorder %s7920_s8, %s11042_s1 }
  0x1e   : > { %p7623_p8 = scmp.ne.s32.totalorder %s7920_s8, %s7622_s29  ;;  %p7629_p13 = scmp.lt.u32.totalorder %s7627_s25, %s7622_s29 }
  0x1f   : > { %p7631_p2 = scmp.lt.u32.totalorder %s7622_s29, %s7920_s8 }
  0x20   : > { %p7625_p10 = pnand %p10802_p9, %p7623_p8  ;;  %p7630_p0 = por %p7629_p13, %p7628_p12 }
  0x22   : > { %p7626_p11 = pneg %p7625_p10  ;;  %p7632_p3 = por %p7631_p2, %p7630_p0 }
  0x24   : > { %p7633_p4 = pnand %p7632_p3, %p7626_p11 }
  0x26   : > { %7636 = shalt.err (!%p7633_p4)
}
  0x27   : > { %s7637_s26 = scalar_lea.vmem %s7925_s10, 36864  ;;  %s7814_s6 = smov [#allocation6]  }
  0x28   : > { %p7638_p5 = scmp.ne.s32.totalorder %s7925_s10, %s7637_s26  ;;  %s7642_s7 = sshll.u32 %s7814_s6, 4  ;;  %s7643_s7 = int_to_ptr.vmem [resolvable:$false] %s7642_s7 }
  0x29   : > { %s7644_s9 = scalar_lea.vmem %s7643_s7, 73728  ;;  %p7645_p10 = scmp.lt.s32.totalorder %s7925_s10, %s7643_s7 }
  0x2a   : > { %p7640_p6 = pnand %p7638_p5, %p10802_p9  ;;  %p7646_p12 = scmp.lt.s32.totalorder %s7644_s9, %s7637_s26 }
  0x2c   : > { %p7641_p8 = pneg %p7640_p6  ;;  %p7647_p13 = por %p7646_p12, %p7645_p10 }
  0x2e   : > { %p7648_p0 = pnand %p7647_p13, %p7641_p8 }
  0x30   : > { %7651 = shalt.err (!%p7648_p0)
}
  0x31   : > { %s7815_s29 = smov 1536   ;;  %s7816_s24 = smov 384  }
  0x32   : > { %s7817_s30 = smov 24   ;;  %s7964_s25 = sadd.s32 4294967295, %s7812_s19  }
  0x33   : > { %6868 = dma.hbm_to_vmem [thread:$0]  (!%p7931_p7), %s7920_s8, 36864, %s7925_s10, %s7935_s28, %s7815_s29, %s7816_s24, %s7817_s30  }
  0x34   : > { %s5816_s4 = sadd.s32 4294967294, %s7812_s19   ;;  %p77_p11 = scmp.ne.s32.totalorder %s7788_s13, %s7784_s12 }
  0x35   : > { %p10801_p2 = scmp.eq.s32.totalorder %s7964_s25, 0  ;;  %p135_p3 = scmp.eq.s32.totalorder %s7964_s25, 3 }
  0x36   : > { %p141_p4 = scmp.eq.s32.totalorder %s5816_s4, 3  ;;  %p5823_p6 = scmp.ge.s32.totalorder %s7812_s19, 1 }
  0x37   : > { %p7973_p5 = por %p10801_p2, %p77_p11  ;;  %p7981_p8 = por %p135_p3, %p71_p1 }
  0x38   : > { %p7985_p10 = por %p141_p4, %p77_p11  ;;  %p148_p12 = scmp.lt.s32.totalorder %s7812_s19, 5 }
  0x39   : > { %s11044_s5 = scalar_select %p7973_p5, 1, 0 }
  0x3a   : > { %s11045_s8 = scalar_select %p7981_p8, 1, 0 }
  0x3b   : > { %s11046_s10 = scalar_select %p7985_p10, 1, 0 }
  0x3c   : > { %p7990_p13 = pnand %p5823_p6, %p148_p12  ;;  %s7818_s6 = smov [#allocation3]  }
  0x3d   : > { %s160_s7 = sshll.u32 %s7818_s6, 4  ;;  %s6847_s9 = smul.u32 6, %s176_s27  ;;  %s7994_s7 = int_to_ptr.vmem [resolvable:$true] %s160_s7 }
  0x3e   : > { %s11047_s26 = scalar_select %p7990_p13, 1, 0 }
  0x3f   : > { %p6861_p0 = pneg %p7990_p13  ;;  %s6279_s29 = smul.u32 96, %s7890_s23 }
  0x40   : > { %s201_s21 = scalar_lea.vmem [#allocation8], %s6847_s9  ;;  %s7652_s27 = scalar_lea.hbm %s10793_s0, 19200 }
  0x41   : > { %p8003_p1 = pnand %p6861_p0, %p10801_p2  ;;  %s8010_s1 = scalar_lea.hbm %s10795_s2, %s6279_s29 }
  0x42   : > { %s211_s6 = sshll.u32 %s201_s21, 4  ;;  %p7653_p11 = scmp.ne.s32.totalorder %s10793_s0, %s7652_s27  ;;  %s8012_s6 = int_to_ptr.vmem [resolvable:$true] %s211_s6 }
  0x43   : > { %p7654_p3 = pneg %p8003_p1  ;;  %p7659_p12 = scmp.lt.u32.totalorder %s7652_s27, %s10793_s0 }
  0x45   : > { %p7655_p4 = pnand %p7654_p3, %p7653_p11 }
  0x47   : > { %p7656_p6 = pneg %p7655_p4 }
  0x49   : > { %p7661_p0 = pnand %p7659_p12, %p7656_p6 }
  0x4b   : > { %7664 = shalt.err (!%p7661_p0)
}
  0x4c   : > { %s7665_s21 = scalar_lea.vmem %s7994_s7, 19200  ;;  %p7673_p8 = scmp.lt.s32.totalorder %s7994_s7, %s7994_s7 }
  0x4d   : > { %p7666_p2 = scmp.ne.s32.totalorder %s7994_s7, %s7665_s21  ;;  %p7674_p5 = scmp.lt.s32.totalorder %s7665_s21, %s7665_s21 }
  0x4f   : > { %p7668_p9 = pnand %p7666_p2, %p7654_p3  ;;  %p7675_p13 = por %p7674_p5, %p7673_p8 }
  0x51   : > { %p7669_p10 = pneg %p7668_p9 }
  0x53   : > { %p7676_p7 = pnand %p7675_p13, %p7669_p10 }
  0x55   : > { %7679 = shalt.err (!%p7676_p7)
}
  0x56   : > { %s7819_s17 = smov 768   ;;  %s7820_s18 = smov 48  }
  0x57   : > { %6864 = dma.hbm_to_vmem [thread:$0]  (!%p8003_p1), %s10793_s0, 19200, %s7994_s7, [#allocation4], %s7819_s17, %s7819_s17, %s7820_s18  }
  0x58   : > { %s7680_s29 = scalar_lea.hbm %s8010_s1, 96  ;;  %p11049_p2 = scmp.ne.s32.totalorder %s11043_s22, 0 }
  0x59   : > { %p7681_p9 = scmp.ne.s32.totalorder %s8010_s1, %s7680_s29  ;;  %s7685_s30 = scalar_lea.hbm %s10795_s2, 384 }
  0x5a   : > { %p11050_p5 = pneg %p11049_p2  ;;  %p7686_p10 = scmp.lt.u32.totalorder %s8010_s1, %s10795_s2 }
  0x5b   : > { %p7687_p13 = scmp.lt.u32.totalorder %s7685_s30, %s7680_s29  ;;  %p7689_p3 = scmp.lt.u32.totalorder %s7680_s29, %s8010_s1 }
  0x5c   : > { %p7683_p8 = pnand %p7681_p9, %p11050_p5 }
  0x5d   : > { %p7688_p11 = por %p7687_p13, %p7686_p10 }
  0x5e   : > { %p7684_p7 = pneg %p7683_p8 }
  0x5f   : > { %p7690_p4 = por %p7689_p3, %p7688_p11 }
  0x61   : > { %p7691_p6 = pnand %p7690_p4, %p7684_p7 }
  0x63   : > { %7694 = shalt.err (!%p7691_p6)
}
  0x64   : > { %s7695_s7 = scalar_lea.vmem %s8012_s6, 96  ;;  %p11051_p12 = pmov %p11050_p5 }
  0x65   : > { %p7696_p1 = scmp.ne.s32.totalorder %s8012_s6, %s7695_s7  ;;  %s7821_s24 = smov [#allocation8]  }
  0x66   : > { %s7700_s17 = sshll.u32 %s7821_s24, 4  ;;  %s7701_s17 = int_to_ptr.vmem [resolvable:$false] %s7700_s17 }
  0x67   : > { %p7698_p0 = pnand %p7696_p1, %p11051_p12  ;;  %s7702_s18 = scalar_lea.vmem %s7701_s17, 192 }
  0x68   : > { %p7703_p5 = scmp.lt.s32.totalorder %s8012_s6, %s7701_s17  ;;  %p7704_p8 = scmp.lt.s32.totalorder %s7702_s18, %s7695_s7 }
  0x69   : > { %p7699_p9 = pneg %p7698_p0 }
  0x6a   : > { %p7705_p10 = por %p7704_p8, %p7703_p5 }
  0x6c   : > { %p7706_p13 = pnand %p7705_p10, %p7699_p9 }
  0x6e   : > { %7709 = shalt.err (!%p7706_p13)
}
  0x6f   : > { %6871 = dma.hbm_to_vmem [thread:$0]  (!%p11049_p2), %s8010_s1, 96, %s8012_s6, %s7935_s28  }
  0x70   : > { %p11052_p7 = scmp.ne.s32.totalorder %s11047_s26, 0 }
  0x72   : > { %220 = sbr.rel (%p11052_p7) target bundleno = 1347 (0x543), region = 32 }
  0x79   : > { %p11053_p11 = scmp.eq.s32.totalorder %s7964_s25, 0 }
  0x7b   : > { %7771 = dma.done.wait (%p11053_p11), [#allocation4], 19200   ;;  %p11054_p3 = pmov %p11053_p11 }
  0x7c   : > { %s226_s20 = sand.u32 1, %s7964_s25   ;;  %s8067_s9 = sand.u32 1, %s7788_s13  }
  0x7d   : > { %7773 = vsyncadd (%p11054_p3), [#allocation4], 4294948096  ;;  %s6848_s22 = smul.u32 2304, %s8067_s9  ;;  %s227_s29 = scalar_lea.sflag [#allocation7], %s226_s20 }
  0x7e   : > { %p11055_p2 = scmp.ne.s32.totalorder %s11044_s5, 0 }
  0x7f   : > { %s8070_s27 = scalar_lea.vmem [#allocation6], %s6848_s22 }
  0x80   : > { %7775 = dma.done.wait (%p11055_p2), %s227_s29, 36960  }
  0x81   : > { %7777 = vsyncadd (%p11055_p2), %s227_s29, 4294930336  ;;  %s6849_s1 = smul.u32 6, %s8067_s9  ;;  %p5832_p4 = scmp.ne.s32.totalorder %s7796_s15, 0 }
  0x82   : > { %s6850_s28 = smul.u32 1200, %s8067_s9 }
  0x83   : > { %s8078_s26 = scalar_lea.vmem [#allocation8], %s6849_s1  ;;  %279 = sbr.rel (%p5832_p4) target bundleno = 584 (0x248), region = 48 }
  0x84   : > { %s8080_s6 = scalar_lea.vmem [#allocation9], %s6850_s28 }
  0x8a   : > { %v8083_v0 = vld [vmem:[#allocation3 + $0x60] sm:$0xff]  ;;  %v8085_v1 = vld [vmem:[#allocation3 + $0x68] sm:$0xff]  ;;  %v8087_v2 = vld [vmem:[#allocation3 + $0x70] sm:$0xff] }
  0x8b   : > { %v8089_v3 = vld [vmem:[#allocation3 + $0x78] sm:$0xff]  ;;  %v444_v4 = vadd.f32 %v8085_v1, %v8083_v0  ;;  %v8093_v5 = vld [vmem:[#allocation3] sm:$0xff]  ;;  %v8095_v6 = vld [vmem:[#allocation3 + $0x8] sm:$0xff] }
  0x8c   : > { %v8097_v7 = vld [vmem:[#allocation3 + $0x10] sm:$0xff]  ;;  %v8099_v8 = vld [vmem:[#allocation3 + $0x80] sm:$0xff]  ;;  %v8102_v10 = vld [vmem:[#allocation3 + $0x18] sm:$0xff]  ;;  %v430_v11 = vadd.f32 %v8095_v6, %v8093_v5 }
  0x8d   : > { %v445_v9 = vadd.f32 %v444_v4, %v8087_v2  ;;  %v8106_v12 = vld [vmem:[#allocation3 + $0x90] sm:$0xff]  ;;  %v8108_v13 = vld [vmem:[#allocation3 + $0x98] sm:$0xff]  ;;  %v8110_v14 = vld [vmem:[#allocation3 + $0xa0] sm:$0xff] }
  0x8e   : > { %v8112_v15 = vld [vmem:[#allocation3 + $0x88] sm:$0xff]  ;;  %v8115_v17 = vld [vmem:[#allocation3 + $0x20] sm:$0xff]  ;;  %v431_v18 = vadd.f32 %v430_v11, %v8097_v7  ;;  %v451_v20 = vadd.f32 %v8108_v13, %v8106_v12  ;;  %v8122_v21 = vld [vmem:[#allocation3 + $0x30] sm:$0xff] }
  0x8f   : > { %v446_v16 = vadd.f32 %v445_v9, %v8089_v3  ;;  %v8118_v19 = vld [vmem:[#allocation3 + $0xa8] sm:$0xff]  ;;  %v8124_v22 = vld [vmem:[#allocation3 + $0x38] sm:$0xff]  ;;  %v8126_v23 = vld [vmem:[#allocation3 + $0x40] sm:$0xff] }
  0x90   : > { %v8129_v25 = vld [vmem:[#allocation3 + $0x28] sm:$0xff]  ;;  %v432_v26 = vadd.f32 %v431_v18, %v8102_v10  ;;  %v8132_v27 = vld [vmem:[#allocation3 + $0xb0] sm:$0xff]  ;;  %v452_v28 = vadd.f32 %v451_v20, %v8110_v14  ;;  %v437_v29 = vadd.f32 %v8124_v22, %v8122_v21  ;;  %v8141_v32 = vld [vmem:[#allocation3 + $0xf8] sm:$0xff] }
  0x91   : > { %v447_v24 = vadd.f32 %v446_v16, %v8099_v8  ;;  %v8137_v30 = vld [vmem:[#allocation3 + $0x48] sm:$0xff]  ;;  %v8139_v31 = vld [vmem:[#allocation3 + $0xf0] sm:$0xff]  ;;  %v8145_v35 = vld [vmem:[#allocation3 + $0xb8] sm:$0xff] }
  0x92   : > { %v433_v34 = vadd.f32 %v432_v26, %v8115_v17  ;;  %v453_v36 = vadd.f32 %v452_v28, %v8118_v19  ;;  %v8148_v37 = vld [vmem:[#allocation3 + $0x50] sm:$0xff]  ;;  %v438_v38 = vadd.f32 %v437_v29, %v8126_v23  ;;  %v8151_v39 = vld [vmem:[#allocation3 + $0x100] sm:$0xff]  ;;  %v8153_v40 = vld [vmem:[#allocation3 + $0x58] sm:$0xff]  ;;  %v465_v41 = vadd.f32 %v8141_v32, %v8139_v31 }
  0x93   : > { %v448_v33 = vadd.f32 %v447_v24, %v8112_v15  ;;  %v8157_v42 = vld [vmem:[#allocation3 + $0xc0] sm:$0xff]  ;;  %v8159_v43 = vld [vmem:[#allocation3 + $0xc8] sm:$0xff]  ;;  %v8161_v44 = vld [vmem:[#allocation3 + $0xd0] sm:$0xff] }
  0x94   : > { %v434_v45 = vadd.f32 %v433_v34, %v8129_v25  ;;  %v454_v46 = vadd.f32 %v453_v36, %v8132_v27  ;;  %v439_v47 = vadd.f32 %v438_v38, %v8137_v30  ;;  %v8166_v48 = vld [vmem:[#allocation3 + $0x108] sm:$0xff]  ;;  %v8168_v49 = vld [vmem:[#allocation3 + $0x110] sm:$0xff]  ;;  %v8170_v50 = vld [vmem:[#allocation3 + $0xd8] sm:$0xff]  ;;  %v458_v51 = vadd.f32 %v8159_v43, %v8157_v42 }
  0x95   : > { %449 = vadd.xlane.f32.xlu1 %v448_v33  ;;  %v466_v52 = vadd.f32 %v465_v41, %v8151_v39  ;;  %v8175_v53 = vld [vmem:[#allocation3 + $0x150] sm:$0xff]  ;;  %v8177_v54 = vld [vmem:[#allocation3 + $0x158] sm:$0xff]  ;;  %v8179_v55 = vld [vmem:[#allocation3 + $0x160] sm:$0xff] }
  0x96   : > { %11056 = vst [vmem:[#allocation17_spill] sm:$0xff] %v8175_v53  ;;  %11057 = vst [vmem:[#allocation18_spill] sm:$0xff] %v8177_v54  ;;  %435 = vadd.xlane.f32.xlu0 %v434_v45  ;;  %v455_v56 = vadd.f32 %v454_v46, %v8145_v35  ;;  %v440_v57 = vadd.f32 %v439_v47, %v8148_v37  ;;  %v8183_v58 = vld [vmem:[#allocation3 + $0x118] sm:$0xff]  ;;  %v8185_v59 = vld [vmem:[#allocation3 + $0xe0] sm:$0xff]  ;;  %v459_v60 = vadd.f32 %v458_v51, %v8161_v44 }
  0x97   : > { %11058 = vst [vmem:[#allocation19_spill] sm:$0xff] %v8179_v55  ;;  %v8188_v61 = vld [vmem:[#allocation3 + $0x168] sm:$0xff]  ;;  %v479_v62 = vadd.f32 %v8177_v54, %v8175_v53  ;;  %v467_v63 = vadd.f32 %v466_v52, %v8166_v48  ;;  %v8193_v4 = vld [vmem:[#allocation3 + $0x120] sm:$0xff]  ;;  %v8197_v11 = vld [vmem:[#allocation3 + $0x130] sm:$0xff] }
  0x98   : > { %11059 = vst [vmem:[#allocation20_spill] sm:$0xff] %v8188_v61  ;;  %v8195_v9 = vld [vmem:[#allocation3 + $0x128] sm:$0xff]  ;;  %v441_v16 = vadd.f32 %v440_v57, %v8153_v40  ;;  %v460_v20 = vadd.f32 %v459_v60, %v8170_v50  ;;  %v8203_v24 = vld [vmem:[#allocation3 + $0x170] sm:$0xff]  ;;  %v8206_v28 = vld [vmem:[#allocation3 + $0x138] sm:$0xff] }
  0x99   : > { %456 = vadd.xlane.f32.xlu1 %v455_v56  ;;  %v8200_v18 = vld [vmem:[#allocation3 + $0xe8] sm:$0xff]  ;;  %11060 = vst [vmem:[#allocation21_spill] sm:$0xff] %v8203_v24  ;;  %v480_v26 = vadd.f32 %v479_v62, %v8179_v55  ;;  %11061 = vst [vmem:[#allocation22_spill] sm:$0xff] %v8206_v28  ;;  %v472_v29 = vadd.f32 %v8195_v9, %v8193_v4  ;;  %v468_v33 = vadd.f32 %v467_v63, %v8168_v49  ;;  %v8211_v34 = vld [vmem:[#allocation3 + $0x1b0] sm:$0xff] }
  0x9a   : > { %11062 = vst [vmem:[#allocation23_spill] sm:$0xff] %v8211_v34  ;;  %v8213_v36 = vld [vmem:[#allocation3 + $0x1b8] sm:$0xff]  ;;  %v8215_v38 = vld [vmem:[#allocation3 + $0x1c0] sm:$0xff]  ;;  %442 = vadd.xlane.f32.xlu0 %v441_v16  ;;  %v461_v41 = vadd.f32 %v460_v20, %v8185_v59  ;;  %v8227_v57 = vld [vmem:[#allocation3 + $0x1c8] sm:$0xff] }
  0x9b   : > { %11063 = vst [vmem:[#allocation24_spill] sm:$0xff] %v8213_v36  ;;  %11064 = vst [vmem:[#allocation25_spill] sm:$0xff] %v8215_v38  ;;  %v8218_v45 = vld [vmem:[#allocation3 + $0x178] sm:$0xff]  ;;  %v481_v46 = vadd.f32 %v480_v26, %v8188_v61  ;;  %v8221_v47 = vld [vmem:[#allocation3 + $0x140] sm:$0xff]  ;;  %v473_v51 = vadd.f32 %v472_v29, %v8197_v11  ;;  %v493_v52 = vadd.f32 %v8213_v36, %v8211_v34 }
  0x9c   : > { %11065 = vst [vmem:[#allocation26_spill] sm:$0xff] %v8218_v45  ;;  %11066 = vst [vmem:[#allocation27_spill] sm:$0xff] %v8221_v47  ;;  %v469_v56 = vadd.f32 %v468_v33, %v8183_v58  ;;  %v8229_v60 = vld [vmem:[#allocation3 + $0x180] sm:$0xff]  ;;  %v8231_v62 = vld [vmem:[#allocation3 + $0x188] sm:$0xff]  ;;  %v462_v63 = vadd.f32 %v461_v41, %v8200_v18 }
  0x9d   : > { %11067 = vst [vmem:[#allocation28_spill] sm:$0xff] %v8227_v57  ;;  %11068 = vst [vmem:[#allocation29_spill] sm:$0xff] %v8229_v60  ;;  %v482_v16 = vadd.f32 %v481_v46, %v8203_v24  ;;  %v8235_v20 = vld [vmem:[#allocation3 + $0x148] sm:$0xff]  ;;  %v474_v26 = vadd.f32 %v473_v51, %v8206_v28  ;;  %v8238_v29 = vld [vmem:[#allocation3 + $0x1d0] sm:$0xff]  ;;  %v494_v36 = vadd.f32 %v493_v52, %v8215_v38 }
  0x9e   : > { %11069 = vst [vmem:[#allocation30_spill] sm:$0xff] %v8231_v62  ;;  %11070 = vst [vmem:[#allocation31_spill] sm:$0xff] %v8235_v20  ;;  %v8241_v34 = vld [vmem:[#allocation3 + $0x190] sm:$0xff]  ;;  %470 = vadd.xlane.f32.xlu1 %v469_v56  ;;  %v8243_v33 = vld [vmem:[#allocation3 + $0x1d8] sm:$0xff]  ;;  %v486_v61 = vadd.f32 %v8231_v62, %v8229_v60  ;;  %463 = vadd.xlane.f32.xlu0 %v462_v63 }
  0x9f   : > { %11071 = vst [vmem:[#allocation32_spill] sm:$0xff] %v8238_v29  ;;  %11072 = vst [vmem:[#allocation33_spill] sm:$0xff] %v8241_v34  ;;  %v8247_v55 = vld [vmem:[#allocation3 + $0x210] sm:$0xff]  ;;  %v8249_v41 = vld [vmem:[#allocation3 + $0x218] sm:$0xff]  ;;  %v483_v51 = vadd.f32 %v482_v16, %v8218_v45  ;;  %v475_v24 = vadd.f32 %v474_v26, %v8221_v47  ;;  %v495_v52 = vadd.f32 %v494_v36, %v8227_v57 }
  0xa0   : > { %11073 = vst [vmem:[#allocation34_spill] sm:$0xff] %v8243_v33  ;;  %11074 = vst [vmem:[#allocation35_spill] sm:$0xff] %v8247_v55  ;;  %v8251_v46 = vld [vmem:[#allocation3 + $0x220] sm:$0xff]  ;;  %v8256_v38 = vld [vmem:[#allocation3 + $0x198] sm:$0xff]  ;;  %v507_v62 = vadd.f32 %v8249_v41, %v8247_v55  ;;  %v487_v60 = vadd.f32 %v486_v61, %v8241_v34 }
  0xa1   : > { %11075 = vst [vmem:[#allocation36_spill] sm:$0xff] %v8249_v41  ;;  %11076 = vst [vmem:[#allocation37_spill] sm:$0xff] %v8251_v46  ;;  %v8258_v56 = vld [vmem:[#allocation3 + $0x1a0] sm:$0xff]  ;;  %v8260_v54 = vld [vmem:[#allocation3 + $0x228] sm:$0xff]  ;;  %v476_v26 = vadd.f32 %v475_v24, %v8235_v20  ;;  %v496_v36 = vadd.f32 %v495_v52, %v8238_v29 }
  0xa2   : > { %11077 = vst [vmem:[#allocation38_spill] sm:$0xff] %v8256_v38  ;;  %11078 = vst [vmem:[#allocation39_spill] sm:$0xff] %v8258_v56  ;;  %v8265_v53 = vld [vmem:[#allocation3 + $0x1e0] sm:$0xff]  ;;  %v8267_v63 = vld [vmem:[#allocation3 + $0x1e8] sm:$0xff]  ;;  %v508_v47 = vadd.f32 %v507_v62, %v8251_v46  ;;  %484 = vadd.xlane.f32.xlu1 %v483_v51  ;;  %v488_v41 = vadd.f32 %v487_v60, %v8256_v38 }
  0xa3   : > { %11079 = vst [vmem:[#allocation40_spill] sm:$0xff] %v8260_v54  ;;  %11080 = vst [vmem:[#allocation41_spill] sm:$0xff] %v8265_v53  ;;  %v8269_v16 = vld [vmem:[#allocation3 + $0x1f0] sm:$0xff]  ;;  %v8273_v57 = vld [vmem:[#allocation3 + $0x1a8] sm:$0xff]  ;;  %v500_v61 = vadd.f32 %v8267_v63, %v8265_v53  ;;  %477 = vadd.xlane.f32.xlu0 %v476_v26  ;;  %v497_v52 = vadd.f32 %v496_v36, %v8243_v33 }
  0xa4   : > { %11081 = vst [vmem:[#allocation42_spill] sm:$0xff] %v8267_v63  ;;  %11082 = vst [vmem:[#allocation43_spill] sm:$0xff] %v8269_v16  ;;  %v8275_v45 = vld [vmem:[#allocation3 + $0x230] sm:$0xff]  ;;  %v8278_v28 = vld [vmem:[#allocation3 + $0x1f8] sm:$0xff]  ;;  %v509_v62 = vadd.f32 %v508_v47, %v8260_v54  ;;  %v489_v53 = vadd.f32 %v488_v41, %v8258_v56 }
  0xa5   : > { %11083 = vst [vmem:[#allocation44_spill] sm:$0xff] %v8273_v57  ;;  %11084 = vst [vmem:[#allocation45_spill] sm:$0xff] %v8275_v45  ;;  %v8283_v55 = vld [vmem:[#allocation3 + $0x270] sm:$0xff]  ;;  %v8285_v34 = vld [vmem:[#allocation3 + $0x278] sm:$0xff]  ;;  %v501_v63 = vadd.f32 %v500_v61, %v8269_v16 }
  0xa6   : > { %11085 = vst [vmem:[#allocation46_spill] sm:$0xff] %v8278_v28  ;;  %11086 = vst [vmem:[#allocation47_spill] sm:$0xff] %v8283_v55  ;;  %v8287_v24 = vld [vmem:[#allocation3 + $0x280] sm:$0xff]  ;;  %v8290_v29 = vld [vmem:[#allocation3 + $0x238] sm:$0xff]  ;;  %v521_v60 = vadd.f32 %v8285_v34, %v8283_v55  ;;  %v510_v33 = vadd.f32 %v509_v62, %v8275_v45  ;;  %498 = vadd.xlane.f32.xlu1 %v497_v52  ;;  %v490_v41 = vadd.f32 %v489_v53, %v8273_v57 }
  0xa7   : > { %11087 = vst [vmem:[#allocation48_spill] sm:$0xff] %v8285_v34  ;;  %11088 = vst [vmem:[#allocation49_spill] sm:$0xff] %v8287_v24  ;;  %v8293_v46 = vld [vmem:[#allocation3 + $0x200] sm:$0xff]  ;;  %v8296_v51 = vld [vmem:[#allocation3 + $0x288] sm:$0xff]  ;;  %v502_v54 = vadd.f32 %v501_v63, %v8278_v28 }
  0xa8   : > { %11089 = vst [vmem:[#allocation50_spill] sm:$0xff] %v8290_v29  ;;  %11090 = vst [vmem:[#allocation51_spill] sm:$0xff] %v8293_v46  ;;  %v8301_v38 = vld [vmem:[#allocation3 + $0x240] sm:$0xff]  ;;  %v8303_v26 = vld [vmem:[#allocation3 + $0x248] sm:$0xff]  ;;  %v522_v16 = vadd.f32 %v521_v60, %v8287_v24  ;;  %v511_v62 = vadd.f32 %v510_v33, %v8290_v29  ;;  %491 = vadd.xlane.f32.xlu0 %v490_v41 }
  0xa9   : > { %11091 = vst [vmem:[#allocation52_spill] sm:$0xff] %v8296_v51  ;;  %11092 = vst [vmem:[#allocation53_spill] sm:$0xff] %v8301_v38  ;;  %v8305_v36 = vld [vmem:[#allocation3 + $0x250] sm:$0xff]  ;;  %v8308_v47 = vld [vmem:[#allocation3 + $0x208] sm:$0xff]  ;;  %v514_v34 = vadd.f32 %v8303_v26, %v8301_v38  ;;  %v503_v63 = vadd.f32 %v502_v54, %v8293_v46 }
  0xaa   : > { %11093 = vst [vmem:[#allocation54_spill] sm:$0xff] %v8303_v26  ;;  %11094 = vst [vmem:[#allocation55_spill] sm:$0xff] %v8305_v36  ;;  %v8311_v61 = vld [vmem:[#allocation3 + $0x290] sm:$0xff]  ;;  %v8317_v55 = vld [vmem:[#allocation3 + $0x258] sm:$0xff]  ;;  %v523_v60 = vadd.f32 %v522_v16, %v8296_v51  ;;  %512 = vadd.xlane.f32.xlu1 %v511_v62 }
  0xab   : > { %11095 = vst [vmem:[#allocation56_spill] sm:$0xff] %v8308_v47  ;;  %11096 = vst [vmem:[#allocation57_spill] sm:$0xff] %v8311_v61  ;;  %v8319_v56 = vld [vmem:[#allocation3 + $0x2d0] sm:$0xff]  ;;  %v8321_v20 = vld [vmem:[#allocation3 + $0x2d8] sm:$0xff]  ;;  %v515_v52 = vadd.f32 %v514_v34, %v8305_v36  ;;  %v504_v16 = vadd.f32 %v503_v63, %v8308_v47 }
  0xac   : > { %11097 = vst [vmem:[#allocation58_spill] sm:$0xff] %v8317_v55  ;;  %11098 = vst [vmem:[#allocation59_spill] sm:$0xff] %v8319_v56  ;;  %v8325_v45 = vld [vmem:[#allocation3 + $0x298] sm:$0xff]  ;;  %v8328_v24 = vld [vmem:[#allocation3 + $0x260] sm:$0xff]  ;;  %v535_v38 = vadd.f32 %v8321_v20, %v8319_v56  ;;  %v524_v51 = vadd.f32 %v523_v60, %v8311_v61 }
  0xad   : > { %11099 = vst [vmem:[#allocation60_spill] sm:$0xff] %v8321_v20  ;;  %11100 = vst [vmem:[#allocation61_spill] sm:$0xff] %v8325_v45  ;;  %v8331_v26 = vld [vmem:[#allocation3 + $0x2e0] sm:$0xff]  ;;  %v8333_v53 = vld [vmem:[#allocation3 + $0x268] sm:$0xff]  ;;  %v516_v34 = vadd.f32 %v515_v52, %v8317_v55  ;;  %505 = vadd.xlane.f32.xlu0 %v504_v16 }
  0xae   : > { %11101 = vst [vmem:[#allocation62_spill] sm:$0xff] %v8328_v24  ;;  %11102 = vst [vmem:[#allocation63_spill] sm:$0xff] %v8331_v26  ;;  %v8337_v28 = vld [vmem:[#allocation3 + $0x2a0] sm:$0xff]  ;;  %v8339_v33 = vld [vmem:[#allocation3 + $0x2a8] sm:$0xff]  ;;  %v536_v56 = vadd.f32 %v535_v38, %v8331_v26  ;;  %v525_v60 = vadd.f32 %v524_v51, %v8325_v45 }
  0xaf   : > { %11103 = vst [vmem:[#allocation64_spill] sm:$0xff] %v8333_v53  ;;  %11104 = vst [vmem:[#allocation65_spill] sm:$0xff] %v8337_v28  ;;  %v8341_v54 = vld [vmem:[#allocation3 + $0x2b0] sm:$0xff]  ;;  %v8346_v36 = vld [vmem:[#allocation3 + $0x2e8] sm:$0xff]  ;;  %v528_v20 = vadd.f32 %v8339_v33, %v8337_v28  ;;  %v517_v52 = vadd.f32 %v516_v34, %v8328_v24 }
  0xb0   : > { %11105 = vst [vmem:[#allocation66_spill] sm:$0xff] %v8339_v33  ;;  %11106 = vst [vmem:[#allocation67_spill] sm:$0xff] %v8341_v54  ;;  %v8348_v41 = vld [vmem:[#allocation3 + $0x2f0] sm:$0xff]  ;;  %v8350_v29 = vld [vmem:[#allocation3 + $0x2b8] sm:$0xff]  ;;  %v537_v62 = vadd.f32 %v536_v56, %v8346_v36  ;;  %526 = vadd.xlane.f32.xlu1 %v525_v60 }
  0xb1   : > { %11107 = vst [vmem:[#allocation68_spill] sm:$0xff] %v8346_v36  ;;  %11108 = vst [vmem:[#allocation69_spill] sm:$0xff] %v8348_v41  ;;  %v8355_v46 = vld [vmem:[#allocation3 + $0x330] sm:$0xff]  ;;  %v8357_v57 = vld [vmem:[#allocation3 + $0x338] sm:$0xff]  ;;  %v529_v47 = vadd.f32 %v528_v20, %v8341_v54  ;;  %v518_v34 = vadd.f32 %v517_v52, %v8333_v53 }
  0xb2   : > { %11109 = vst [vmem:[#allocation70_spill] sm:$0xff] %v8350_v29  ;;  %11110 = vst [vmem:[#allocation71_spill] sm:$0xff] %v8355_v46  ;;  %v8359_v63 = vld [vmem:[#allocation3 + $0x340] sm:$0xff]  ;;  %v8363_v61 = vld [vmem:[#allocation3 + $0x2f8] sm:$0xff]  ;;  %v549_v38 = vadd.f32 %v8357_v57, %v8355_v46  ;;  %v538_v16 = vadd.f32 %v537_v62, %v8348_v41 }
  0xb3   : > { %11111 = vst [vmem:[#allocation72_spill] sm:$0xff] %v8357_v57  ;;  %11112 = vst [vmem:[#allocation73_spill] sm:$0xff] %v8359_v63  ;;  %v8365_v55 = vld [vmem:[#allocation3 + $0x2c0] sm:$0xff]  ;;  %v8368_v33 = vld [vmem:[#allocation3 + $0x348] sm:$0xff]  ;;  %v530_v20 = vadd.f32 %v529_v47, %v8350_v29  ;;  %519 = vadd.xlane.f32.xlu0 %v518_v34 }
  0xb4   : > { %11113 = vst [vmem:[#allocation74_spill] sm:$0xff] %v8363_v61  ;;  %11114 = vst [vmem:[#allocation75_spill] sm:$0xff] %v8365_v55  ;;  %v8373_v26 = vld [vmem:[#allocation3 + $0x300] sm:$0xff]  ;;  %v8375_v28 = vld [vmem:[#allocation3 + $0x308] sm:$0xff]  ;;  %v550_v24 = vadd.f32 %v549_v38, %v8359_v63  ;;  %v539_v62 = vadd.f32 %v538_v16, %v8363_v61 }
  0xb5   : > { %11115 = vst [vmem:[#allocation76_spill] sm:$0xff] %v8368_v33  ;;  %11116 = vst [vmem:[#allocation77_spill] sm:$0xff] %v8373_v26  ;;  %v8377_v51 = vld [vmem:[#allocation3 + $0x310] sm:$0xff]  ;;  %v8380_v45 = vld [vmem:[#allocation3 + $0x2c8] sm:$0xff]  ;;  %v542_v56 = vadd.f32 %v8375_v28, %v8373_v26  ;;  %v531_v47 = vadd.f32 %v530_v20, %v8365_v55 }
  0xb6   : > { %11117 = vst [vmem:[#allocation78_spill] sm:$0xff] %v8375_v28  ;;  %11118 = vst [vmem:[#allocation79_spill] sm:$0xff] %v8377_v51  ;;  %v8383_v54 = vld [vmem:[#allocation3 + $0x350] sm:$0xff]  ;;  %v8386_v57 = vld [vmem:[#allocation3 + $0x318] sm:$0xff]  ;;  %v551_v38 = vadd.f32 %v550_v24, %v8368_v33  ;;  %540 = vadd.xlane.f32.xlu1 %v539_v62 }
  0xb7   : > { %11119 = vst [vmem:[#allocation80_spill] sm:$0xff] %v8380_v45  ;;  %11120 = vst [vmem:[#allocation81_spill] sm:$0xff] %v8383_v54  ;;  %v8391_v46 = vld [vmem:[#allocation3 + $0x390] sm:$0xff]  ;;  %v8393_v36 = vld [vmem:[#allocation3 + $0x398] sm:$0xff]  ;;  %v543_v53 = vadd.f32 %v542_v56, %v8377_v51  ;;  %v532_v20 = vadd.f32 %v531_v47, %v8380_v45 }
  0xb8   : > { %11121 = vst [vmem:[#allocation82_spill] sm:$0xff] %v8386_v57  ;;  %11122 = vst [vmem:[#allocation83_spill] sm:$0xff] %v8391_v46  ;;  %v8395_v52 = vld [vmem:[#allocation3 + $0x3a0] sm:$0xff]  ;;  %v8398_v29 = vld [vmem:[#allocation3 + $0x358] sm:$0xff]  ;;  %v563_v60 = vadd.f32 %v8393_v36, %v8391_v46  ;;  %v552_v24 = vadd.f32 %v551_v38, %v8383_v54 }
  0xb9   : > { %11123 = vst [vmem:[#allocation84_spill] sm:$0xff] %v8393_v36  ;;  %11124 = vst [vmem:[#allocation85_spill] sm:$0xff] %v8395_v52  ;;  %v8401_v63 = vld [vmem:[#allocation3 + $0x320] sm:$0xff]  ;;  %v8407_v28 = vld [vmem:[#allocation3 + $0x3a8] sm:$0xff]  ;;  %v544_v56 = vadd.f32 %v543_v53, %v8386_v57  ;;  %533 = vadd.xlane.f32.xlu0 %v532_v20 }
  0xba   : > { %11125 = vst [vmem:[#allocation86_spill] sm:$0xff] %v8398_v29  ;;  %11126 = vst [vmem:[#allocation87_spill] sm:$0xff] %v8401_v63  ;;  %v8409_v26 = vld [vmem:[#allocation3 + $0x360] sm:$0xff]  ;;  %v8411_v41 = vld [vmem:[#allocation3 + $0x368] sm:$0xff]  ;;  %v564_v34 = vadd.f32 %v563_v60, %v8395_v52  ;;  %v553_v53 = vadd.f32 %v552_v24, %v8398_v29 }
  0xbb   : > { %11127 = vst [vmem:[#allocation88_spill] sm:$0xff] %v8407_v28  ;;  %11128 = vst [vmem:[#allocation89_spill] sm:$0xff] %v8409_v26  ;;  %v8415_v33 = vld [vmem:[#allocation3 + $0x328] sm:$0xff]  ;;  %v8418_v51 = vld [vmem:[#allocation3 + $0x3b0] sm:$0xff]  ;;  %v556_v46 = vadd.f32 %v8411_v41, %v8409_v26  ;;  %v545_v54 = vadd.f32 %v544_v56, %v8401_v63 }
  0xbc   : > { %11129 = vst [vmem:[#allocation90_spill] sm:$0xff] %v8411_v41  ;;  %11130 = vst [vmem:[#allocation91_spill] sm:$0xff] %v8415_v33  ;;  %v8421_v36 = vld [vmem:[#allocation3 + $0x370] sm:$0xff]  ;;  %v8423_v16 = vld [vmem:[#allocation3 + $0x3b8] sm:$0xff]  ;;  %v565_v60 = vadd.f32 %v564_v34, %v8407_v28  ;;  %554 = vadd.xlane.f32.xlu1 %v553_v53 }
  0xbd   : > { %11131 = vst [vmem:[#allocation92_spill] sm:$0xff] %v8418_v51  ;;  %11132 = vst [vmem:[#allocation93_spill] sm:$0xff] %v8421_v36  ;;  %v8427_v61 = vld [vmem:[#allocation3 + $0x3f0] sm:$0xff]  ;;  %v8429_v47 = vld [vmem:[#allocation3 + $0x3f8] sm:$0xff]  ;;  %v557_v26 = vadd.f32 %v556_v46, %v8421_v36  ;;  %v546_v56 = vadd.f32 %v545_v54, %v8415_v33 }
  0xbe   : > { %11133 = vst [vmem:[#allocation94_spill] sm:$0xff] %v8423_v16  ;;  %11134 = vst [vmem:[#allocation95_spill] sm:$0xff] %v8427_v61  ;;  %v8431_v38 = vld [vmem:[#allocation3 + $0x400] sm:$0xff]  ;;  %v8436_v52 = vld [vmem:[#allocation3 + $0x378] sm:$0xff]  ;;  %v577_v41 = vadd.f32 %v8429_v47, %v8427_v61  ;;  %v566_v34 = vadd.f32 %v565_v60, %v8418_v51 }
  0xbf   : > { %11135 = vst [vmem:[#allocation96_spill] sm:$0xff] %v8429_v47  ;;  %11136 = vst [vmem:[#allocation97_spill] sm:$0xff] %v8431_v38  ;;  %v8438_v62 = vld [vmem:[#allocation3 + $0x380] sm:$0xff]  ;;  %v8440_v57 = vld [vmem:[#allocation3 + $0x408] sm:$0xff]  ;;  %v558_v20 = vadd.f32 %v557_v26, %v8436_v52  ;;  %547 = vadd.xlane.f32.xlu0 %v546_v56 }
  0xc0   : > { %11137 = vst [vmem:[#allocation98_spill] sm:$0xff] %v8436_v52  ;;  %11138 = vst [vmem:[#allocation99_spill] sm:$0xff] %v8438_v62  ;;  %v8445_v45 = vld [vmem:[#allocation3 + $0x3c0] sm:$0xff]  ;;  %v8447_v55 = vld [vmem:[#allocation3 + $0x3c8] sm:$0xff]  ;;  %v578_v63 = vadd.f32 %v577_v41, %v8431_v38  ;;  %v567_v60 = vadd.f32 %v566_v34, %v8423_v16 }
  0xc1   : > { %11139 = vst [vmem:[#allocation100_spill] sm:$0xff] %v8440_v57  ;;  %11140 = vst [vmem:[#allocation101_spill] sm:$0xff] %v8445_v45  ;;  %v8449_v24 = vld [vmem:[#allocation3 + $0x3d0] sm:$0xff]  ;;  %v8453_v28 = vld [vmem:[#allocation3 + $0x388] sm:$0xff]  ;;  %v570_v46 = vadd.f32 %v8447_v55, %v8445_v45  ;;  %v559_v53 = vadd.f32 %v558_v20, %v8438_v62 }
  0xc2   : > { %11141 = vst [vmem:[#allocation102_spill] sm:$0xff] %v8447_v55  ;;  %11142 = vst [vmem:[#allocation103_spill] sm:$0xff] %v8449_v24  ;;  %v8455_v29 = vld [vmem:[#allocation3 + $0x410] sm:$0xff]  ;;  %v8458_v47 = vld [vmem:[#allocation3 + $0x3d8] sm:$0xff]  ;;  %v579_v41 = vadd.f32 %v578_v63, %v8440_v57  ;;  %568 = vadd.xlane.f32.xlu1 %v567_v60 }
  0xc3   : > { %11143 = vst [vmem:[#allocation104_spill] sm:$0xff] %v8455_v29  ;;  %v8463_v61 = vld [vmem:[#allocation3 + $0x450] sm:$0xff]  ;;  %v8465_v36 = vld [vmem:[#allocation3 + $0x458] sm:$0xff]  ;;  %v8467_v54 = vld [vmem:[#allocation3 + $0x460] sm:$0xff]  ;;  %v571_v33 = vadd.f32 %v570_v46, %v8449_v24  ;;  %v560_v20 = vadd.f32 %v559_v53, %v8453_v28 }
  0xc4   : > { %11144 = vst [vmem:[#allocation105_spill] sm:$0xff] %v8463_v61  ;;  %11145 = vst [vmem:[#allocation106_spill] sm:$0xff] %v8465_v36  ;;  %v8470_v51 = vld [vmem:[#allocation3 + $0x418] sm:$0xff]  ;;  %v8473_v38 = vld [vmem:[#allocation3 + $0x3e0] sm:$0xff]  ;;  %v591_v26 = vadd.f32 %v8465_v36, %v8463_v61  ;;  %v580_v63 = vadd.f32 %v579_v41, %v8455_v29 }
  0xc5   : > { %11146 = vst [vmem:[#allocation107_spill] sm:$0xff] %v8467_v54  ;;  %11147 = vst [vmem:[#allocation108_spill] sm:$0xff] %v8470_v51  ;;  %v8476_v55 = vld [vmem:[#allocation3 + $0x468] sm:$0xff]  ;;  %v8481_v45 = vld [vmem:[#allocation3 + $0x420] sm:$0xff]  ;;  %v572_v46 = vadd.f32 %v571_v33, %v8458_v47  ;;  %561 = vadd.xlane.f32.xlu0 %v560_v20 }
  0xc6   : > { %11148 = vst [vmem:[#allocation109_spill] sm:$0xff] %v8476_v55  ;;  %11149 = vst [vmem:[#allocation110_spill] sm:$0xff] %v8481_v45  ;;  %v8483_v52 = vld [vmem:[#allocation3 + $0x428] sm:$0xff]  ;;  %v8485_v34 = vld [vmem:[#allocation3 + $0x430] sm:$0xff]  ;;  %v592_v16 = vadd.f32 %v591_v26, %v8467_v54  ;;  %v581_v41 = vadd.f32 %v580_v63, %v8470_v51 }
  0xc7   : > { %11150 = vst [vmem:[#allocation111_spill] sm:$0xff] %v8483_v52  ;;  %11151 = vst [vmem:[#allocation112_spill] sm:$0xff] %v8485_v34  ;;  %v8488_v57 = vld [vmem:[#allocation3 + $0x3e8] sm:$0xff]  ;;  %v8491_v24 = vld [vmem:[#allocation3 + $0x470] sm:$0xff]  ;;  %v584_v56 = vadd.f32 %v8483_v52, %v8481_v45  ;;  %v573_v33 = vadd.f32 %v572_v46, %v8473_v38 }
  0xc8   : > { %v8497_v36 = vld [vmem:[#allocation3 + $0x438] sm:$0xff]  ;;  %v8499_v61 = vld [vmem:[#allocation3 + $0x480] sm:$0xff]  ;;  %v8501_v62 = vld [vmem:[#allocation3 + $0x488] sm:$0xff]  ;;  %v593_v29 = vadd.f32 %v592_v16, %v8476_v55  ;;  %582 = vadd.xlane.f32.xlu1 %v581_v41 }
  0xc9   : > { %11152 = vst [vmem:[#allocation113_spill] sm:$0xff] %v8501_v62  ;;  %v585_v26 = vadd.f32 %v584_v56, %v8485_v34  ;;  %v8507_v54 = vld [vmem:[#allocation3 + $0x490] sm:$0xff]  ;;  %v8509_v60 = vld [vmem:[#allocation3 + $0x478] sm:$0xff]  ;;  %v8511_v53 = vld [vmem:[#allocation3 + $0x440] sm:$0xff]  ;;  %v598_v52 = vadd.f32 %v8501_v62, %v8499_v61  ;;  %v574_v45 = vadd.f32 %v573_v33, %v8488_v57 }
  0xca   : > { %11153 = vst [vmem:[#allocation114_spill] sm:$0xff] %v8507_v54  ;;  %11154 = vst [vmem:[#allocation115_spill] sm:$0xff] %v8509_v60  ;;  %v594_v63 = vadd.f32 %v593_v29, %v8491_v24  ;;  %v8518_v51 = vld [vmem:[#allocation3 + $0x498] sm:$0xff]  ;;  %v8520_v16 = vld [vmem:[#allocation3 + $0x448] sm:$0xff] }
  0xcb   : > { %v586_v46 = vadd.f32 %v585_v26, %v8497_v36  ;;  %v599_v56 = vadd.f32 %v598_v52, %v8507_v54  ;;  %v8525_v34 = vld [vmem:[#allocation3 + $0x4a0] sm:$0xff]  ;;  %575 = vadd.xlane.f32.xlu0 %v574_v45  ;;  %v8529_v62 = vld [vmem:[#allocation3 + $0x4a8] sm:$0xff] }
  0xcc   : > { %v595_v20 = vadd.f32 %v594_v63, %v8509_v60 }
  0xcd   : > { %v587_v55 = vadd.f32 %v586_v46, %v8511_v53  ;;  %v600_v33 = vadd.f32 %v599_v56, %v8518_v51 }
  0xce   : > { %596 = vadd.xlane.f32.xlu1 %v595_v20 }
  0xcf   : > { %v588_v29 = vadd.f32 %v587_v55, %v8520_v16  ;;  %v601_v41 = vadd.f32 %v600_v33, %v8525_v34 }
  0xd1   : > { %589 = vadd.xlane.f32.xlu0 %v588_v29  ;;  %v602_v26 = vadd.f32 %v601_v41, %v8529_v62 }
  0xd5   : > { %603 = vadd.xlane.f32.xlu0 %v602_v26 }
 0x122   : > { %v450_v52 = vpop.xlane.xlu1 %449 }
 0x123   : > { %v608_v63 = vmul.f32 0.0013020834, %v450_v52  ;;  %v436_v60 = vpop.xlane.xlu0 %435 }
 0x124   : > { %v606_v46 = vmul.f32 0.0013020834, %v436_v60 }
 0x125   : > { %v8534_v54 = vsub.f32 %v8083_v0, %v608_v63  ;;  %v8537_v56 = vsub.f32 %v8085_v1, %v608_v63  ;;  %v8549_v29 = vsub.f32 %v8087_v2, %v608_v63  ;;  %v8558_v1 = vsub.f32 %v8089_v3, %v608_v63 }
 0x126   : > { %v457_v45 = vpop.xlane.xlu1 %456  ;;  %v8540_v55 = vsub.f32 %v8093_v5, %v606_v46  ;;  %v8543_v20 = vsub.f32 %v8095_v6, %v606_v46  ;;  %v8546_v33 = vsub.f32 %v8097_v7, %v606_v46  ;;  %v8552_v0 = vsub.f32 %v8102_v10, %v606_v46 }
 0x127   : > { %11155 = vst [vmem:[#allocation116_spill] sm:$0xff] %v8534_v54  ;;  %11156 = vst [vmem:[#allocation117_spill] sm:$0xff] %v8537_v56  ;;  %v443_v60 = vpop.xlane.xlu0 %442  ;;  %v8555_v41 = vsub.f32 %v8115_v17, %v606_v46  ;;  %v793_v5 = vmul.f32 %v8534_v54, %v8534_v54  ;;  %v8563_v7 = vsub.f32 %v8129_v25, %v606_v46  ;;  %v609_v26 = vmul.f32 0.0013020834, %v457_v45 }
 0x128   : > { %11157 = vst [vmem:[#allocation118_spill] sm:$0xff] %v8540_v55  ;;  %11158 = vst [vmem:[#allocation119_spill] sm:$0xff] %v8543_v20  ;;  %v607_v6 = vmul.f32 0.0013020834, %v443_v60  ;;  %v781_v2 = vmul.f32 %v8540_v55, %v8540_v55  ;;  %v782_v10 = vmul.f32 %v8543_v20, %v8543_v20  ;;  %v8570_v17 = vsub.f32 %v8099_v8, %v608_v63 }
 0x129   : > { %11159 = vst [vmem:[#allocation120_spill] sm:$0xff] %v8546_v33  ;;  %11160 = vst [vmem:[#allocation121_spill] sm:$0xff] %v8549_v29  ;;  %v8573_v3 = vsub.f32 %v8112_v15, %v608_v63  ;;  %v794_v52 = vmul.f32 %v8537_v56, %v8537_v56  ;;  %v783_v25 = vmul.f32 %v8546_v33, %v8546_v33 }
 0x12a   : > { %11161 = vst [vmem:[#allocation122_spill] sm:$0xff] %v8555_v41  ;;  %11162 = vst [vmem:[#allocation123_spill] sm:$0xff] %v8558_v1  ;;  %v784_v46 = vmul.f32 %v8552_v0, %v8552_v0  ;;  %v931_v54 = vadd.f32 %v782_v10, %v781_v2  ;;  %v795_v45 = vmul.f32 %v8549_v29, %v8549_v29 }
 0x12b   : > { %11163 = vst [vmem:[#allocation124_spill] sm:$0xff] %v8563_v7  ;;  %11164 = vst [vmem:[#allocation125_spill] sm:$0xff] %v8570_v17  ;;  %v471_v60 = vpop.xlane.xlu1 %470  ;;  %v464_v20 = vpop.xlane.xlu0 %463  ;;  %v785_v8 = vmul.f32 %v8555_v41, %v8555_v41  ;;  %v796_v15 = vmul.f32 %v8558_v1, %v8558_v1  ;;  %v945_v63 = vadd.f32 %v794_v52, %v793_v5 }
 0x12c   : > { %11165 = vst [vmem:[#allocation126_spill] sm:$0xff] %v8573_v3  ;;  %v8588_v56 = vsub.f32 %v8122_v21, %v607_v6  ;;  %v786_v33 = vmul.f32 %v8563_v7, %v8563_v7  ;;  %v932_v55 = vadd.f32 %v931_v54, %v783_v25  ;;  %v8593_v2 = vsub.f32 %v8124_v22, %v607_v6 }
 0x12d   : > { %v8596_v10 = vsub.f32 %v8126_v23, %v607_v6  ;;  %v8598_v29 = vmul.f32 0.0013020834, %v471_v60  ;;  %v797_v41 = vmul.f32 %v8570_v17, %v8570_v17  ;;  %v798_v5 = vmul.f32 %v8573_v3, %v8573_v3 }
 0x12e   : > { %11166 = vst [vmem:[#allocation127_spill] sm:$0xff] %v8588_v56  ;;  %v946_v21 = vadd.f32 %v945_v63, %v795_v45  ;;  %v933_v1 = vadd.f32 %v932_v55, %v784_v46  ;;  %v8605_v7 = vsub.f32 %v8137_v30, %v607_v6  ;;  %v787_v22 = vmul.f32 %v8588_v56, %v8588_v56 }
 0x12f   : > { %v485_v52 = vpop.xlane.xlu1 %484  ;;  %v788_v23 = vmul.f32 %v8593_v2, %v8593_v2  ;;  %v610_v54 = vmul.f32 0.0013020834, %v464_v20  ;;  %v8612_v17 = vsub.f32 %v8148_v37, %v607_v6  ;;  %v8615_v3 = vsub.f32 %v8153_v40, %v607_v6 }
 0x130   : > { %v478_v60 = vpop.xlane.xlu0 %477  ;;  %v947_v25 = vadd.f32 %v946_v21, %v796_v15  ;;  %v8617_v45 = vmul.f32 0.0013020834, %v485_v52  ;;  %v934_v55 = vadd.f32 %v933_v1, %v785_v8  ;;  %v789_v30 = vmul.f32 %v8596_v10, %v8596_v10 }
 0x131   : > { %v938_v46 = vadd.f32 %v788_v23, %v787_v22  ;;  %v8622_v56 = vsub.f32 %v8106_v12, %v609_v26  ;;  %v8625_v20 = vsub.f32 %v8108_v13, %v609_v26  ;;  %v8628_v37 = vsub.f32 %v8110_v14, %v609_v26 }
 0x132   : > { %v948_v63 = vadd.f32 %v947_v25, %v797_v41  ;;  %v935_v40 = vadd.f32 %v934_v55, %v786_v33  ;;  %v790_v6 = vmul.f32 %v8605_v7, %v8605_v7  ;;  %v8633_v8 = vsub.f32 %v8118_v19, %v609_v26 }
 0x133   : > { %v499_v15 = vpop.xlane.xlu1 %498  ;;  %v939_v1 = vadd.f32 %v938_v46, %v789_v30  ;;  %v8635_v21 = vmul.f32 0.0013020834, %v478_v60  ;;  %v791_v12 = vmul.f32 %v8612_v17, %v8612_v17  ;;  %v792_v13 = vmul.f32 %v8615_v3, %v8615_v3 }
 0x134   : > { %v799_v14 = vmul.f32 %v8622_v56, %v8622_v56  ;;  %936 = vadd.xlane.f32.xlu1 %v935_v40  ;;  %v8644_v52 = vsub.f32 %v8132_v27, %v609_v26  ;;  %v800_v19 = vmul.f32 %v8625_v20, %v8625_v20  ;;  %v801_v22 = vmul.f32 %v8628_v37, %v8628_v37 }
 0x135   : > { %v492_v41 = vpop.xlane.xlu0 %491  ;;  %v940_v33 = vadd.f32 %v939_v1, %v790_v6  ;;  %v949_v23 = vadd.f32 %v948_v63, %v798_v5  ;;  %v8651_v60 = vsub.f32 %v8145_v35, %v609_v26  ;;  %v802_v25 = vmul.f32 %v8633_v8, %v8633_v8 }
 0x136   : > { %v8656_v55 = vsub.f32 %v8157_v42, %v610_v54  ;;  %v952_v27 = vadd.f32 %v800_v19, %v799_v14  ;;  %v8659_v40 = vsub.f32 %v8159_v43, %v610_v54  ;;  %v8662_v6 = vsub.f32 %v8161_v44, %v610_v54 }
 0x137   : > { %v513_v30 = vpop.xlane.xlu1 %512  ;;  %v941_v46 = vadd.f32 %v940_v33, %v791_v12  ;;  %v8664_v1 = vmul.f32 0.0013020834, %v499_v15  ;;  %v8666_v5 = vmul.f32 0.0013020834, %v492_v41  ;;  %v8669_v35 = vsub.f32 %v8170_v50, %v610_v54 }
 0x138   : > { %v8672_v26 = vsub.f32 %v8185_v59, %v610_v54  ;;  %950 = vadd.xlane.f32.xlu1 %v949_v23  ;;  %v953_v12 = vadd.f32 %v952_v27, %v801_v22  ;;  %v805_v43 = vmul.f32 %v8656_v55, %v8656_v55  ;;  %v806_v44 = vmul.f32 %v8659_v40, %v8659_v40 }
 0x139   : > { %v942_v63 = vadd.f32 %v941_v46, %v792_v13  ;;  %v8678_v15 = vmul.f32 0.0013020834, %v513_v30  ;;  %v803_v14 = vmul.f32 %v8644_v52, %v8644_v52  ;;  %v804_v50 = vmul.f32 %v8651_v60, %v8651_v60 }
 0x13a   : > { %v506_v42 = vpop.xlane.xlu0 %505  ;;  %v8685_v59 = vsub.f32 %v8200_v18, %v610_v54  ;;  %v954_v41 = vadd.f32 %v953_v12, %v802_v25  ;;  %v807_v33 = vmul.f32 %v8662_v6, %v8662_v6  ;;  %v959_v19 = vadd.f32 %v806_v44, %v805_v43 }
 0x13b   : > { %943 = vadd.xlane.f32.xlu0 %v942_v63  ;;  %v8691_v22 = vsub.f32 %v8139_v31, %v8598_v29  ;;  %v8693_v23 = vmul.f32 0.0013020834, %v506_v42  ;;  %v8697_v30 = vsub.f32 %v8141_v32, %v8598_v29  ;;  %v8701_v18 = vsub.f32 %v8151_v39, %v8598_v29 }
 0x13c   : > { %v8705_v54 = vsub.f32 %v8166_v48, %v8598_v29  ;;  %v955_v46 = vadd.f32 %v954_v41, %v803_v14  ;;  %v808_v31 = vmul.f32 %v8669_v35, %v8669_v35  ;;  %v809_v27 = vmul.f32 %v8672_v26, %v8672_v26 }
 0x13d   : > { %v527_v13 = vpop.xlane.xlu1 %526  ;;  %11167 = vst [vmem:[#allocation128_spill] sm:$0xff] %v8697_v30  ;;  %11168 = vst [vmem:[#allocation129_spill] sm:$0xff] %v8701_v18  ;;  %v960_v42 = vadd.f32 %v959_v19, %v807_v33  ;;  %v8713_v32 = vsub.f32 %v8168_v49, %v8598_v29  ;;  %v811_v39 = vmul.f32 %v8691_v22, %v8691_v22 }
 0x13e   : > { %11169 = vst [vmem:[#allocation130_spill] sm:$0xff] %v8705_v54  ;;  %v812_v48 = vmul.f32 %v8697_v30, %v8697_v30  ;;  %v813_v63 = vmul.f32 %v8701_v18, %v8701_v18  ;;  %v8721_v12 = vmul.f32 0.0013020834, %v527_v13  ;;  %v956_v43 = vadd.f32 %v955_v46, %v804_v50 }
 0x13f   : > { %11170 = vst [vmem:[#allocation131_spill] sm:$0xff] %v8713_v32  ;;  %v810_v44 = vmul.f32 %v8685_v59, %v8685_v59  ;;  %v961_v14 = vadd.f32 %v960_v42, %v808_v31  ;;  %v8727_v49 = vsub.f32 %v8183_v58, %v8598_v29  ;;  %v814_v41 = vmul.f32 %v8705_v54, %v8705_v54 }
 0x140   : > { %v520_v25 = vpop.xlane.xlu0 %519  ;;  %v966_v33 = vadd.f32 %v812_v48, %v811_v39  ;;  %v8733_v19 = vsub.f32 %v8193_v4, %v8635_v21  ;;  %957 = vadd.xlane.f32.xlu0 %v956_v43  ;;  %v8739_v31 = vsub.f32 %v8195_v9, %v8635_v21  ;;  %v8743_v58 = vsub.f32 %v8197_v11, %v8635_v21  ;;  %v11175_v4 = vld [vmem:[#allocation22_spill] sm:$0xff]  ;;  %v11179_v9 = vld [vmem:[#allocation31_spill] sm:$0xff] }
 0x141   : > { %11171 = vst [vmem:[#allocation132_spill] sm:$0xff] %v8727_v49  ;;  %v8735_v18 = vmul.f32 0.0013020834, %v520_v25  ;;  %v962_v50 = vadd.f32 %v961_v14, %v809_v27  ;;  %v815_v29 = vmul.f32 %v8713_v32, %v8713_v32  ;;  %v8749_v25 = vsub.f32 %v11175_v4, %v8635_v21  ;;  %v11177_v27 = vld [vmem:[#allocation27_spill] sm:$0xff] }
 0x142   : > { %11172 = vst [vmem:[#allocation133_spill] sm:$0xff] %v8733_v19  ;;  %11173 = vst [vmem:[#allocation134_spill] sm:$0xff] %v8739_v31  ;;  %v967_v42 = vadd.f32 %v966_v33, %v813_v63  ;;  %v8753_v39 = vsub.f32 %v11177_v27, %v8635_v21  ;;  %v8757_v43 = vsub.f32 %v11179_v9, %v8635_v21 }
 0x143   : > { %v541_v13 = vpop.xlane.xlu1 %540  ;;  %11174 = vst [vmem:[#allocation135_spill] sm:$0xff] %v8743_v58  ;;  %11176 = vst [vmem:[#allocation22_spill] sm:$0xff] %v8749_v25  ;;  %v963_v48 = vadd.f32 %v962_v50, %v810_v44  ;;  %v817_v11 = vmul.f32 %v8733_v19, %v8733_v19  ;;  %v818_v14 = vmul.f32 %v8739_v31, %v8739_v31  ;;  %v11181_v50 = vld [vmem:[#allocation17_spill] sm:$0xff]  ;;  %v11183_v19 = vld [vmem:[#allocation18_spill] sm:$0xff] }
 0x144   : > { %11178 = vst [vmem:[#allocation27_spill] sm:$0xff] %v8753_v39  ;;  %11180 = vst [vmem:[#allocation31_spill] sm:$0xff] %v8757_v43  ;;  %v8763_v63 = vmul.f32 0.0013020834, %v541_v13  ;;  %v816_v4 = vmul.f32 %v8727_v49, %v8727_v49  ;;  %v968_v27 = vadd.f32 %v967_v42, %v814_v41  ;;  %v819_v44 = vmul.f32 %v8743_v58, %v8743_v58  ;;  %v11185_v49 = vld [vmem:[#allocation19_spill] sm:$0xff]  ;;  %v11187_v42 = vld [vmem:[#allocation20_spill] sm:$0xff] }
 0x145   : > { %964 = vadd.xlane.f32.xlu1 %v963_v48  ;;  %v973_v21 = vadd.f32 %v818_v14, %v817_v11  ;;  %v8773_v9 = vsub.f32 %v11181_v50, %v8617_v45  ;;  %v8777_v31 = vsub.f32 %v11183_v19, %v8617_v45  ;;  %v8783_v41 = vsub.f32 %v11185_v49, %v8617_v45 }
 0x146   : > { %v534_v46 = vpop.xlane.xlu0 %533  ;;  %v969_v13 = vadd.f32 %v968_v27, %v815_v29  ;;  %v8787_v48 = vsub.f32 %v11187_v42, %v8617_v45  ;;  %v821_v11 = vmul.f32 %v8753_v39, %v8753_v39  ;;  %v822_v14 = vmul.f32 %v8757_v43, %v8757_v43  ;;  %v11191_v43 = vld [vmem:[#allocation26_spill] sm:$0xff] }
 0x147   : > { %v8765_v33 = vmul.f32 0.0013020834, %v534_v46  ;;  %11182 = vst [vmem:[#allocation17_spill] sm:$0xff] %v8773_v9  ;;  %11184 = vst [vmem:[#allocation18_spill] sm:$0xff] %v8777_v31  ;;  %v820_v46 = vmul.f32 %v8749_v25, %v8749_v25  ;;  %v974_v19 = vadd.f32 %v973_v21, %v819_v44  ;;  %v823_v29 = vmul.f32 %v8773_v9, %v8773_v9  ;;  %v11189_v25 = vld [vmem:[#allocation21_spill] sm:$0xff] }
 0x148   : > { %11186 = vst [vmem:[#allocation19_spill] sm:$0xff] %v8783_v41  ;;  %11188 = vst [vmem:[#allocation20_spill] sm:$0xff] %v8787_v48  ;;  %v970_v27 = vadd.f32 %v969_v13, %v816_v4  ;;  %v8797_v49 = vsub.f32 %v11189_v25, %v8617_v45  ;;  %v824_v42 = vmul.f32 %v8777_v31, %v8777_v31  ;;  %v11193_v21 = vld [vmem:[#allocation29_spill] sm:$0xff]  ;;  %v11195_v31 = vld [vmem:[#allocation30_spill] sm:$0xff] }
 0x149   : > { %v555_v50 = vpop.xlane.xlu1 %554  ;;  %v825_v58 = vmul.f32 %v8783_v41, %v8783_v41  ;;  %v975_v39 = vadd.f32 %v974_v19, %v820_v46  ;;  %v8805_v44 = vsub.f32 %v11191_v43, %v8617_v45  ;;  %v826_v4 = vmul.f32 %v8787_v48, %v8787_v48  ;;  %v11197_v46 = vld [vmem:[#allocation33_spill] sm:$0xff]  ;;  %v11199_v45 = vld [vmem:[#allocation38_spill] sm:$0xff] }
 0x14a   : > { %11190 = vst [vmem:[#allocation21_spill] sm:$0xff] %v8797_v49  ;;  %v8811_v13 = vsub.f32 %v11193_v21, %v8666_v5  ;;  %971 = vadd.xlane.f32.xlu0 %v970_v27  ;;  %v980_v25 = vadd.f32 %v824_v42, %v823_v29  ;;  %v8815_v9 = vsub.f32 %v11195_v31, %v8666_v5  ;;  %v8825_v48 = vmul.f32 0.0013020834, %v555_v50  ;;  %v11201_v21 = vld [vmem:[#allocation39_spill] sm:$0xff]  ;;  %v11203_v42 = vld [vmem:[#allocation44_spill] sm:$0xff] }
 0x14b   : > { %11192 = vst [vmem:[#allocation26_spill] sm:$0xff] %v8805_v44  ;;  %v8819_v19 = vsub.f32 %v11197_v46, %v8666_v5  ;;  %v8823_v43 = vsub.f32 %v11199_v45, %v8666_v5  ;;  %v976_v41 = vadd.f32 %v975_v39, %v821_v11  ;;  %v8829_v54 = vsub.f32 %v11201_v21, %v8666_v5 }
 0x14c   : > { %v548_v32 = vpop.xlane.xlu0 %547  ;;  %11194 = vst [vmem:[#allocation29_spill] sm:$0xff] %v8811_v13  ;;  %11196 = vst [vmem:[#allocation30_spill] sm:$0xff] %v8815_v9  ;;  %v829_v29 = vmul.f32 %v8811_v13, %v8811_v13  ;;  %v981_v27 = vadd.f32 %v980_v25, %v825_v58  ;;  %v8837_v46 = vsub.f32 %v11203_v42, %v8666_v5  ;;  %v11205_v5 = vld [vmem:[#allocation23_spill] sm:$0xff]  ;;  %v11209_v13 = vld [vmem:[#allocation25_spill] sm:$0xff] }
 0x14d   : > { %11198 = vst [vmem:[#allocation33_spill] sm:$0xff] %v8819_v19  ;;  %11200 = vst [vmem:[#allocation38_spill] sm:$0xff] %v8823_v43  ;;  %v8833_v31 = vmul.f32 0.0013020834, %v548_v32  ;;  %v830_v45 = vmul.f32 %v8815_v9, %v8815_v9  ;;  %v977_v39 = vadd.f32 %v976_v41, %v822_v14  ;;  %v827_v11 = vmul.f32 %v8797_v49, %v8797_v49  ;;  %v11207_v14 = vld [vmem:[#allocation24_spill] sm:$0xff] }
 0x14e   : > { %11202 = vst [vmem:[#allocation39_spill] sm:$0xff] %v8829_v54  ;;  %11204 = vst [vmem:[#allocation44_spill] sm:$0xff] %v8837_v46  ;;  %v828_v50 = vmul.f32 %v8805_v44, %v8805_v44  ;;  %v831_v21 = vmul.f32 %v8819_v19, %v8819_v19  ;;  %v982_v32 = vadd.f32 %v981_v27, %v826_v4  ;;  %v11211_v4 = vld [vmem:[#allocation28_spill] sm:$0xff] }
 0x14f   : > { %v832_v58 = vmul.f32 %v8823_v43, %v8823_v43  ;;  %v987_v25 = vadd.f32 %v830_v45, %v829_v29  ;;  %v8851_v42 = vsub.f32 %v11205_v5, %v8664_v1  ;;  %978 = vadd.xlane.f32.xlu1 %v977_v39  ;;  %v833_v41 = vmul.f32 %v8829_v54, %v8829_v54  ;;  %v569_v54 = vpop.xlane.xlu1 %568 }
 0x150   : > { %v8857_v9 = vsub.f32 %v11207_v14, %v8664_v1  ;;  %v8861_v19 = vsub.f32 %v11209_v13, %v8664_v1  ;;  %v8865_v27 = vsub.f32 %v11211_v4, %v8664_v1  ;;  %v983_v29 = vadd.f32 %v982_v32, %v827_v11  ;;  %v11213_v14 = vld [vmem:[#allocation32_spill] sm:$0xff]  ;;  %v11215_v13 = vld [vmem:[#allocation34_spill] sm:$0xff] }
 0x151   : > { %11206 = vst [vmem:[#allocation23_spill] sm:$0xff] %v8851_v42  ;;  %v834_v45 = vmul.f32 %v8837_v46, %v8837_v46  ;;  %v988_v39 = vadd.f32 %v987_v25, %v831_v21  ;;  %v835_v5 = vmul.f32 %v8851_v42, %v8851_v42  ;;  %v8873_v43 = vsub.f32 %v11213_v14, %v8664_v1  ;;  %v11217_v46 = vld [vmem:[#allocation41_spill] sm:$0xff] }
 0x152   : > { %11208 = vst [vmem:[#allocation24_spill] sm:$0xff] %v8857_v9  ;;  %11210 = vst [vmem:[#allocation25_spill] sm:$0xff] %v8861_v19  ;;  %v8877_v44 = vsub.f32 %v11215_v13, %v8664_v1  ;;  %v836_v4 = vmul.f32 %v8857_v9, %v8857_v9  ;;  %v837_v11 = vmul.f32 %v8861_v19, %v8861_v19  ;;  %v562_v25 = vpop.xlane.xlu0 %561  ;;  %v11219_v1 = vld [vmem:[#allocation42_spill] sm:$0xff]  ;;  %v11221_v9 = vld [vmem:[#allocation43_spill] sm:$0xff] }
 0x153   : > { %11212 = vst [vmem:[#allocation28_spill] sm:$0xff] %v8865_v27  ;;  %11214 = vst [vmem:[#allocation32_spill] sm:$0xff] %v8873_v43  ;;  %v984_v32 = vadd.f32 %v983_v29, %v828_v50  ;;  %v989_v21 = vadd.f32 %v988_v39, %v832_v58  ;;  %v838_v42 = vmul.f32 %v8865_v27, %v8865_v27  ;;  %v11223_v50 = vld [vmem:[#allocation46_spill] sm:$0xff]  ;;  %v8901_v39 = vmul.f32 0.0013020834, %v569_v54 }
 0x154   : > { %11216 = vst [vmem:[#allocation34_spill] sm:$0xff] %v8877_v44  ;;  %v8887_v14 = vsub.f32 %v11217_v46, %v8693_v23  ;;  %v994_v49 = vadd.f32 %v836_v4, %v835_v5  ;;  %v8891_v13 = vsub.f32 %v11219_v1, %v8693_v23  ;;  %v8895_v30 = vsub.f32 %v11221_v9, %v8693_v23  ;;  %v11225_v46 = vld [vmem:[#allocation51_spill] sm:$0xff]  ;;  %v11227_v9 = vld [vmem:[#allocation56_spill] sm:$0xff] }
 0x155   : > { %v8899_v58 = vsub.f32 %v11223_v50, %v8693_v23  ;;  %985 = vadd.xlane.f32.xlu0 %v984_v32  ;;  %v990_v29 = vadd.f32 %v989_v21, %v833_v41  ;;  %v8905_v27 = vsub.f32 %v11225_v46, %v8693_v23  ;;  %v8909_v4 = vmul.f32 0.0013020834, %v562_v25 }
 0x156   : > { %11218 = vst [vmem:[#allocation41_spill] sm:$0xff] %v8887_v14  ;;  %11220 = vst [vmem:[#allocation42_spill] sm:$0xff] %v8891_v13  ;;  %v841_v5 = vmul.f32 %v8887_v14, %v8887_v14  ;;  %v995_v1 = vadd.f32 %v994_v49, %v837_v11  ;;  %v8913_v19 = vsub.f32 %v11227_v9, %v8693_v23  ;;  %v11229_v23 = vld [vmem:[#allocation35_spill] sm:$0xff] }
 0x157   : > { %11222 = vst [vmem:[#allocation43_spill] sm:$0xff] %v8895_v30  ;;  %11224 = vst [vmem:[#allocation46_spill] sm:$0xff] %v8899_v58  ;;  %v842_v32 = vmul.f32 %v8891_v13, %v8891_v13  ;;  %v991_v41 = vadd.f32 %v990_v29, %v834_v45  ;;  %v839_v54 = vmul.f32 %v8873_v43, %v8873_v43  ;;  %v11231_v29 = vld [vmem:[#allocation36_spill] sm:$0xff]  ;;  %v11233_v13 = vld [vmem:[#allocation37_spill] sm:$0xff] }
 0x158   : > { %11226 = vst [vmem:[#allocation51_spill] sm:$0xff] %v8905_v27  ;;  %11228 = vst [vmem:[#allocation56_spill] sm:$0xff] %v8913_v19  ;;  %v840_v21 = vmul.f32 %v8877_v44, %v8877_v44  ;;  %v843_v50 = vmul.f32 %v8895_v30, %v8895_v30  ;;  %v996_v25 = vadd.f32 %v995_v1, %v838_v42  ;;  %v11235_v42 = vld [vmem:[#allocation40_spill] sm:$0xff] }
 0x159   : > { %v844_v49 = vmul.f32 %v8899_v58, %v8899_v58  ;;  %v1001_v11 = vadd.f32 %v842_v32, %v841_v5  ;;  %v8927_v46 = vsub.f32 %v11229_v23, %v8678_v15  ;;  %992 = vadd.xlane.f32.xlu1 %v991_v41  ;;  %v845_v45 = vmul.f32 %v8905_v27, %v8905_v27  ;;  %v583_v27 = vpop.xlane.xlu1 %582 }
 0x15a   : > { %v8933_v9 = vsub.f32 %v11231_v29, %v8678_v15  ;;  %v8937_v30 = vsub.f32 %v11233_v13, %v8678_v15  ;;  %v8941_v1 = vsub.f32 %v11235_v42, %v8678_v15  ;;  %v997_v5 = vadd.f32 %v996_v25, %v839_v54  ;;  %v11237_v29 = vld [vmem:[#allocation45_spill] sm:$0xff]  ;;  %v11239_v13 = vld [vmem:[#allocation50_spill] sm:$0xff] }
 0x15b   : > { %11230 = vst [vmem:[#allocation35_spill] sm:$0xff] %v8927_v46  ;;  %v846_v32 = vmul.f32 %v8913_v19, %v8913_v19  ;;  %v1002_v41 = vadd.f32 %v1001_v11, %v843_v50  ;;  %v847_v23 = vmul.f32 %v8927_v46, %v8927_v46  ;;  %v8949_v58 = vsub.f32 %v11237_v29, %v8678_v15  ;;  %v576_v11 = vpop.xlane.xlu0 %575  ;;  %v11241_v19 = vld [vmem:[#allocation53_spill] sm:$0xff] }
 0x15c   : > { %11232 = vst [vmem:[#allocation36_spill] sm:$0xff] %v8933_v9  ;;  %11234 = vst [vmem:[#allocation37_spill] sm:$0xff] %v8937_v30  ;;  %v8953_v14 = vsub.f32 %v11239_v13, %v8678_v15  ;;  %v848_v42 = vmul.f32 %v8933_v9, %v8933_v9  ;;  %v849_v54 = vmul.f32 %v8937_v30, %v8937_v30  ;;  %v11243_v15 = vld [vmem:[#allocation54_spill] sm:$0xff]  ;;  %v11245_v9 = vld [vmem:[#allocation55_spill] sm:$0xff] }
 0x15d   : > { %11236 = vst [vmem:[#allocation40_spill] sm:$0xff] %v8941_v1  ;;  %11238 = vst [vmem:[#allocation45_spill] sm:$0xff] %v8949_v58  ;;  %v998_v25 = vadd.f32 %v997_v5, %v840_v21  ;;  %v1003_v50 = vadd.f32 %v1002_v41, %v844_v49  ;;  %v850_v46 = vmul.f32 %v8941_v1, %v8941_v1  ;;  %v11247_v21 = vld [vmem:[#allocation58_spill] sm:$0xff]  ;;  %v8977_v41 = vmul.f32 0.0013020834, %v583_v27 }
 0x15e   : > { %11240 = vst [vmem:[#allocation50_spill] sm:$0xff] %v8953_v14  ;;  %v8963_v29 = vsub.f32 %v11241_v19, %v8735_v18  ;;  %v1008_v44 = vadd.f32 %v848_v42, %v847_v23  ;;  %v8967_v13 = vsub.f32 %v11243_v15, %v8735_v18  ;;  %v8971_v43 = vsub.f32 %v11245_v9, %v8735_v18  ;;  %v11249_v19 = vld [vmem:[#allocation62_spill] sm:$0xff]  ;;  %v11251_v9 = vld [vmem:[#allocation64_spill] sm:$0xff] }
 0x15f   : > { %v8975_v49 = vsub.f32 %v11247_v21, %v8735_v18  ;;  %999 = vadd.xlane.f32.xlu0 %v998_v25  ;;  %v1004_v5 = vadd.f32 %v1003_v50, %v845_v45  ;;  %v8981_v1 = vsub.f32 %v11249_v19, %v8735_v18  ;;  %v8985_v42 = vmul.f32 0.0013020834, %v576_v11  ;;  %v11253_v19 = vld [vmem:[#allocation47_spill] sm:$0xff] }
 0x160   : > { %11242 = vst [vmem:[#allocation53_spill] sm:$0xff] %v8963_v29  ;;  %11244 = vst [vmem:[#allocation54_spill] sm:$0xff] %v8967_v13  ;;  %v853_v23 = vmul.f32 %v8963_v29, %v8963_v29  ;;  %v1009_v15 = vadd.f32 %v1008_v44, %v849_v54  ;;  %v8989_v30 = vsub.f32 %v11251_v9, %v8735_v18  ;;  %v597_v18 = vpop.xlane.xlu1 %596 }
 0x161   : > { %11246 = vst [vmem:[#allocation55_spill] sm:$0xff] %v8971_v43  ;;  %11248 = vst [vmem:[#allocation58_spill] sm:$0xff] %v8975_v49  ;;  %v854_v25 = vmul.f32 %v8967_v13, %v8967_v13  ;;  %v1005_v45 = vadd.f32 %v1004_v5, %v846_v32  ;;  %v851_v27 = vmul.f32 %v8949_v58, %v8949_v58  ;;  %v11255_v5 = vld [vmem:[#allocation48_spill] sm:$0xff] }
 0x162   : > { %11250 = vst [vmem:[#allocation62_spill] sm:$0xff] %v8981_v1  ;;  %11252 = vst [vmem:[#allocation64_spill] sm:$0xff] %v8989_v30  ;;  %v852_v50 = vmul.f32 %v8953_v14, %v8953_v14  ;;  %v855_v21 = vmul.f32 %v8971_v43, %v8971_v43  ;;  %v1010_v11 = vadd.f32 %v1009_v15, %v850_v46  ;;  %v11257_v43 = vld [vmem:[#allocation49_spill] sm:$0xff]  ;;  %v11259_v15 = vld [vmem:[#allocation52_spill] sm:$0xff]  ;;  %v590_v14 = vpop.xlane.xlu0 %589 }
 0x163   : > { %v856_v44 = vmul.f32 %v8975_v49, %v8975_v49  ;;  %v1015_v54 = vadd.f32 %v854_v25, %v853_v23  ;;  %v9003_v9 = vsub.f32 %v11253_v19, %v8721_v12  ;;  %1006 = vadd.xlane.f32.xlu1 %v1005_v45  ;;  %v857_v32 = vmul.f32 %v8981_v1, %v8981_v1 }
 0x164   : > { %v9009_v13 = vsub.f32 %v11255_v5, %v8721_v12  ;;  %v9013_v46 = vsub.f32 %v11257_v43, %v8721_v12  ;;  %v9017_v23 = vsub.f32 %v11259_v15, %v8721_v12  ;;  %v1011_v25 = vadd.f32 %v1010_v11, %v851_v27  ;;  %v11261_v5 = vld [vmem:[#allocation57_spill] sm:$0xff] }
 0x165   : > { %11254 = vst [vmem:[#allocation47_spill] sm:$0xff] %v9003_v9  ;;  %v858_v19 = vmul.f32 %v8989_v30, %v8989_v30  ;;  %v1016_v45 = vadd.f32 %v1015_v54, %v855_v21  ;;  %v859_v1 = vmul.f32 %v9003_v9, %v9003_v9  ;;  %v9023_v49 = vmul.f32 0.0013020834, %v597_v18  ;;  %v11263_v21 = vld [vmem:[#allocation61_spill] sm:$0xff] }
 0x166   : > { %11256 = vst [vmem:[#allocation48_spill] sm:$0xff] %v9009_v13  ;;  %11258 = vst [vmem:[#allocation49_spill] sm:$0xff] %v9013_v46  ;;  %v9027_v29 = vsub.f32 %v11261_v5, %v8721_v12  ;;  %v860_v43 = vmul.f32 %v9009_v13, %v9009_v13  ;;  %v861_v15 = vmul.f32 %v9013_v46, %v9013_v46  ;;  %v11264_v18 = vld [vmem:[#allocation65_spill] sm:$0xff]  ;;  %v11266_v13 = vld [vmem:[#allocation66_spill] sm:$0xff] }
 0x167   : > { %11260 = vst [vmem:[#allocation52_spill] sm:$0xff] %v9017_v23  ;;  %v1012_v27 = vadd.f32 %v1011_v25, %v852_v50  ;;  %v1017_v11 = vadd.f32 %v1016_v45, %v856_v44  ;;  %v9035_v54 = vsub.f32 %v11263_v21, %v8721_v12  ;;  %v9039_v9 = vsub.f32 %v11264_v18, %v8765_v33  ;;  %v11267_v50 = vld [vmem:[#allocation67_spill] sm:$0xff]  ;;  %v11269_v12 = vld [vmem:[#allocation70_spill] sm:$0xff] }
 0x168   : > { %11262 = vst [vmem:[#allocation57_spill] sm:$0xff] %v9027_v29  ;;  %v862_v5 = vmul.f32 %v9017_v23, %v9017_v23  ;;  %v1022_v30 = vadd.f32 %v860_v43, %v859_v1  ;;  %v9045_v58 = vsub.f32 %v11266_v13, %v8765_v33  ;;  %v9049_v44 = vsub.f32 %v11267_v50, %v8765_v33  ;;  %v11271_v21 = vld [vmem:[#allocation75_spill] sm:$0xff] }
 0x169   : > { %11265 = vst [vmem:[#allocation61_spill] sm:$0xff] %v9039_v9  ;;  %1013 = vadd.xlane.f32.xlu0 %v1012_v27  ;;  %v1018_v25 = vadd.f32 %v1017_v11, %v857_v32  ;;  %v9053_v45 = vsub.f32 %v11269_v12, %v8765_v33  ;;  %v9057_v18 = vsub.f32 %v11271_v21, %v8765_v33  ;;  %v9061_v43 = vmul.f32 0.0013020834, %v590_v14  ;;  %v11273_v12 = vld [vmem:[#allocation80_spill] sm:$0xff]  ;;  %v11274_v46 = vld [vmem:[#allocation59_spill] sm:$0xff] }
 0x16a   : > { %11268 = vst [vmem:[#allocation65_spill] sm:$0xff] %v9049_v44  ;;  %v865_v1 = vmul.f32 %v9039_v9, %v9039_v9  ;;  %v863_v13 = vmul.f32 %v9027_v29, %v9027_v29  ;;  %v1023_v50 = vadd.f32 %v1022_v30, %v861_v15  ;;  %v866_v32 = vmul.f32 %v9045_v58, %v9045_v58  ;;  %v11276_v30 = vld [vmem:[#allocation60_spill] sm:$0xff] }
 0x16b   : > { %11270 = vst [vmem:[#allocation66_spill] sm:$0xff] %v9053_v45  ;;  %11272 = vst [vmem:[#allocation67_spill] sm:$0xff] %v9057_v18  ;;  %v1019_v27 = vadd.f32 %v1018_v25, %v858_v19  ;;  %v864_v11 = vmul.f32 %v9035_v54, %v9035_v54  ;;  %v9071_v21 = vsub.f32 %v11273_v12, %v8765_v33  ;;  %v11278_v25 = vld [vmem:[#allocation63_spill] sm:$0xff] }
 0x16c   : > { %v867_v9 = vmul.f32 %v9049_v44, %v9049_v44  ;;  %v1024_v14 = vadd.f32 %v1023_v50, %v862_v5  ;;  %v1029_v23 = vadd.f32 %v866_v32, %v865_v1  ;;  %v9077_v29 = vsub.f32 %v11274_v46, %v8763_v63  ;;  %v11280_v5 = vld [vmem:[#allocation68_spill] sm:$0xff]  ;;  %v11288_v44 = vld [vmem:[#allocation78_spill] sm:$0xff] }
 0x16d   : > { %v9081_v15 = vsub.f32 %v11276_v30, %v8763_v63  ;;  %1020 = vadd.xlane.f32.xlu1 %v1019_v27  ;;  %v868_v19 = vmul.f32 %v9053_v45, %v9053_v45  ;;  %v869_v33 = vmul.f32 %v9057_v18, %v9057_v18  ;;  %v9089_v12 = vsub.f32 %v11278_v25, %v8763_v63  ;;  %v11282_v30 = vld [vmem:[#allocation69_spill] sm:$0xff]  ;;  %v11284_v18 = vld [vmem:[#allocation74_spill] sm:$0xff] }
 0x16e   : > { %11275 = vst [vmem:[#allocation70_spill] sm:$0xff] %v9077_v29  ;;  %v9093_v1 = vsub.f32 %v11280_v5, %v8763_v63  ;;  %v1025_v46 = vadd.f32 %v1024_v14, %v863_v13  ;;  %v1030_v50 = vadd.f32 %v1029_v23, %v867_v9  ;;  %v871_v32 = vmul.f32 %v9077_v29, %v9077_v29  ;;  %v11286_v29 = vld [vmem:[#allocation77_spill] sm:$0xff] }
 0x16f   : > { %11277 = vst [vmem:[#allocation75_spill] sm:$0xff] %v9081_v15  ;;  %11279 = vst [vmem:[#allocation80_spill] sm:$0xff] %v9089_v12  ;;  %v872_v27 = vmul.f32 %v9081_v15, %v9081_v15  ;;  %v9101_v45 = vsub.f32 %v11282_v30, %v8763_v63  ;;  %v9105_v25 = vsub.f32 %v11284_v18, %v8763_v63  ;;  %v11290_v18 = vld [vmem:[#allocation79_spill] sm:$0xff] }
 0x170   : > { %11281 = vst [vmem:[#allocation59_spill] sm:$0xff] %v9093_v1  ;;  %v873_v5 = vmul.f32 %v9089_v12, %v9089_v12  ;;  %v874_v9 = vmul.f32 %v9093_v1, %v9093_v1  ;;  %v1026_v23 = vadd.f32 %v1025_v46, %v864_v11  ;;  %v1031_v13 = vadd.f32 %v1030_v50, %v868_v19  ;;  %v11291_v1 = vld [vmem:[#allocation82_spill] sm:$0xff] }
 0x171   : > { %11283 = vst [vmem:[#allocation60_spill] sm:$0xff] %v9101_v45  ;;  %11285 = vst [vmem:[#allocation63_spill] sm:$0xff] %v9105_v25  ;;  %v1036_v14 = vadd.f32 %v872_v27, %v871_v32  ;;  %v9113_v15 = vsub.f32 %v11286_v29, %v8833_v31  ;;  %v870_v30 = vmul.f32 %v9071_v21, %v9071_v21  ;;  %v11293_v29 = vld [vmem:[#allocation87_spill] sm:$0xff] }
 0x172   : > { %v9119_v63 = vsub.f32 %v11288_v44, %v8833_v31  ;;  %v9123_v12 = vsub.f32 %v11290_v18, %v8833_v31  ;;  %v9127_v11 = vsub.f32 %v11291_v1, %v8833_v31  ;;  %1027 = vadd.xlane.f32.xlu0 %v1026_v23  ;;  %v1032_v19 = vadd.f32 %v1031_v13, %v869_v33  ;;  %v11295_v18 = vld [vmem:[#allocation91_spill] sm:$0xff] }
 0x173   : > { %11287 = vst [vmem:[#allocation68_spill] sm:$0xff] %v9113_v15  ;;  %v1037_v46 = vadd.f32 %v1036_v14, %v873_v5  ;;  %v9131_v50 = vsub.f32 %v11293_v29, %v8833_v31  ;;  %v877_v32 = vmul.f32 %v9113_v15, %v9113_v15  ;;  %v875_v44 = vmul.f32 %v9101_v45, %v9101_v45  ;;  %v11296_v14 = vld [vmem:[#allocation71_spill] sm:$0xff]  ;;  %v11298_v45 = vld [vmem:[#allocation72_spill] sm:$0xff] }
 0x174   : > { %11289 = vst [vmem:[#allocation69_spill] sm:$0xff] %v9119_v63  ;;  %11292 = vst [vmem:[#allocation74_spill] sm:$0xff] %v9127_v11  ;;  %v876_v27 = vmul.f32 %v9105_v25, %v9105_v25  ;;  %v9141_v1 = vsub.f32 %v11295_v18, %v8833_v31  ;;  %v878_v33 = vmul.f32 %v9119_v63, %v9119_v63  ;;  %v11300_v31 = vld [vmem:[#allocation73_spill] sm:$0xff]  ;;  %v11302_v63 = vld [vmem:[#allocation76_spill] sm:$0xff] }
 0x175   : > { %11294 = vst [vmem:[#allocation77_spill] sm:$0xff] %v9131_v50  ;;  %v1033_v5 = vadd.f32 %v1032_v19, %v870_v30  ;;  %v1038_v23 = vadd.f32 %v1037_v46, %v874_v9  ;;  %v879_v13 = vmul.f32 %v9123_v12, %v9123_v12  ;;  %v9149_v29 = vsub.f32 %v11296_v14, %v8825_v48 }
 0x176   : > { %v1043_v15 = vadd.f32 %v878_v33, %v877_v32  ;;  %v9153_v25 = vsub.f32 %v11298_v45, %v8825_v48  ;;  %v9157_v18 = vsub.f32 %v11300_v31, %v8825_v48  ;;  %v9161_v30 = vsub.f32 %v11302_v63, %v8825_v48  ;;  %v11304_v33 = vld [vmem:[#allocation81_spill] sm:$0xff] }
 0x177   : > { %11297 = vst [vmem:[#allocation78_spill] sm:$0xff] %v9149_v29  ;;  %1034 = vadd.xlane.f32.xlu1 %v1033_v5  ;;  %v1039_v9 = vadd.f32 %v1038_v23, %v875_v44  ;;  %v880_v19 = vmul.f32 %v9127_v11, %v9127_v11  ;;  %v881_v46 = vmul.f32 %v9131_v50, %v9131_v50  ;;  %v11306_v23 = vld [vmem:[#allocation86_spill] sm:$0xff] }
 0x178   : > { %11299 = vst [vmem:[#allocation79_spill] sm:$0xff] %v9153_v25  ;;  %11301 = vst [vmem:[#allocation82_spill] sm:$0xff] %v9157_v18  ;;  %v883_v45 = vmul.f32 %v9149_v29, %v9149_v29  ;;  %v1044_v32 = vadd.f32 %v1043_v15, %v879_v13  ;;  %v9171_v14 = vsub.f32 %v11304_v33, %v8825_v48  ;;  %v11308_v15 = vld [vmem:[#allocation89_spill] sm:$0xff]  ;;  %v11310_v11 = vld [vmem:[#allocation90_spill] sm:$0xff] }
 0x179   : > { %11303 = vst [vmem:[#allocation87_spill] sm:$0xff] %v9161_v30  ;;  %v884_v63 = vmul.f32 %v9153_v25, %v9153_v25  ;;  %v885_v44 = vmul.f32 %v9157_v18, %v9157_v18  ;;  %v1040_v5 = vadd.f32 %v1039_v9, %v876_v27  ;;  %v9179_v31 = vsub.f32 %v11306_v23, %v8825_v48  ;;  %v11312_v18 = vld [vmem:[#allocation93_spill] sm:$0xff]  ;;  %v11314_v9 = vld [vmem:[#allocation98_spill] sm:$0xff] }
 0x17a   : > { %11305 = vst [vmem:[#allocation91_spill] sm:$0xff] %v9171_v14  ;;  %v886_v50 = vmul.f32 %v9161_v30, %v9161_v30  ;;  %v9185_v13 = vsub.f32 %v11308_v15, %v8909_v4  ;;  %v1045_v33 = vadd.f32 %v1044_v32, %v880_v19  ;;  %v9189_v25 = vsub.f32 %v11310_v11, %v8909_v4  ;;  %v11315_v15 = vld [vmem:[#allocation99_spill] sm:$0xff] }
 0x17b   : > { %11307 = vst [vmem:[#allocation71_spill] sm:$0xff] %v9179_v31  ;;  %v1050_v29 = vadd.f32 %v884_v63, %v883_v45  ;;  %v9193_v27 = vsub.f32 %v11312_v18, %v8909_v4  ;;  %1041 = vadd.xlane.f32.xlu0 %v1040_v5  ;;  %v882_v48 = vmul.f32 %v9141_v1, %v9141_v1 }
 0x17c   : > { %11309 = vst [vmem:[#allocation72_spill] sm:$0xff] %v9185_v13  ;;  %11311 = vst [vmem:[#allocation73_spill] sm:$0xff] %v9189_v25  ;;  %v9199_v23 = vsub.f32 %v11314_v9, %v8909_v4  ;;  %v9203_v19 = vsub.f32 %v11315_v15, %v8909_v4  ;;  %v889_v11 = vmul.f32 %v9185_v13, %v9185_v13  ;;  %v11316_v13 = vld [vmem:[#allocation83_spill] sm:$0xff] }
 0x17d   : > { %11313 = vst [vmem:[#allocation76_spill] sm:$0xff] %v9193_v27  ;;  %v1046_v45 = vadd.f32 %v1045_v33, %v881_v46  ;;  %v887_v18 = vmul.f32 %v9171_v14, %v9171_v14  ;;  %v1051_v32 = vadd.f32 %v1050_v29, %v885_v44  ;;  %v890_v63 = vmul.f32 %v9189_v25, %v9189_v25  ;;  %v11318_v44 = vld [vmem:[#allocation84_spill] sm:$0xff] }
 0x17e   : > { %v888_v5 = vmul.f32 %v9179_v31, %v9179_v31  ;;  %v9215_v9 = vsub.f32 %v8453_v28, %v8909_v4  ;;  %v891_v15 = vmul.f32 %v9193_v27, %v9193_v27  ;;  %v9221_v46 = vsub.f32 %v11316_v13, %v8901_v39  ;;  %v11320_v4 = vld [vmem:[#allocation85_spill] sm:$0xff]  ;;  %v11322_v13 = vld [vmem:[#allocation88_spill] sm:$0xff] }
 0x17f   : > { %v1047_v33 = vadd.f32 %v1046_v45, %v882_v48  ;;  %v1052_v14 = vadd.f32 %v1051_v32, %v886_v50  ;;  %v1057_v29 = vadd.f32 %v890_v63, %v889_v11  ;;  %v9225_v25 = vsub.f32 %v11318_v44, %v8901_v39  ;;  %v11323_v32 = vld [vmem:[#allocation92_spill] sm:$0xff]  ;;  %v11324_v44 = vld [vmem:[#allocation94_spill] sm:$0xff] }
 0x180   : > { %11317 = vst [vmem:[#allocation81_spill] sm:$0xff] %v9221_v46  ;;  %v892_v31 = vmul.f32 %v9199_v23, %v9199_v23  ;;  %v893_v28 = vmul.f32 %v9203_v19, %v9203_v19  ;;  %v9233_v27 = vsub.f32 %v11320_v4, %v8901_v39  ;;  %v9237_v30 = vsub.f32 %v11322_v13, %v8901_v39 }
 0x181   : > { %11319 = vst [vmem:[#allocation86_spill] sm:$0xff] %v9225_v25  ;;  %1048 = vadd.xlane.f32.xlu1 %v1047_v33  ;;  %v1053_v50 = vadd.f32 %v1052_v14, %v887_v18  ;;  %v1058_v48 = vadd.f32 %v1057_v29, %v891_v15  ;;  %v895_v11 = vmul.f32 %v9221_v46, %v9221_v46  ;;  %v11325_v29 = vld [vmem:[#allocation101_spill] sm:$0xff]  ;;  %v11327_v46 = vld [vmem:[#allocation102_spill] sm:$0xff] }
 0x182   : > { %11321 = vst [vmem:[#allocation89_spill] sm:$0xff] %v9233_v27  ;;  %v896_v45 = vmul.f32 %v9225_v25, %v9225_v25  ;;  %v9245_v63 = vsub.f32 %v11323_v32, %v8901_v39  ;;  %v9249_v4 = vsub.f32 %v11324_v44, %v8901_v39  ;;  %v897_v13 = vmul.f32 %v9233_v27, %v9233_v27  ;;  %v11329_v44 = vld [vmem:[#allocation103_spill] sm:$0xff] }
 0x183   : > { %v898_v14 = vmul.f32 %v9237_v30, %v9237_v30  ;;  %v1054_v18 = vadd.f32 %v1053_v50, %v888_v5  ;;  %v1059_v15 = vadd.f32 %v1058_v48, %v892_v31  ;;  %v9257_v25 = vsub.f32 %v11325_v29, %v8985_v42 }
 0x184   : > { %v1064_v33 = vadd.f32 %v896_v45, %v895_v11  ;;  %v894_v32 = vmul.f32 %v9215_v9, %v9215_v9  ;;  %v9263_v39 = vsub.f32 %v11327_v46, %v8985_v42  ;;  %v9267_v27 = vsub.f32 %v11329_v44, %v8985_v42  ;;  %v11335_v44 = vld [vmem:[#allocation96_spill] sm:$0xff] }
 0x185   : > { %11326 = vst [vmem:[#allocation90_spill] sm:$0xff] %v9257_v25  ;;  %v9271_v5 = vsub.f32 %v8458_v47, %v8985_v42  ;;  %1055 = vadd.xlane.f32.xlu0 %v1054_v18  ;;  %v1060_v31 = vadd.f32 %v1059_v15, %v893_v28  ;;  %v9275_v48 = vsub.f32 %v8473_v38, %v8985_v42  ;;  %v11333_v15 = vld [vmem:[#allocation95_spill] sm:$0xff] }
 0x186   : > { %11328 = vst [vmem:[#allocation93_spill] sm:$0xff] %v9263_v39  ;;  %11330 = vst [vmem:[#allocation98_spill] sm:$0xff] %v9267_v27  ;;  %v1065_v50 = vadd.f32 %v1064_v33, %v897_v13  ;;  %v901_v11 = vmul.f32 %v9257_v25, %v9257_v25  ;;  %v899_v46 = vmul.f32 %v9245_v63, %v9245_v63 }
 0x187   : > { %11331 = vst [vmem:[#allocation99_spill] sm:$0xff] %v9271_v5  ;;  %11332 = vst [vmem:[#allocation83_spill] sm:$0xff] %v9275_v48  ;;  %v900_v45 = vmul.f32 %v9249_v4, %v9249_v4  ;;  %v9285_v47 = vsub.f32 %v8488_v57, %v8985_v42  ;;  %v902_v28 = vmul.f32 %v9263_v39, %v9263_v39  ;;  %v11337_v57 = vld [vmem:[#allocation97_spill] sm:$0xff]  ;;  %v11339_v39 = vld [vmem:[#allocation100_spill] sm:$0xff] }
 0x188   : > { %v1061_v13 = vadd.f32 %v1060_v31, %v894_v32  ;;  %v1066_v18 = vadd.f32 %v1065_v50, %v898_v14  ;;  %v903_v38 = vmul.f32 %v9267_v27, %v9267_v27  ;;  %v9293_v33 = vsub.f32 %v11333_v15, %v8977_v41  ;;  %v11345_v27 = vld [vmem:[#allocation111_spill] sm:$0xff] }
 0x189   : > { %v1071_v29 = vadd.f32 %v902_v28, %v901_v11  ;;  %v9297_v25 = vsub.f32 %v11335_v44, %v8977_v41  ;;  %v9301_v42 = vsub.f32 %v11337_v57, %v8977_v41  ;;  %v9305_v32 = vsub.f32 %v11339_v39, %v8977_v41  ;;  %v604_v28 = vpop.xlane.xlu0 %603  ;;  %v11340_v44 = vld [vmem:[#allocation104_spill] sm:$0xff] }
 0x18a   : > { %11334 = vst [vmem:[#allocation84_spill] sm:$0xff] %v9293_v33  ;;  %1062 = vadd.xlane.f32.xlu1 %v1061_v13  ;;  %v1067_v14 = vadd.f32 %v1066_v18, %v899_v46  ;;  %v904_v31 = vmul.f32 %v9271_v5, %v9271_v5  ;;  %v905_v50 = vmul.f32 %v9275_v48, %v9275_v48  ;;  %v11341_v18 = vld [vmem:[#allocation108_spill] sm:$0xff] }
 0x18b   : > { %11336 = vst [vmem:[#allocation85_spill] sm:$0xff] %v9297_v25  ;;  %11338 = vst [vmem:[#allocation88_spill] sm:$0xff] %v9301_v42  ;;  %v907_v11 = vmul.f32 %v9293_v33, %v9293_v33  ;;  %v1072_v15 = vadd.f32 %v1071_v29, %v903_v38  ;;  %v9315_v57 = vsub.f32 %v11340_v44, %v8977_v41  ;;  %v11343_v38 = vld [vmem:[#allocation110_spill] sm:$0xff] }
 0x18c   : > { %v908_v39 = vmul.f32 %v9297_v25, %v9297_v25  ;;  %v909_v46 = vmul.f32 %v9301_v42, %v9301_v42  ;;  %v1068_v13 = vadd.f32 %v1067_v14, %v900_v45  ;;  %v9323_v5 = vsub.f32 %v11341_v18, %v8977_v41  ;;  %v11347_v42 = vld [vmem:[#allocation112_spill] sm:$0xff] }
 0x18d   : > { %v910_v33 = vmul.f32 %v9305_v32, %v9305_v32  ;;  %v9329_v29 = vsub.f32 %v11343_v38, %v9061_v43  ;;  %v1073_v44 = vadd.f32 %v1072_v15, %v904_v31  ;;  %v9333_v25 = vsub.f32 %v11345_v27, %v9061_v43 }
 0x18e   : > { %11342 = vst [vmem:[#allocation92_spill] sm:$0xff] %v9323_v5  ;;  %v1078_v48 = vadd.f32 %v908_v39, %v907_v11  ;;  %v9337_v45 = vsub.f32 %v11347_v42, %v9061_v43  ;;  %v630_v14 = vmul.f32 0.0013020834, %v604_v28  ;;  %1069 = vadd.xlane.f32.xlu0 %v1068_v13  ;;  %v906_v41 = vmul.f32 %v9285_v47, %v9285_v47  ;;  %v11349_v13 = vld [vmem:[#allocation105_spill] sm:$0xff] }
 0x18f   : > { %11344 = vst [vmem:[#allocation94_spill] sm:$0xff] %v9329_v29  ;;  %11346 = vst [vmem:[#allocation101_spill] sm:$0xff] %v9333_v25  ;;  %v9343_v18 = vsub.f32 %v8497_v36, %v9061_v43  ;;  %v913_v31 = vmul.f32 %v9329_v29, %v9329_v29  ;;  %v1074_v11 = vadd.f32 %v1073_v44, %v905_v50 }
 0x190   : > { %11348 = vst [vmem:[#allocation102_spill] sm:$0xff] %v9337_v45  ;;  %v911_v27 = vmul.f32 %v9315_v57, %v9315_v57  ;;  %v1079_v15 = vadd.f32 %v1078_v48, %v909_v46  ;;  %v914_v42 = vmul.f32 %v9333_v25, %v9333_v25  ;;  %v912_v28 = vmul.f32 %v9323_v5, %v9323_v5  ;;  %v11351_v46 = vld [vmem:[#allocation106_spill] sm:$0xff] }
 0x191   : > { %v9355_v39 = vsub.f32 %v8511_v53, %v9061_v43  ;;  %v915_v36 = vmul.f32 %v9337_v45, %v9337_v45  ;;  %v9361_v50 = vsub.f32 %v11349_v13, %v9023_v49  ;;  %v1075_v38 = vadd.f32 %v1074_v11, %v906_v41  ;;  %v11353_v45 = vld [vmem:[#allocation107_spill] sm:$0xff]  ;;  %v11355_v13 = vld [vmem:[#allocation109_spill] sm:$0xff] }
 0x192   : > { %v1080_v44 = vadd.f32 %v1079_v15, %v910_v33  ;;  %v1085_v48 = vadd.f32 %v914_v42, %v913_v31  ;;  %v9365_v25 = vsub.f32 %v11351_v46, %v9023_v49  ;;  %v9369_v29 = vsub.f32 %v8520_v16, %v9061_v43  ;;  %v11357_v46 = vld [vmem:[#allocation113_spill] sm:$0xff] }
 0x193   : > { %11350 = vst [vmem:[#allocation103_spill] sm:$0xff] %v9361_v50  ;;  %v916_v53 = vmul.f32 %v9343_v18, %v9343_v18  ;;  %v9375_v5 = vsub.f32 %v11353_v45, %v9023_v49  ;;  %v9379_v41 = vsub.f32 %v11355_v13, %v9023_v49  ;;  %1076 = vadd.xlane.f32.xlu1 %v1075_v38 }
 0x194   : > { %11352 = vst [vmem:[#allocation95_spill] sm:$0xff] %v9365_v25  ;;  %v1081_v33 = vadd.f32 %v1080_v44, %v911_v27  ;;  %v1086_v31 = vadd.f32 %v1085_v48, %v915_v36  ;;  %v919_v11 = vmul.f32 %v9361_v50, %v9361_v50  ;;  %v920_v16 = vmul.f32 %v9365_v25, %v9365_v25  ;;  %v11360_v50 = vld [vmem:[#allocation115_spill] sm:$0xff] }
 0x195   : > { %11354 = vst [vmem:[#allocation96_spill] sm:$0xff] %v9375_v5  ;;  %11356 = vst [vmem:[#allocation97_spill] sm:$0xff] %v9379_v41  ;;  %v917_v43 = vmul.f32 %v9355_v39, %v9355_v39  ;;  %v9389_v45 = vsub.f32 %v8491_v24, %v9023_v49  ;;  %v921_v15 = vmul.f32 %v9375_v5, %v9375_v5  ;;  %v11358_v24 = vld [vmem:[#allocation114_spill] sm:$0xff] }
 0x196   : > { %v922_v27 = vmul.f32 %v9379_v41, %v9379_v41  ;;  %v1082_v42 = vadd.f32 %v1081_v33, %v912_v28  ;;  %v1087_v36 = vadd.f32 %v1086_v31, %v916_v53  ;;  %v1092_v38 = vadd.f32 %v920_v16, %v919_v11 }
 0x197   : > { %v9396_v44 = vsub.f32 %v8499_v61, %v630_v14  ;;  %v918_v48 = vmul.f32 %v9369_v29, %v9369_v29  ;;  %v9401_v13 = vsub.f32 %v11357_v46, %v630_v14  ;;  %v9404_v25 = vsub.f32 %v11358_v24, %v630_v14 }
 0x198   : > { %1083 = vadd.xlane.f32.xlu0 %v1082_v42  ;;  %v1088_v5 = vadd.f32 %v1087_v36, %v917_v43  ;;  %v9408_v41 = vsub.f32 %v11360_v50, %v9023_v49  ;;  %v1093_v28 = vadd.f32 %v1092_v38, %v921_v15  ;;  %v9413_v53 = vsub.f32 %v8518_v51, %v630_v14 }
 0x199   : > { %11359 = vst [vmem:[#allocation100_spill] sm:$0xff] %v9404_v25  ;;  %v925_v61 = vmul.f32 %v9396_v44, %v9396_v44  ;;  %v926_v33 = vmul.f32 %v9401_v13, %v9401_v13  ;;  %v923_v11 = vmul.f32 %v9389_v45, %v9389_v45  ;;  %v9420_v43 = vsub.f32 %v8525_v34, %v630_v14 }
 0x19a   : > { %11361 = vst [vmem:[#allocation104_spill] sm:$0xff] %v9413_v53  ;;  %v1089_v31 = vadd.f32 %v1088_v5, %v918_v48  ;;  %v1094_v16 = vadd.f32 %v1093_v28, %v922_v27  ;;  %v927_v49 = vmul.f32 %v9404_v25, %v9404_v25  ;;  %v924_v51 = vmul.f32 %v9408_v41, %v9408_v41 }
 0x19b   : > { %11362 = vst [vmem:[#allocation108_spill] sm:$0xff] %v9420_v43  ;;  %v1099_v50 = vadd.f32 %v926_v33, %v925_v61  ;;  %v9427_v42 = vsub.f32 %v8529_v62, %v630_v14  ;;  %v928_v5 = vmul.f32 %v9413_v53, %v9413_v53  ;;  %v929_v34 = vmul.f32 %v9420_v43, %v9420_v43  ;;  %v11371_v43 = vld [vmem:[#allocation121_spill] sm:$0xff]  ;;  %v11372_v53 = vld [vmem:[#allocation123_spill] sm:$0xff] }
 0x19c   : > { %1090 = vadd.xlane.f32.xlu1 %v1089_v31  ;;  %v1095_v15 = vadd.f32 %v1094_v16, %v923_v11 }
 0x19d   : > { %11363 = vst [vmem:[#allocation110_spill] sm:$0xff] %v9427_v42  ;;  %v1100_v36 = vadd.f32 %v1099_v50, %v927_v49  ;;  %v930_v48 = vmul.f32 %v9427_v42, %v9427_v42  ;;  %v11370_v42 = vld [vmem:[#allocation117_spill] sm:$0xff] }
 0x19e   : > { %v1096_v27 = vadd.f32 %v1095_v15, %v924_v51 }
 0x19f   : > { %v1101_v38 = vadd.f32 %v1100_v36, %v928_v5  ;;  %v11364_v36 = vld [vmem:[#allocation118_spill] sm:$0xff] }
 0x1a0   : > { %1097 = vadd.xlane.f32.xlu0 %v1096_v27 }
 0x1a1   : > { %v1102_v46 = vadd.f32 %v1101_v38, %v929_v34  ;;  %v11365_v34 = vld [vmem:[#allocation119_spill] sm:$0xff] }
 0x1a3   : > { %v1103_v24 = vadd.f32 %v1102_v46, %v930_v48  ;;  %v11366_v48 = vld [vmem:[#allocation120_spill] sm:$0xff] }
 0x1a5   : > { %1104 = vadd.xlane.f32.xlu1 %v1103_v24 }
 0x1c1   : > { %v937_v28 = vpop.xlane.xlu1 %936 }
 0x1c2   : > { %v1106_v61 = vmul.f32 0.0013020834, %v937_v28 }
 0x1c4   : > { %v1131_v62 = vadd.f32 1e-06, %v1106_v61  ;;  %v11367_v61 = vld [vmem:[#allocation122_spill] sm:$0xff] }
 0x1c5   : > { %v951_v14 = vpop.xlane.xlu1 %950 }
 0x1c6   : > { %6953 = vrsqrt.f32 %v1131_v62  ;;  %v1108_v33 = vmul.f32 0.0013020834, %v951_v14  ;;  %v11368_v14 = vld [vmem:[#allocation124_spill] sm:$0xff] }
 0x1c8   : > { %v944_v31 = vpop.xlane.xlu0 %943  ;;  %v1133_v11 = vadd.f32 1e-06, %v1108_v33 }
 0x1c9   : > { %v1107_v16 = vmul.f32 0.0013020834, %v944_v31 }
 0x1ca   : > { %6955 = vrsqrt.f32 %v1133_v11 }
 0x1cb   : > { %v1132_v49 = vadd.f32 1e-06, %v1107_v16 }
 0x1cd   : > { %6957 = vrsqrt.f32 %v1132_v49  ;;  %v958_v50 = vpop.xlane.xlu0 %957 }
 0x1ce   : > { %v1109_v51 = vmul.f32 0.0013020834, %v958_v50 }
 0x1d0   : > { %v6954_v15 = vpop.eup %6953  ;;  %v1134_v5 = vadd.f32 1e-06, %v1109_v51 }
 0x1d1   : > { %v1181_v27 = vmul.f32 %v6954_v15, %v11364_v36  ;;  %v1182_v38 = vmul.f32 %v6954_v15, %v11365_v34  ;;  %v1183_v46 = vmul.f32 %v6954_v15, %v11366_v48  ;;  %v1184_v24 = vmul.f32 %v6954_v15, %v8552_v0  ;;  %v11369_v36 = vld [vmem:[#allocation116_spill] sm:$0xff] }
 0x1d2   : > { %v965_v28 = vpop.xlane.xlu1 %964  ;;  %v1185_v62 = vmul.f32 %v6954_v15, %v11367_v61  ;;  %v1186_v33 = vmul.f32 %v6954_v15, %v11368_v14  ;;  %6959 = vrsqrt.f32 %v1134_v5  ;;  %v11373_v15 = vld [vmem:[#allocation125_spill] sm:$0xff]  ;;  %v11374_v5 = vld [vmem:[#allocation126_spill] sm:$0xff] }
 0x1d3   : > { %v1110_v31 = vmul.f32 0.0013020834, %v965_v28  ;;  %v6280_v11 = vpack.c.bf16 %v1182_v38, %v1181_v27  ;;  %v6281_v16 = vpack.c.bf16 %v1184_v24, %v1183_v46 }
 0x1d4   : > { %v6956_v49 = vpop.eup %6955  ;;  %v6282_v50 = vpack.c.bf16 %v1186_v33, %v1185_v62  ;;  %v11375_v62 = vld [vmem:[#allocation127_spill] sm:$0xff] }
 0x1d5   : > { %v1135_v51 = vadd.f32 1e-06, %v1110_v31  ;;  %1787 = vst [vmem:[#allocation2] sm:$0xff] %v6280_v11  ;;  %1788 = vst [vmem:[#allocation2 + $0x8] sm:$0xff] %v6281_v16  ;;  %v1193_v34 = vmul.f32 %v6956_v49, %v11369_v36  ;;  %v1194_v48 = vmul.f32 %v6956_v49, %v11370_v42  ;;  %v1195_v0 = vmul.f32 %v6956_v49, %v11371_v43 }
 0x1d6   : > { %v1196_v25 = vmul.f32 %v6956_v49, %v11372_v53  ;;  %1789 = vst [vmem:[#allocation2 + $0x10] sm:$0xff] %v6282_v50  ;;  %v1197_v28 = vmul.f32 %v6956_v49, %v11373_v15  ;;  %v1198_v27 = vmul.f32 %v6956_v49, %v11374_v5 }
 0x1d7   : > { %v6958_v61 = vpop.eup %6957  ;;  %6961 = vrsqrt.f32 %v1135_v51  ;;  %v972_v38 = vpop.xlane.xlu0 %971  ;;  %v6286_v46 = vpack.c.bf16 %v1194_v48, %v1193_v34 }
 0x1d8   : > { %v6287_v24 = vpack.c.bf16 %v1196_v25, %v1195_v0  ;;  %v1187_v14 = vmul.f32 %v6958_v61, %v11375_v62  ;;  %v1188_v33 = vmul.f32 %v6958_v61, %v8593_v2  ;;  %v6288_v31 = vpack.c.bf16 %v1198_v27, %v1197_v28 }
 0x1d9   : > { %v1189_v42 = vmul.f32 %v6958_v61, %v8596_v10  ;;  %v1190_v43 = vmul.f32 %v6958_v61, %v8605_v7  ;;  %v1191_v53 = vmul.f32 %v6958_v61, %v8612_v17  ;;  %1793 = vst [vmem:[#allocation2 + $0x30] sm:$0xff] %v6286_v46  ;;  %v1192_v11 = vmul.f32 %v6958_v61, %v8615_v3 }
 0x1da   : > { %1794 = vst [vmem:[#allocation2 + $0x38] sm:$0xff] %v6287_v24  ;;  %v6283_v16 = vpack.c.bf16 %v1188_v33, %v1187_v14  ;;  %v1111_v49 = vmul.f32 0.0013020834, %v972_v38  ;;  %1795 = vst [vmem:[#allocation2 + $0x40] sm:$0xff] %v6288_v31 }
 0x1db   : > { %v6284_v50 = vpack.c.bf16 %v1190_v43, %v1189_v42  ;;  %v6285_v25 = vpack.c.bf16 %v1192_v11, %v1191_v53  ;;  %v11376_v42 = vld [vmem:[#allocation128_spill] sm:$0xff]  ;;  %v11377_v43 = vld [vmem:[#allocation129_spill] sm:$0xff]  ;;  %v11378_v53 = vld [vmem:[#allocation130_spill] sm:$0xff] }
 0x1dc   : > { %1790 = vst [vmem:[#allocation2 + $0x18] sm:$0xff] %v6283_v16  ;;  %v979_v51 = vpop.xlane.xlu1 %978  ;;  %v1136_v36 = vadd.f32 1e-06, %v1111_v49  ;;  %v6960_v2 = vpop.eup %6959 }
 0x1dd   : > { %1791 = vst [vmem:[#allocation2 + $0x20] sm:$0xff] %v6284_v50  ;;  %v1112_v34 = vmul.f32 0.0013020834, %v979_v51  ;;  %1792 = vst [vmem:[#allocation2 + $0x28] sm:$0xff] %v6285_v25  ;;  %v1199_v7 = vmul.f32 %v6960_v2, %v8622_v56  ;;  %v1200_v17 = vmul.f32 %v6960_v2, %v8625_v20  ;;  %v1201_v10 = vmul.f32 %v6960_v2, %v8628_v37  ;;  %v11379_v50 = vld [vmem:[#allocation131_spill] sm:$0xff]  ;;  %v11380_v51 = vld [vmem:[#allocation132_spill] sm:$0xff] }
 0x1de   : > { %v1202_v3 = vmul.f32 %v6960_v2, %v8633_v8  ;;  %v1203_v48 = vmul.f32 %v6960_v2, %v8644_v52  ;;  %v1204_v0 = vmul.f32 %v6960_v2, %v8651_v60  ;;  %6963 = vrsqrt.f32 %v1136_v36 }
 0x1df   : > { %v1137_v61 = vadd.f32 1e-06, %v1112_v34  ;;  %v6289_v15 = vpack.c.bf16 %v1200_v17, %v1199_v7  ;;  %v11381_v34 = vld [vmem:[#allocation133_spill] sm:$0xff]  ;;  %v11382_v17 = vld [vmem:[#allocation134_spill] sm:$0xff] }
 0x1e0   : > { %v6290_v28 = vpack.c.bf16 %v1202_v3, %v1201_v10  ;;  %v6291_v27 = vpack.c.bf16 %v1204_v0, %v1203_v48  ;;  %v11383_v3 = vld [vmem:[#allocation135_spill] sm:$0xff]  ;;  %v11384_v48 = vld [vmem:[#allocation22_spill] sm:$0xff] }
 0x1e1   : > { %v6962_v5 = vpop.eup %6961  ;;  %6965 = vrsqrt.f32 %v1137_v61  ;;  %1796 = vst [vmem:[#allocation2 + $0x48] sm:$0xff] %v6289_v15  ;;  %v11385_v61 = vld [vmem:[#allocation27_spill] sm:$0xff] }
 0x1e2   : > { %v986_v38 = vpop.xlane.xlu0 %985  ;;  %v1205_v56 = vmul.f32 %v6962_v5, %v8656_v55  ;;  %v1206_v20 = vmul.f32 %v6962_v5, %v8659_v40  ;;  %v1207_v37 = vmul.f32 %v6962_v5, %v8662_v6  ;;  %v1208_v8 = vmul.f32 %v6962_v5, %v8669_v35  ;;  %1797 = vst [vmem:[#allocation2 + $0x50] sm:$0xff] %v6290_v28  ;;  %v11386_v28 = vld [vmem:[#allocation31_spill] sm:$0xff] }
 0x1e3   : > { %v1209_v52 = vmul.f32 %v6962_v5, %v8672_v26  ;;  %v1210_v60 = vmul.f32 %v6962_v5, %v8685_v59  ;;  %1798 = vst [vmem:[#allocation2 + $0x58] sm:$0xff] %v6291_v27  ;;  %v1113_v46 = vmul.f32 0.0013020834, %v986_v38 }
 0x1e4   : > { %v6292_v24 = vpack.c.bf16 %v1206_v20, %v1205_v56  ;;  %v6293_v62 = vpack.c.bf16 %v1208_v8, %v1207_v37 }
 0x1e5   : > { %v6294_v14 = vpack.c.bf16 %v1210_v60, %v1209_v52  ;;  %v1138_v31 = vadd.f32 1e-06, %v1113_v46 }
 0x1e6   : > { %v993_v33 = vpop.xlane.xlu1 %992  ;;  %1799 = vst [vmem:[#allocation2 + $0x60] sm:$0xff] %v6292_v24  ;;  %1800 = vst [vmem:[#allocation2 + $0x68] sm:$0xff] %v6293_v62 }
 0x1e7   : > { %v1114_v55 = vmul.f32 0.0013020834, %v993_v33  ;;  %1801 = vst [vmem:[#allocation2 + $0x70] sm:$0xff] %v6294_v14  ;;  %6967 = vrsqrt.f32 %v1138_v31  ;;  %v11387_v14 = vld [vmem:[#allocation17_spill] sm:$0xff]  ;;  %v11388_v31 = vld [vmem:[#allocation18_spill] sm:$0xff] }
 0x1e8   : > { %v6964_v6 = vpop.eup %6963 }
 0x1e9   : > { %v1139_v40 = vadd.f32 1e-06, %v1114_v55  ;;  %v1211_v35 = vmul.f32 %v6964_v6, %v8691_v22  ;;  %v1212_v26 = vmul.f32 %v6964_v6, %v11376_v42  ;;  %v1213_v59 = vmul.f32 %v6964_v6, %v11377_v43 }
 0x1ea   : > { %v1214_v11 = vmul.f32 %v6964_v6, %v11378_v53  ;;  %v1215_v25 = vmul.f32 %v6964_v6, %v11379_v50  ;;  %v1216_v36 = vmul.f32 %v6964_v6, %v11380_v51 }
 0x1eb   : > { %v6966_v49 = vpop.eup %6965  ;;  %6969 = vrsqrt.f32 %v1139_v40  ;;  %v6295_v27 = vpack.c.bf16 %v1212_v26, %v1211_v35  ;;  %v11389_v40 = vld [vmem:[#allocation19_spill] sm:$0xff]  ;;  %v11390_v35 = vld [vmem:[#allocation20_spill] sm:$0xff]  ;;  %v11391_v26 = vld [vmem:[#allocation21_spill] sm:$0xff] }
 0x1ec   : > { %v1000_v16 = vpop.xlane.xlu0 %999  ;;  %v1217_v7 = vmul.f32 %v6966_v49, %v11381_v34  ;;  %v1218_v10 = vmul.f32 %v6966_v49, %v11382_v17  ;;  %v1219_v22 = vmul.f32 %v6966_v49, %v11383_v3  ;;  %v1220_v0 = vmul.f32 %v6966_v49, %v11384_v48  ;;  %v11394_v34 = vld [vmem:[#allocation30_spill] sm:$0xff]  ;;  %v11395_v17 = vld [vmem:[#allocation33_spill] sm:$0xff]  ;;  %v11397_v48 = vld [vmem:[#allocation39_spill] sm:$0xff] }
 0x1ed   : > { %v1115_v2 = vmul.f32 0.0013020834, %v1000_v16  ;;  %v1221_v15 = vmul.f32 %v6966_v49, %v11385_v61  ;;  %v1222_v5 = vmul.f32 %v6966_v49, %v11386_v28  ;;  %v6296_v38 = vpack.c.bf16 %v1214_v11, %v1213_v59  ;;  %1802 = vst [vmem:[#allocation2 + $0x78] sm:$0xff] %v6295_v27  ;;  %v11392_v59 = vld [vmem:[#allocation26_spill] sm:$0xff]  ;;  %v11398_v61 = vld [vmem:[#allocation44_spill] sm:$0xff] }
 0x1ee   : > { %v6298_v56 = vpack.c.bf16 %v1218_v10, %v1217_v7  ;;  %v6299_v20 = vpack.c.bf16 %v1220_v0, %v1219_v22  ;;  %v6297_v37 = vpack.c.bf16 %v1216_v36, %v1215_v25  ;;  %v11393_v36 = vld [vmem:[#allocation29_spill] sm:$0xff]  ;;  %v11396_v3 = vld [vmem:[#allocation38_spill] sm:$0xff] }
 0x1ef   : > { %v1140_v52 = vadd.f32 1e-06, %v1115_v2  ;;  %v6300_v60 = vpack.c.bf16 %v1222_v5, %v1221_v15  ;;  %1803 = vst [vmem:[#allocation2 + $0x80] sm:$0xff] %v6296_v38 }
 0x1f0   : > { %v1007_v8 = vpop.xlane.xlu1 %1006  ;;  %1805 = vst [vmem:[#allocation2 + $0x90] sm:$0xff] %v6298_v56  ;;  %1806 = vst [vmem:[#allocation2 + $0x98] sm:$0xff] %v6299_v20 }
 0x1f1   : > { %v1116_v46 = vmul.f32 0.0013020834, %v1007_v8  ;;  %1804 = vst [vmem:[#allocation2 + $0x88] sm:$0xff] %v6297_v37  ;;  %6971 = vrsqrt.f32 %v1140_v52  ;;  %v6968_v24 = vpop.eup %6967  ;;  %1807 = vst [vmem:[#allocation2 + $0xa0] sm:$0xff] %v6300_v60  ;;  %v11399_v52 = vld [vmem:[#allocation23_spill] sm:$0xff] }
 0x1f2   : > { %v1223_v33 = vmul.f32 %v6968_v24, %v11387_v14  ;;  %v1224_v55 = vmul.f32 %v6968_v24, %v11388_v31  ;;  %v1225_v6 = vmul.f32 %v6968_v24, %v11389_v40  ;;  %v1226_v42 = vmul.f32 %v6968_v24, %v11390_v35 }
 0x1f3   : > { %v1141_v62 = vadd.f32 1e-06, %v1116_v46  ;;  %v1227_v43 = vmul.f32 %v6968_v24, %v11391_v26  ;;  %v1228_v53 = vmul.f32 %v6968_v24, %v11392_v59  ;;  %v11400_v46 = vld [vmem:[#allocation24_spill] sm:$0xff] }
 0x1f4   : > { %v6301_v16 = vpack.c.bf16 %v1224_v55, %v1223_v33  ;;  %v6302_v49 = vpack.c.bf16 %v1226_v42, %v1225_v6  ;;  %v11402_v33 = vld [vmem:[#allocation28_spill] sm:$0xff]  ;;  %v11404_v6 = vld [vmem:[#allocation34_spill] sm:$0xff] }
 0x1f5   : > { %6973 = vrsqrt.f32 %v1141_v62  ;;  %v6970_v25 = vpop.eup %6969  ;;  %v6303_v51 = vpack.c.bf16 %v1228_v53, %v1227_v43  ;;  %v11401_v62 = vld [vmem:[#allocation25_spill] sm:$0xff]  ;;  %v11403_v55 = vld [vmem:[#allocation32_spill] sm:$0xff] }
 0x1f6   : > { %v1014_v11 = vpop.xlane.xlu0 %1013  ;;  %v1229_v2 = vmul.f32 %v6970_v25, %v11393_v36  ;;  %v1230_v7 = vmul.f32 %v6970_v25, %v11394_v34  ;;  %v1231_v10 = vmul.f32 %v6970_v25, %v11395_v17  ;;  %v1232_v22 = vmul.f32 %v6970_v25, %v11396_v3  ;;  %1808 = vst [vmem:[#allocation2 + $0xa8] sm:$0xff] %v6301_v16  ;;  %v11408_v36 = vld [vmem:[#allocation46_spill] sm:$0xff]  ;;  %v11409_v34 = vld [vmem:[#allocation51_spill] sm:$0xff]  ;;  %v11410_v17 = vld [vmem:[#allocation56_spill] sm:$0xff] }
 0x1f7   : > { %v1117_v50 = vmul.f32 0.0013020834, %v1014_v11  ;;  %1809 = vst [vmem:[#allocation2 + $0xb0] sm:$0xff] %v6302_v49  ;;  %v1233_v0 = vmul.f32 %v6970_v25, %v11397_v48  ;;  %v1234_v15 = vmul.f32 %v6970_v25, %v11398_v61  ;;  %1810 = vst [vmem:[#allocation2 + $0xb8] sm:$0xff] %v6303_v51  ;;  %v11405_v11 = vld [vmem:[#allocation41_spill] sm:$0xff]  ;;  %v11406_v49 = vld [vmem:[#allocation42_spill] sm:$0xff] }
 0x1f8   : > { %v6304_v27 = vpack.c.bf16 %v1230_v7, %v1229_v2  ;;  %v6305_v38 = vpack.c.bf16 %v1232_v22, %v1231_v10  ;;  %v11407_v25 = vld [vmem:[#allocation43_spill] sm:$0xff] }
 0x1f9   : > { %v1142_v5 = vadd.f32 1e-06, %v1117_v50  ;;  %v6306_v20 = vpack.c.bf16 %v1234_v15, %v1233_v0 }
 0x1fa   : > { %v1021_v28 = vpop.xlane.xlu1 %1020  ;;  %1811 = vst [vmem:[#allocation2 + $0xc0] sm:$0xff] %v6304_v27  ;;  %1812 = vst [vmem:[#allocation2 + $0xc8] sm:$0xff] %v6305_v38  ;;  %v11411_v38 = vld [vmem:[#allocation35_spill] sm:$0xff] }
 0x1fb   : > { %v1118_v56 = vmul.f32 0.0013020834, %v1021_v28  ;;  %6975 = vrsqrt.f32 %v1142_v5  ;;  %v6972_v37 = vpop.eup %6971  ;;  %1813 = vst [vmem:[#allocation2 + $0xd0] sm:$0xff] %v6306_v20  ;;  %v11412_v20 = vld [vmem:[#allocation36_spill] sm:$0xff] }
 0x1fc   : > { %v1235_v60 = vmul.f32 %v6972_v37, %v11399_v52  ;;  %v1236_v24 = vmul.f32 %v6972_v37, %v11400_v46  ;;  %v1237_v14 = vmul.f32 %v6972_v37, %v11401_v62  ;;  %v1238_v31 = vmul.f32 %v6972_v37, %v11402_v33  ;;  %v11415_v62 = vld [vmem:[#allocation45_spill] sm:$0xff]  ;;  %v11416_v33 = vld [vmem:[#allocation50_spill] sm:$0xff] }
 0x1fd   : > { %v1143_v8 = vadd.f32 1e-06, %v1118_v56  ;;  %v1239_v40 = vmul.f32 %v6972_v37, %v11403_v55  ;;  %v1240_v35 = vmul.f32 %v6972_v37, %v11404_v6 }
 0x1fe   : > { %v6307_v43 = vpack.c.bf16 %v1236_v24, %v1235_v60  ;;  %v6308_v59 = vpack.c.bf16 %v1238_v31, %v1237_v14  ;;  %v11414_v60 = vld [vmem:[#allocation40_spill] sm:$0xff] }
 0x1ff   : > { %6977 = vrsqrt.f32 %v1143_v8  ;;  %v1028_v42 = vpop.xlane.xlu0 %1027  ;;  %v6974_v26 = vpop.eup %6973  ;;  %v6309_v3 = vpack.c.bf16 %v1240_v35, %v1239_v40  ;;  %v11413_v8 = vld [vmem:[#allocation37_spill] sm:$0xff] }
 0x200   : > { %v1119_v53 = vmul.f32 0.0013020834, %v1028_v42  ;;  %v1241_v16 = vmul.f32 %v6974_v26, %v11405_v11  ;;  %v1242_v50 = vmul.f32 %v6974_v26, %v11406_v49  ;;  %v1243_v51 = vmul.f32 %v6974_v26, %v11407_v25  ;;  %1814 = vst [vmem:[#allocation2 + $0xd8] sm:$0xff] %v6307_v43  ;;  %1815 = vst [vmem:[#allocation2 + $0xe0] sm:$0xff] %v6308_v59  ;;  %v11417_v42 = vld [vmem:[#allocation53_spill] sm:$0xff]  ;;  %v11418_v43 = vld [vmem:[#allocation54_spill] sm:$0xff] }
 0x201   : > { %v1244_v2 = vmul.f32 %v6974_v26, %v11408_v36  ;;  %v1245_v7 = vmul.f32 %v6974_v26, %v11409_v34  ;;  %v1246_v10 = vmul.f32 %v6974_v26, %v11410_v17  ;;  %1816 = vst [vmem:[#allocation2 + $0xe8] sm:$0xff] %v6309_v3 }
 0x202   : > { %v1144_v22 = vadd.f32 1e-06, %v1119_v53  ;;  %v6310_v48 = vpack.c.bf16 %v1242_v50, %v1241_v16  ;;  %v11419_v53 = vld [vmem:[#allocation55_spill] sm:$0xff]  ;;  %v11420_v16 = vld [vmem:[#allocation58_spill] sm:$0xff] }
 0x203   : > { %v6311_v0 = vpack.c.bf16 %v1244_v2, %v1243_v51  ;;  %v6312_v15 = vpack.c.bf16 %v1246_v10, %v1245_v7  ;;  %v11421_v50 = vld [vmem:[#allocation62_spill] sm:$0xff]  ;;  %v11422_v51 = vld [vmem:[#allocation64_spill] sm:$0xff] }
 0x204   : > { %v1035_v61 = vpop.xlane.xlu1 %1034  ;;  %6979 = vrsqrt.f32 %v1144_v22  ;;  %1817 = vst [vmem:[#allocation2 + $0xf0] sm:$0xff] %v6310_v48 }
 0x205   : > { %v1120_v28 = vmul.f32 0.0013020834, %v1035_v61  ;;  %1818 = vst [vmem:[#allocation2 + $0xf8] sm:$0xff] %v6311_v0  ;;  %v6976_v5 = vpop.eup %6975  ;;  %1819 = vst [vmem:[#allocation2 + $0x100] sm:$0xff] %v6312_v15  ;;  %v11423_v0 = vld [vmem:[#allocation47_spill] sm:$0xff]  ;;  %v11424_v15 = vld [vmem:[#allocation48_spill] sm:$0xff] }
 0x206   : > { %v1247_v56 = vmul.f32 %v6976_v5, %v11411_v38  ;;  %v1248_v37 = vmul.f32 %v6976_v5, %v11412_v20  ;;  %v1249_v52 = vmul.f32 %v6976_v5, %v11413_v8  ;;  %v1250_v46 = vmul.f32 %v6976_v5, %v11414_v60  ;;  %v11426_v38 = vld [vmem:[#allocation52_spill] sm:$0xff]  ;;  %v11427_v20 = vld [vmem:[#allocation57_spill] sm:$0xff] }
 0x207   : > { %v1145_v27 = vadd.f32 1e-06, %v1120_v28  ;;  %v1251_v14 = vmul.f32 %v6976_v5, %v11415_v62  ;;  %v1252_v31 = vmul.f32 %v6976_v5, %v11416_v33  ;;  %v11425_v5 = vld [vmem:[#allocation49_spill] sm:$0xff] }
 0x208   : > { %v1042_v24 = vpop.xlane.xlu0 %1041  ;;  %v6313_v6 = vpack.c.bf16 %v1248_v37, %v1247_v56  ;;  %v6314_v35 = vpack.c.bf16 %v1250_v46, %v1249_v52 }
 0x209   : > { %6981 = vrsqrt.f32 %v1145_v27  ;;  %v1121_v55 = vmul.f32 0.0013020834, %v1042_v24  ;;  %v6978_v40 = vpop.eup %6977  ;;  %v6315_v2 = vpack.c.bf16 %v1252_v31, %v1251_v14  ;;  %v11428_v31 = vld [vmem:[#allocation61_spill] sm:$0xff] }
 0x20a   : > { %v1253_v26 = vmul.f32 %v6978_v40, %v11417_v42  ;;  %v1254_v59 = vmul.f32 %v6978_v40, %v11418_v43  ;;  %v1255_v11 = vmul.f32 %v6978_v40, %v11419_v53  ;;  %v1256_v49 = vmul.f32 %v6978_v40, %v11420_v16  ;;  %1820 = vst [vmem:[#allocation2 + $0x108] sm:$0xff] %v6313_v6  ;;  %v11429_v6 = vld [vmem:[#allocation65_spill] sm:$0xff]  ;;  %v11430_v42 = vld [vmem:[#allocation66_spill] sm:$0xff]  ;;  %v11431_v43 = vld [vmem:[#allocation67_spill] sm:$0xff] }
 0x20b   : > { %v1257_v25 = vmul.f32 %v6978_v40, %v11421_v50  ;;  %v1258_v36 = vmul.f32 %v6978_v40, %v11422_v51  ;;  %1821 = vst [vmem:[#allocation2 + $0x110] sm:$0xff] %v6314_v35  ;;  %v1146_v34 = vadd.f32 1e-06, %v1121_v55  ;;  %1822 = vst [vmem:[#allocation2 + $0x118] sm:$0xff] %v6315_v2 }
 0x20c   : > { %v6316_v7 = vpack.c.bf16 %v1254_v59, %v1253_v26  ;;  %v6317_v17 = vpack.c.bf16 %v1256_v49, %v1255_v11 }
 0x20d   : > { %v6318_v3 = vpack.c.bf16 %v1258_v36, %v1257_v25  ;;  %6983 = vrsqrt.f32 %v1146_v34  ;;  %v11432_v36 = vld [vmem:[#allocation70_spill] sm:$0xff]  ;;  %v11433_v34 = vld [vmem:[#allocation75_spill] sm:$0xff] }
 0x20e   : > { %v1049_v10 = vpop.xlane.xlu1 %1048  ;;  %v6980_v48 = vpop.eup %6979  ;;  %1823 = vst [vmem:[#allocation2 + $0x120] sm:$0xff] %v6316_v7  ;;  %1824 = vst [vmem:[#allocation2 + $0x128] sm:$0xff] %v6317_v17  ;;  %v11434_v17 = vld [vmem:[#allocation80_spill] sm:$0xff] }
 0x20f   : > { %v1122_v22 = vmul.f32 0.0013020834, %v1049_v10  ;;  %1825 = vst [vmem:[#allocation2 + $0x130] sm:$0xff] %v6318_v3  ;;  %v1259_v61 = vmul.f32 %v6980_v48, %v11423_v0  ;;  %v1260_v28 = vmul.f32 %v6980_v48, %v11424_v15  ;;  %v1261_v27 = vmul.f32 %v6980_v48, %v11425_v5 }
 0x210   : > { %v1262_v56 = vmul.f32 %v6980_v48, %v11426_v38  ;;  %v1263_v37 = vmul.f32 %v6980_v48, %v11427_v20  ;;  %v1264_v8 = vmul.f32 %v6980_v48, %v9035_v54  ;;  %v11436_v48 = vld [vmem:[#allocation60_spill] sm:$0xff] }
 0x211   : > { %v1147_v52 = vadd.f32 1e-06, %v1122_v22  ;;  %v6319_v46 = vpack.c.bf16 %v1260_v28, %v1259_v61  ;;  %v11437_v61 = vld [vmem:[#allocation63_spill] sm:$0xff] }
 0x212   : > { %v1056_v60 = vpop.xlane.xlu0 %1055  ;;  %v6320_v24 = vpack.c.bf16 %v1262_v56, %v1261_v27  ;;  %v6321_v33 = vpack.c.bf16 %v1264_v8, %v1263_v37  ;;  %v11438_v37 = vld [vmem:[#allocation68_spill] sm:$0xff] }
 0x213   : > { %v1123_v62 = vmul.f32 0.0013020834, %v1056_v60  ;;  %v6982_v14 = vpop.eup %6981  ;;  %6985 = vrsqrt.f32 %v1147_v52  ;;  %1826 = vst [vmem:[#allocation2 + $0x138] sm:$0xff] %v6319_v46  ;;  %v11439_v52 = vld [vmem:[#allocation69_spill] sm:$0xff] }
 0x214   : > { %v1265_v55 = vmul.f32 %v6982_v14, %v11428_v31  ;;  %v1266_v40 = vmul.f32 %v6982_v14, %v9045_v58  ;;  %v1267_v35 = vmul.f32 %v6982_v14, %v11429_v6  ;;  %v1268_v26 = vmul.f32 %v6982_v14, %v11430_v42  ;;  %1827 = vst [vmem:[#allocation2 + $0x140] sm:$0xff] %v6320_v24  ;;  %v11440_v24 = vld [vmem:[#allocation74_spill] sm:$0xff] }
 0x215   : > { %v1269_v54 = vmul.f32 %v6982_v14, %v11431_v43  ;;  %v1270_v59 = vmul.f32 %v6982_v14, %v9071_v21  ;;  %1828 = vst [vmem:[#allocation2 + $0x148] sm:$0xff] %v6321_v33  ;;  %v1148_v11 = vadd.f32 1e-06, %v1123_v62  ;;  %v11435_v21 = vld [vmem:[#allocation59_spill] sm:$0xff]  ;;  %v11441_v33 = vld [vmem:[#allocation77_spill] sm:$0xff] }
 0x216   : > { %v6322_v16 = vpack.c.bf16 %v1266_v40, %v1265_v55  ;;  %v6323_v49 = vpack.c.bf16 %v1268_v26, %v1267_v35 }
 0x217   : > { %v1063_v53 = vpop.xlane.xlu1 %1062  ;;  %v6324_v25 = vpack.c.bf16 %v1270_v59, %v1269_v54  ;;  %6987 = vrsqrt.f32 %v1148_v11  ;;  %v6984_v51 = vpop.eup %6983  ;;  %v11442_v54 = vld [vmem:[#allocation78_spill] sm:$0xff] }
 0x218   : > { %v1124_v50 = vmul.f32 0.0013020834, %v1063_v53  ;;  %1829 = vst [vmem:[#allocation2 + $0x150] sm:$0xff] %v6322_v16  ;;  %1830 = vst [vmem:[#allocation2 + $0x158] sm:$0xff] %v6323_v49  ;;  %v1271_v2 = vmul.f32 %v6984_v51, %v11432_v36  ;;  %v1272_v7 = vmul.f32 %v6984_v51, %v11433_v34  ;;  %v1273_v10 = vmul.f32 %v6984_v51, %v11434_v17  ;;  %v11444_v11 = vld [vmem:[#allocation82_spill] sm:$0xff]  ;;  %v11445_v49 = vld [vmem:[#allocation87_spill] sm:$0xff] }
 0x219   : > { %1831 = vst [vmem:[#allocation2 + $0x160] sm:$0xff] %v6324_v25  ;;  %v1274_v3 = vmul.f32 %v6984_v51, %v11435_v21  ;;  %v1275_v0 = vmul.f32 %v6984_v51, %v11436_v48  ;;  %v1276_v15 = vmul.f32 %v6984_v51, %v11437_v61  ;;  %v11450_v48 = vld [vmem:[#allocation76_spill] sm:$0xff] }
 0x21a   : > { %v1149_v58 = vadd.f32 1e-06, %v1124_v50  ;;  %v6325_v5 = vpack.c.bf16 %v1272_v7, %v1271_v2 }
 0x21b   : > { %v1070_v22 = vpop.xlane.xlu0 %1069  ;;  %v6326_v27 = vpack.c.bf16 %v1274_v3, %v1273_v10  ;;  %v6327_v38 = vpack.c.bf16 %v1276_v15, %v1275_v0  ;;  %v11448_v10 = vld [vmem:[#allocation72_spill] sm:$0xff]  ;;  %v11449_v3 = vld [vmem:[#allocation73_spill] sm:$0xff] }
 0x21c   : > { %6989 = vrsqrt.f32 %v1149_v58  ;;  %v1125_v28 = vmul.f32 0.0013020834, %v1070_v22  ;;  %1832 = vst [vmem:[#allocation2 + $0x168] sm:$0xff] %v6325_v5  ;;  %v11447_v58 = vld [vmem:[#allocation71_spill] sm:$0xff] }
 0x21d   : > { %v6986_v20 = vpop.eup %6985  ;;  %1833 = vst [vmem:[#allocation2 + $0x170] sm:$0xff] %v6326_v27  ;;  %1834 = vst [vmem:[#allocation2 + $0x178] sm:$0xff] %v6327_v38 }
 0x21e   : > { %v1150_v56 = vadd.f32 1e-06, %v1125_v28  ;;  %v1277_v8 = vmul.f32 %v6986_v20, %v11438_v37  ;;  %v1278_v60 = vmul.f32 %v6986_v20, %v11439_v52  ;;  %v1279_v46 = vmul.f32 %v6986_v20, %v9123_v12  ;;  %v11443_v12 = vld [vmem:[#allocation79_spill] sm:$0xff] }
 0x21f   : > { %v1280_v62 = vmul.f32 %v6986_v20, %v11440_v24  ;;  %v1281_v31 = vmul.f32 %v6986_v20, %v11441_v33  ;;  %v1282_v55 = vmul.f32 %v6986_v20, %v9141_v1  ;;  %v11446_v1 = vld [vmem:[#allocation91_spill] sm:$0xff]  ;;  %v11453_v24 = vld [vmem:[#allocation89_spill] sm:$0xff] }
 0x220   : > { %v1077_v14 = vpop.xlane.xlu1 %1076  ;;  %6991 = vrsqrt.f32 %v1150_v56  ;;  %v6328_v6 = vpack.c.bf16 %v1278_v60, %v1277_v8 }
 0x221   : > { %v1126_v40 = vmul.f32 0.0013020834, %v1077_v14  ;;  %v6329_v35 = vpack.c.bf16 %v1280_v62, %v1279_v46  ;;  %v6988_v42 = vpop.eup %6987  ;;  %v6330_v26 = vpack.c.bf16 %v1282_v55, %v1281_v31  ;;  %v11452_v46 = vld [vmem:[#allocation86_spill] sm:$0xff] }
 0x222   : > { %1835 = vst [vmem:[#allocation2 + $0x180] sm:$0xff] %v6328_v6  ;;  %v1283_v59 = vmul.f32 %v6988_v42, %v11442_v54  ;;  %v1284_v53 = vmul.f32 %v6988_v42, %v11443_v12  ;;  %v1285_v16 = vmul.f32 %v6988_v42, %v11444_v11  ;;  %v1286_v50 = vmul.f32 %v6988_v42, %v11445_v49  ;;  %v11454_v54 = vld [vmem:[#allocation90_spill] sm:$0xff]  ;;  %v11455_v12 = vld [vmem:[#allocation93_spill] sm:$0xff]  ;;  %v11457_v49 = vld [vmem:[#allocation99_spill] sm:$0xff] }
 0x223   : > { %v1151_v43 = vadd.f32 1e-06, %v1126_v40  ;;  %1836 = vst [vmem:[#allocation2 + $0x188] sm:$0xff] %v6329_v35  ;;  %1837 = vst [vmem:[#allocation2 + $0x190] sm:$0xff] %v6330_v26  ;;  %v1287_v51 = vmul.f32 %v6988_v42, %v11446_v1  ;;  %v1288_v36 = vmul.f32 %v6988_v42, %v11447_v58  ;;  %v11456_v11 = vld [vmem:[#allocation98_spill] sm:$0xff] }
 0x224   : > { %v6331_v7 = vpack.c.bf16 %v1284_v53, %v1283_v59  ;;  %v6332_v17 = vpack.c.bf16 %v1286_v50, %v1285_v16 }
 0x225   : > { %v1084_v25 = vpop.xlane.xlu0 %1083  ;;  %6993 = vrsqrt.f32 %v1151_v43  ;;  %v6333_v5 = vpack.c.bf16 %v1288_v36, %v1287_v51 }
 0x226   : > { %v1127_v2 = vmul.f32 0.0013020834, %v1084_v25  ;;  %v6990_v34 = vpop.eup %6989  ;;  %1838 = vst [vmem:[#allocation2 + $0x198] sm:$0xff] %v6331_v7  ;;  %1839 = vst [vmem:[#allocation2 + $0x1a0] sm:$0xff] %v6332_v17  ;;  %v11459_v7 = vld [vmem:[#allocation84_spill] sm:$0xff] }
 0x227   : > { %v1289_v21 = vmul.f32 %v6990_v34, %v11448_v10  ;;  %v1290_v22 = vmul.f32 %v6990_v34, %v11449_v3  ;;  %v1291_v0 = vmul.f32 %v6990_v34, %v11450_v48  ;;  %v1292_v61 = vmul.f32 %v6990_v34, %v9199_v23  ;;  %1840 = vst [vmem:[#allocation2 + $0x1a8] sm:$0xff] %v6333_v5  ;;  %v11451_v23 = vld [vmem:[#allocation81_spill] sm:$0xff]  ;;  %v11461_v3 = vld [vmem:[#allocation88_spill] sm:$0xff] }
 0x228   : > { %v1293_v15 = vmul.f32 %v6990_v34, %v9203_v19  ;;  %v1294_v28 = vmul.f32 %v6990_v34, %v9215_v9  ;;  %v1152_v38 = vadd.f32 1e-06, %v1127_v2  ;;  %v11460_v10 = vld [vmem:[#allocation85_spill] sm:$0xff] }
 0x229   : > { %v1091_v27 = vpop.xlane.xlu1 %1090  ;;  %v6334_v56 = vpack.c.bf16 %v1290_v22, %v1289_v21  ;;  %v6335_v20 = vpack.c.bf16 %v1292_v61, %v1291_v0  ;;  %v11462_v0 = vld [vmem:[#allocation92_spill] sm:$0xff] }
 0x22a   : > { %v1128_v37 = vmul.f32 0.0013020834, %v1091_v27  ;;  %v6336_v8 = vpack.c.bf16 %v1294_v28, %v1293_v15  ;;  %6995 = vrsqrt.f32 %v1152_v38  ;;  %v6992_v52 = vpop.eup %6991  ;;  %v11463_v27 = vld [vmem:[#allocation94_spill] sm:$0xff] }
 0x22b   : > { %1841 = vst [vmem:[#allocation2 + $0x1b0] sm:$0xff] %v6334_v56  ;;  %1842 = vst [vmem:[#allocation2 + $0x1b8] sm:$0xff] %v6335_v20  ;;  %v1295_v19 = vmul.f32 %v6992_v52, %v11451_v23  ;;  %v1296_v9 = vmul.f32 %v6992_v52, %v11452_v46  ;;  %v1297_v62 = vmul.f32 %v6992_v52, %v11453_v24  ;;  %v11464_v56 = vld [vmem:[#allocation101_spill] sm:$0xff]  ;;  %v11466_v24 = vld [vmem:[#allocation103_spill] sm:$0xff] }
 0x22c   : > { %v1153_v60 = vadd.f32 1e-06, %v1128_v37  ;;  %1843 = vst [vmem:[#allocation2 + $0x1c0] sm:$0xff] %v6336_v8  ;;  %v1298_v14 = vmul.f32 %v6992_v52, %v9237_v30  ;;  %v1299_v31 = vmul.f32 %v6992_v52, %v9245_v63  ;;  %v1300_v55 = vmul.f32 %v6992_v52, %v9249_v4  ;;  %v11458_v63 = vld [vmem:[#allocation83_spill] sm:$0xff]  ;;  %v11465_v37 = vld [vmem:[#allocation102_spill] sm:$0xff] }
 0x22d   : > { %v1098_v33 = vpop.xlane.xlu0 %1097  ;;  %v6337_v6 = vpack.c.bf16 %v1296_v9, %v1295_v19 }
 0x22e   : > { %6997 = vrsqrt.f32 %v1153_v60  ;;  %v1129_v40 = vmul.f32 0.0013020834, %v1098_v33  ;;  %v6338_v35 = vpack.c.bf16 %v1298_v14, %v1297_v62  ;;  %v6339_v26 = vpack.c.bf16 %v1300_v55, %v1299_v31  ;;  %v11467_v14 = vld [vmem:[#allocation95_spill] sm:$0xff]  ;;  %v11468_v31 = vld [vmem:[#allocation96_spill] sm:$0xff]  ;;  %v11469_v55 = vld [vmem:[#allocation97_spill] sm:$0xff] }
 0x22f   : > { %v6994_v42 = vpop.eup %6993  ;;  %1844 = vst [vmem:[#allocation2 + $0x1c8] sm:$0xff] %v6337_v6 }
 0x230   : > { %v1154_v43 = vadd.f32 1e-06, %v1129_v40  ;;  %v1301_v59 = vmul.f32 %v6994_v42, %v11454_v54  ;;  %v1302_v53 = vmul.f32 %v6994_v42, %v11455_v12  ;;  %v1303_v16 = vmul.f32 %v6994_v42, %v11456_v11  ;;  %1845 = vst [vmem:[#allocation2 + $0x1d0] sm:$0xff] %v6338_v35  ;;  %1846 = vst [vmem:[#allocation2 + $0x1d8] sm:$0xff] %v6339_v26 }
 0x231   : > { %v1304_v30 = vmul.f32 %v6994_v42, %v11457_v49  ;;  %v1305_v50 = vmul.f32 %v6994_v42, %v11458_v63  ;;  %v1306_v4 = vmul.f32 %v6994_v42, %v9285_v47 }
 0x232   : > { %v1105_v25 = vpop.xlane.xlu1 %1104  ;;  %6999 = vrsqrt.f32 %v1154_v43  ;;  %v6340_v1 = vpack.c.bf16 %v1302_v53, %v1301_v59  ;;  %v11470_v59 = vld [vmem:[#allocation100_spill] sm:$0xff] }
 0x233   : > { %v6341_v51 = vpack.c.bf16 %v1304_v30, %v1303_v16  ;;  %v1130_v58 = vmul.f32 0.0013020834, %v1105_v25  ;;  %v6342_v36 = vpack.c.bf16 %v1306_v4, %v1305_v50  ;;  %v11471_v53 = vld [vmem:[#allocation104_spill] sm:$0xff] }
 0x234   : > { %v6996_v2 = vpop.eup %6995  ;;  %1847 = vst [vmem:[#allocation2 + $0x1e0] sm:$0xff] %v6340_v1  ;;  %v11472_v16 = vld [vmem:[#allocation108_spill] sm:$0xff] }
 0x235   : > { %1848 = vst [vmem:[#allocation2 + $0x1e8] sm:$0xff] %v6341_v51  ;;  %v1155_v34 = vadd.f32 1e-06, %v1130_v58  ;;  %1849 = vst [vmem:[#allocation2 + $0x1f0] sm:$0xff] %v6342_v36  ;;  %v1307_v17 = vmul.f32 %v6996_v2, %v11459_v7  ;;  %v1308_v21 = vmul.f32 %v6996_v2, %v11460_v10  ;;  %v1309_v22 = vmul.f32 %v6996_v2, %v11461_v3 }
 0x236   : > { %v1310_v47 = vmul.f32 %v6996_v2, %v9305_v32  ;;  %v1311_v48 = vmul.f32 %v6996_v2, %v9315_v57  ;;  %v1312_v61 = vmul.f32 %v6996_v2, %v11462_v0 }
 0x237   : > { %7001 = vrsqrt.f32 %v1155_v34  ;;  %v6343_v28 = vpack.c.bf16 %v1308_v21, %v1307_v17 }
 0x238   : > { %v6998_v15 = vpop.eup %6997  ;;  %v6344_v5 = vpack.c.bf16 %v1310_v47, %v1309_v22  ;;  %v6345_v23 = vpack.c.bf16 %v1312_v61, %v1311_v48 }
 0x239   : > { %v1313_v38 = vmul.f32 %v6998_v15, %v11463_v27  ;;  %v1314_v20 = vmul.f32 %v6998_v15, %v11464_v56  ;;  %v1315_v8 = vmul.f32 %v6998_v15, %v11465_v37  ;;  %v1316_v52 = vmul.f32 %v6998_v15, %v9343_v18  ;;  %1850 = vst [vmem:[#allocation2 + $0x1f8] sm:$0xff] %v6343_v28 }
 0x23a   : > { %v1317_v60 = vmul.f32 %v6998_v15, %v9355_v39  ;;  %v1318_v32 = vmul.f32 %v6998_v15, %v9369_v29  ;;  %1851 = vst [vmem:[#allocation2 + $0x200] sm:$0xff] %v6344_v5  ;;  %1852 = vst [vmem:[#allocation2 + $0x208] sm:$0xff] %v6345_v23 }
 0x23b   : > { %v6346_v57 = vpack.c.bf16 %v1314_v20, %v1313_v38  ;;  %v6347_v19 = vpack.c.bf16 %v1316_v52, %v1315_v8 }
 0x23c   : > { %v7000_v46 = vpop.eup %6999  ;;  %v6348_v9 = vpack.c.bf16 %v1318_v32, %v1317_v60 }
 0x23d   : > { %1853 = vst [vmem:[#allocation2 + $0x210] sm:$0xff] %v6346_v57  ;;  %1854 = vst [vmem:[#allocation2 + $0x218] sm:$0xff] %v6347_v19  ;;  %v1319_v62 = vmul.f32 %v7000_v46, %v11466_v24  ;;  %v1320_v33 = vmul.f32 %v7000_v46, %v11467_v14  ;;  %v1321_v18 = vmul.f32 %v7000_v46, %v11468_v31 }
 0x23e   : > { %v1322_v39 = vmul.f32 %v7000_v46, %v11469_v55  ;;  %1855 = vst [vmem:[#allocation2 + $0x220] sm:$0xff] %v6348_v9  ;;  %v1323_v29 = vmul.f32 %v7000_v46, %v9389_v45  ;;  %v1324_v40 = vmul.f32 %v7000_v46, %v9408_v41  ;;  %v11473_v45 = vld [vmem:[#allocation110_spill] sm:$0xff] }
 0x23f   : > { %v6349_v6 = vpack.c.bf16 %v1320_v33, %v1319_v62 }
 0x240   : > { %v6350_v35 = vpack.c.bf16 %v1322_v39, %v1321_v18  ;;  %v6351_v42 = vpack.c.bf16 %v1324_v40, %v1323_v29 }
 0x241   : > { %v7002_v26 = vpop.eup %7001  ;;  %1856 = vst [vmem:[#allocation2 + $0x228] sm:$0xff] %v6349_v6 }
 0x242   : > { %1857 = vst [vmem:[#allocation2 + $0x230] sm:$0xff] %v6350_v35  ;;  %v1325_v43 = vmul.f32 %v7002_v26, %v9396_v44  ;;  %v1326_v54 = vmul.f32 %v7002_v26, %v9401_v13  ;;  %v1327_v12 = vmul.f32 %v7002_v26, %v11470_v59  ;;  %v1328_v11 = vmul.f32 %v7002_v26, %v11471_v53 }
 0x243   : > { %1858 = vst [vmem:[#allocation2 + $0x238] sm:$0xff] %v6351_v42  ;;  %v1329_v49 = vmul.f32 %v7002_v26, %v11472_v16  ;;  %v1330_v30 = vmul.f32 %v7002_v26, %v11473_v45 }
 0x244   : > { %v6352_v41 = vpack.c.bf16 %v1326_v54, %v1325_v43  ;;  %v6353_v63 = vpack.c.bf16 %v1328_v11, %v1327_v12 }
 0x245   : > { %v6354_v50 = vpack.c.bf16 %v1330_v30, %v1329_v49 }
 0x246   : > { %1859 = vst [vmem:[#allocation2 + $0x240] sm:$0xff] %v6352_v41  ;;  %1860 = vst [vmem:[#allocation2 + $0x248] sm:$0xff] %v6353_v63 }
 0x247   : > { %1861 = vst [vmem:[#allocation2 + $0x250] sm:$0xff] %v6354_v50 }
 0x248 PF: > { %v7003_v44 = vld [vmem:[%s8070_s27 + $0x4] ss:$24 sps:$4 sm:$0xff]   ;;  %v7007_v4 = vld [vmem:[%s8070_s27] ss:$24 sps:$4 sm:$0xff]   ;;  %v7009_v1 = vld [vmem:[%s8070_s27 + $0x34] ss:$24 sps:$4 sm:$0xff]  }
 0x249   : > { %v7005_v13 = vld [vmem:[%s8070_s27 + $0x304] ss:$24 sps:$4 sm:$0xff]   ;;  %4078 = vmatprep.subr.bf16.mxu1 %v7003_v44  ;;  %v7008_v25 = vld [vmem:[%s8070_s27 + $0x300] ss:$24 sps:$4 sm:$0xff]   ;;  %v7011_v51 = vld [vmem:[%s8070_s27 + $0x334] ss:$24 sps:$4 sm:$0xff]  }
 0x24a   : > { %4239 = vmatprep.subr.bf16.mxu0 %v7005_v13  ;;  %4079 = vmatpush1.bf16.msra.mxu1 %v7007_v4  ;;  %v7013_v58 = vld [vmem:[%s8070_s27 + $0x30] ss:$24 sps:$4 sm:$0xff]   ;;  %v7015_v2 = vld [vmem:[%s8070_s27 + $0x64] ss:$24 sps:$4 sm:$0xff]   ;;  %v7019_v7 = vld [vmem:[%s8070_s27 + $0x60] ss:$24 sps:$4 sm:$0xff]  }
 0x24b   : > { %4240 = vmatpush1.bf16.msra.mxu0 %v7008_v25  ;;  %4080 = vmatprep.subr.bf16.mxu1 %v7009_v1  ;;  %v7014_v36 = vld [vmem:[%s8070_s27 + $0x330] ss:$24 sps:$4 sm:$0xff]   ;;  %v7017_v34 = vld [vmem:[%s8070_s27 + $0x364] ss:$24 sps:$4 sm:$0xff]   ;;  %v7020_v17 = vld [vmem:[%s8070_s27 + $0x360] ss:$24 sps:$4 sm:$0xff]  }
 0x24c   : > { %4241 = vmatprep.subr.bf16.mxu0 %v7011_v51  ;;  %v7021_v10 = vld [vmem:[%s8070_s27 + $0x94] ss:$24 sps:$4 sm:$0xff]   ;;  %v7025_v3 = vld [vmem:[%s8070_s27 + $0x90] ss:$24 sps:$4 sm:$0xff]   ;;  %v7027_v47 = vld [vmem:[%s8070_s27 + $0xc4] ss:$24 sps:$4 sm:$0xff]  }
 0x24d   : > { %v7023_v21 = vld [vmem:[%s8070_s27 + $0x394] ss:$24 sps:$4 sm:$0xff]   ;;  %v7026_v22 = vld [vmem:[%s8070_s27 + $0x390] ss:$24 sps:$4 sm:$0xff]   ;;  %v7029_v48 = vld [vmem:[%s8070_s27 + $0x3c4] ss:$24 sps:$4 sm:$0xff]  }
 0x24e   : > { %4081 = vmatpush1.bf16.msra.mxu1 %v7013_v58  ;;  %v7031_v0 = vld [vmem:[%s8070_s27 + $0xc0] ss:$24 sps:$4 sm:$0xff]   ;;  %v7033_v15 = vld [vmem:[%s8070_s27 + $0xf4] ss:$24 sps:$4 sm:$0xff]   ;;  %v7037_v5 = vld [vmem:[%s8070_s27 + $0xf0] ss:$24 sps:$4 sm:$0xff]  }
 0x24f   : > { %4242 = vmatpush1.bf16.msra.mxu0 %v7014_v36  ;;  %4082 = vmatprep.subr.bf16.mxu1 %v7015_v2  ;;  %v7032_v61 = vld [vmem:[%s8070_s27 + $0x3c0] ss:$24 sps:$4 sm:$0xff]   ;;  %v7035_v28 = vld [vmem:[%s8070_s27 + $0x3f4] ss:$24 sps:$4 sm:$0xff]   ;;  %v7038_v27 = vld [vmem:[%s8070_s27 + $0x3f0] ss:$24 sps:$4 sm:$0xff]  }
 0x250   : > { %4243 = vmatprep.subr.bf16.mxu0 %v7017_v34  ;;  %v7039_v38 = vld [vmem:[%s8070_s27 + $0x124] ss:$24 sps:$4 sm:$0xff]   ;;  %v7043_v20 = vld [vmem:[%s8070_s27 + $0x120] ss:$24 sps:$4 sm:$0xff]   ;;  %v7045_v8 = vld [vmem:[%s8070_s27 + $0x154] ss:$24 sps:$4 sm:$0xff]  }
 0x251   : > { %v7041_v56 = vld [vmem:[%s8070_s27 + $0x424] ss:$24 sps:$4 sm:$0xff]   ;;  %v7044_v37 = vld [vmem:[%s8070_s27 + $0x420] ss:$24 sps:$4 sm:$0xff]   ;;  %v7047_v52 = vld [vmem:[%s8070_s27 + $0x454] ss:$24 sps:$4 sm:$0xff]  }
 0x252   : > { %4083 = vmatpush1.bf16.msra.mxu1 %v7019_v7  ;;  %v7049_v60 = vld [vmem:[%s8070_s27 + $0x150] ss:$24 sps:$4 sm:$0xff]   ;;  %v7051_v23 = vld [vmem:[%s8070_s27 + $0x184] ss:$24 sps:$4 sm:$0xff]   ;;  %v7055_v19 = vld [vmem:[%s8070_s27 + $0x180] ss:$24 sps:$4 sm:$0xff]  }
 0x253   : > { %4244 = vmatpush1.bf16.msra.mxu0 %v7020_v17  ;;  %4084 = vmatprep.subr.bf16.mxu1 %v7021_v10  ;;  %v7050_v32 = vld [vmem:[%s8070_s27 + $0x450] ss:$24 sps:$4 sm:$0xff]   ;;  %v7053_v57 = vld [vmem:[%s8070_s27 + $0x484] ss:$24 sps:$4 sm:$0xff]   ;;  %v7056_v46 = vld [vmem:[%s8070_s27 + $0x480] ss:$24 sps:$4 sm:$0xff]  }
 0x254   : > { %4245 = vmatprep.subr.bf16.mxu0 %v7023_v21  ;;  %v7057_v9 = vld [vmem:[%s8070_s27 + $0x1b4] ss:$24 sps:$4 sm:$0xff]   ;;  %v7061_v62 = vld [vmem:[%s8070_s27 + $0x1b0] ss:$24 sps:$4 sm:$0xff]   ;;  %v7063_v33 = vld [vmem:[%s8070_s27 + $0x1e4] ss:$24 sps:$4 sm:$0xff]  }
 0x255   : > { %v7059_v24 = vld [vmem:[%s8070_s27 + $0x4b4] ss:$24 sps:$4 sm:$0xff]   ;;  %v7062_v14 = vld [vmem:[%s8070_s27 + $0x4b0] ss:$24 sps:$4 sm:$0xff]   ;;  %v7065_v31 = vld [vmem:[%s8070_s27 + $0x4e4] ss:$24 sps:$4 sm:$0xff]  }
 0x256   : > { %4085 = vmatpush1.bf16.msra.mxu1 %v7025_v3  ;;  %v7067_v18 = vld [vmem:[%s8070_s27 + $0x1e0] ss:$24 sps:$4 sm:$0xff]   ;;  %v7069_v39 = vld [vmem:[%s8070_s27 + $0x214] ss:$24 sps:$4 sm:$0xff]   ;;  %v7073_v40 = vld [vmem:[%s8070_s27 + $0x210] ss:$24 sps:$4 sm:$0xff]  }
 0x257   : > { %4246 = vmatpush1.bf16.msra.mxu0 %v7026_v22  ;;  %4086 = vmatprep.subr.bf16.mxu1 %v7027_v47  ;;  %v7068_v55 = vld [vmem:[%s8070_s27 + $0x4e0] ss:$24 sps:$4 sm:$0xff]   ;;  %v7071_v29 = vld [vmem:[%s8070_s27 + $0x514] ss:$24 sps:$4 sm:$0xff]   ;;  %v7074_v6 = vld [vmem:[%s8070_s27 + $0x510] ss:$24 sps:$4 sm:$0xff]  }
 0x258   : > { %4247 = vmatprep.subr.bf16.mxu0 %v7029_v48  ;;  %v9633_v35 = vld [vmem:[#allocation2 + $0x4] ss:$24 sps:$4 sm:$0xff]   ;;  %v7079_v54 = vld [vmem:[%s8070_s27 + $0x240] ss:$24 sps:$4 sm:$0xff]   ;;  %v7085_v11 = vld [vmem:[%s8070_s27 + $0x270] ss:$24 sps:$4 sm:$0xff]  }
 0x259   : > { %v7075_v42 = vld [vmem:[%s8070_s27 + $0x244] ss:$24 sps:$4 sm:$0xff]   ;;  %4110 = vmatprep.mubr.bf16.mxu1 %v9633_v35  ;;  %v7080_v59 = vld [vmem:[%s8070_s27 + $0x540] ss:$24 sps:$4 sm:$0xff]   ;;  %v7081_v12 = vld [vmem:[%s8070_s27 + $0x274] ss:$24 sps:$4 sm:$0xff]  }
 0x25a   : > { %4087 = vmatpush1.bf16.msra.mxu1 %v7031_v0  ;;  %v7101_v26 = vld [vmem:[#allocation2 + $0xc] ss:$24 sps:$4 sm:$0xff]   ;;  %v7083_v53 = vld [vmem:[%s8070_s27 + $0x574] ss:$24 sps:$4 sm:$0xff]   ;;  %v7086_v16 = vld [vmem:[%s8070_s27 + $0x570] ss:$24 sps:$4 sm:$0xff]  }
 0x25b   : > { %4248 = vmatpush1.bf16.msra.mxu0 %v7032_v61  ;;  %4088 = vmatprep.subr.bf16.mxu1 %v7033_v15  ;;  %v7077_v43 = vld [vmem:[%s8070_s27 + $0x544] ss:$24 sps:$4 sm:$0xff]   ;;  %v7091_v30 = vld [vmem:[%s8070_s27 + $0x2a0] ss:$24 sps:$4 sm:$0xff]   ;;  %v7093_v63 = vld [vmem:[%s8070_s27 + $0x2d4] ss:$24 sps:$4 sm:$0xff]  }
 0x25c   : > { %4249 = vmatprep.subr.bf16.mxu0 %v7035_v28  ;;  %4271 = vmatprep.mubr.bf16.mxu0 %v7101_v26  ;;  %v7087_v49 = vld [vmem:[%s8070_s27 + $0x2a4] ss:$24 sps:$4 sm:$0xff]   ;;  %v7092_v41 = vld [vmem:[%s8070_s27 + $0x5a0] ss:$24 sps:$4 sm:$0xff]   ;;  %v7095_v50 = vld [vmem:[%s8070_s27 + $0x5d4] ss:$24 sps:$4 sm:$0xff]  }
 0x25d   : > { %v7089_v45 = vld [vmem:[%s8070_s27 + $0x5a4] ss:$24 sps:$4 sm:$0xff]   ;;  %v7097_v44 = vld [vmem:[%s8070_s27 + $0x2d0] ss:$24 sps:$4 sm:$0xff]   ;;  %v7104_v51 = vld [vmem:[#allocation2 + $0x8] ss:$24 sps:$4 sm:$0xff]  }
 0x25e   : > { %4089 = vmatpush1.bf16.msra.mxu1 %v7037_v5  ;;  %v7098_v13 = vld [vmem:[%s8070_s27 + $0x5d0] ss:$24 sps:$4 sm:$0xff]   ;;  %v7107_v4 = vld [vmem:[%s8070_s27 + $0x604] ss:$24 sps:$4 sm:$0xff]   ;;  %v7105_v58 = vld [vmem:[%s8070_s27 + $0x600] ss:$24 sps:$4 sm:$0xff]  }
 0x25f   : > { %4250 = vmatpush1.bf16.msra.mxu0 %v7038_v27  ;;  %4090 = vmatprep.subr.bf16.mxu1 %v7039_v38  ;;  %v7119_v25 = vld [vmem:[%s8070_s27 + $0xc] ss:$24 sps:$4 sm:$0xff]   ;;  %v9654_v1 = vld [vmem:[#allocation2] ss:$24 sps:$4 sm:$0xff]   ;;  %v7117_v7 = vld [vmem:[%s8070_s27 + $0x8] ss:$24 sps:$4 sm:$0xff]  }
 0x260   : > { %4251 = vmatprep.subr.bf16.mxu0 %v7041_v56  ;;  %v9657_v36 = vld [vmem:[#allocation2 + $0x34] ss:$24 sps:$4 sm:$0xff]   ;;  %v7131_v17 = vld [vmem:[%s8070_s27 + $0x3c] ss:$24 sps:$4 sm:$0xff]   ;;  %v7112_v10 = vld [vmem:[%s8070_s27 + $0x630] ss:$24 sps:$4 sm:$0xff]  }
 0x261   : > { %v7110_v2 = vld [vmem:[#allocation2 + $0x3c] ss:$24 sps:$4 sm:$0xff]   ;;  %v9665_v21 = vld [vmem:[#allocation2 + $0x30] ss:$24 sps:$4 sm:$0xff]   ;;  %v7122_v3 = vld [vmem:[%s8070_s27 + $0x664] ss:$24 sps:$4 sm:$0xff]  }
 0x262   : > { %4091 = vmatpush1.bf16.msra.mxu1 %v7043_v20  ;;  %v7114_v34 = vld [vmem:[%s8070_s27 + $0x634] ss:$24 sps:$4 sm:$0xff]   ;;  %v7116_v22 = vld [vmem:[#allocation2 + $0x38] ss:$24 sps:$4 sm:$0xff]   ;;  %v7120_v48 = vld [vmem:[%s8070_s27 + $0x660] ss:$24 sps:$4 sm:$0xff]  }
 0x263   : > { %4252 = vmatpush1.bf16.msra.mxu0 %v7044_v37  ;;  %4092 = vmatprep.subr.bf16.mxu1 %v7045_v8  ;;  %v7129_v47 = vld [vmem:[%s8070_s27 + $0x38] ss:$24 sps:$4 sm:$0xff]   ;;  %v9670_v0 = vld [vmem:[#allocation2 + $0x64] ss:$24 sps:$4 sm:$0xff]   ;;  %v7141_v28 = vld [vmem:[%s8070_s27 + $0x6c] ss:$24 sps:$4 sm:$0xff]  }
 0x264   : > { %4253 = vmatprep.subr.bf16.mxu0 %v7047_v52  ;;  %v7125_v61 = vld [vmem:[#allocation2 + $0x6c] ss:$24 sps:$4 sm:$0xff]   ;;  %v7134_v15 = vld [vmem:[%s8070_s27 + $0x694] ss:$24 sps:$4 sm:$0xff]   ;;  %v7132_v5 = vld [vmem:[%s8070_s27 + $0x690] ss:$24 sps:$4 sm:$0xff]  }
 0x265   : > { %v7139_v27 = vld [vmem:[%s8070_s27 + $0x68] ss:$24 sps:$4 sm:$0xff]   ;;  %v7149_v38 = vld [vmem:[%s8070_s27 + $0x9c] ss:$24 sps:$4 sm:$0xff]   ;;  %v9680_v20 = vld [vmem:[#allocation2 + $0x60] ss:$24 sps:$4 sm:$0xff]  }
 0x266   : > { %4093 = vmatpush1.bf16.msra.mxu1 %v7049_v60  ;;  %v7146_v56 = vld [vmem:[%s8070_s27 + $0x6c4] ss:$24 sps:$4 sm:$0xff]   ;;  %v7128_v37 = vld [vmem:[#allocation2 + $0x68] ss:$24 sps:$4 sm:$0xff]   ;;  %v7137_v52 = vld [vmem:[#allocation2 + $0x9c] ss:$24 sps:$4 sm:$0xff]  }
 0x267   : > { %4254 = vmatpush1.bf16.msra.mxu0 %v7050_v32  ;;  %4094 = vmatprep.subr.bf16.mxu1 %v7051_v23  ;;  %v9682_v8 = vld [vmem:[#allocation2 + $0x94] ss:$24 sps:$4 sm:$0xff]   ;;  %v7144_v60 = vld [vmem:[%s8070_s27 + $0x6c0] ss:$24 sps:$4 sm:$0xff]   ;;  %s6274_s25 = sshll.u32 %s7800_s16, 1  ;;  %s5693_s23 = sshll.u32 %s8080_s6, 4  ;;  %s10735_s23 = int_to_ptr.vmem [resolvable:$true] %s5693_s23 }
 0x268   : > { %4255 = vmatprep.subr.bf16.mxu0 %v7053_v57  ;;  %v7147_v32 = vld [vmem:[%s8070_s27 + $0x98] ss:$24 sps:$4 sm:$0xff]   ;;  %v7158_v23 = vld [vmem:[%s8070_s27 + $0x6f4] ss:$24 sps:$4 sm:$0xff]   ;;  %v7183_v26 = vld [vmem:[%s8070_s27 + $0x128] ss:$24 sps:$4 sm:$0xff]   ;;  %s5686_s16 = sadd.s32 %s7796_s15, %s6274_s25 }
 0x269   : > { %v7161_v57 = vld [vmem:[%s8070_s27 + $0xcc] ss:$24 sps:$4 sm:$0xff]   ;;  %s6355_s5 = smul.u32 768, %s5686_s16  ;;  %s5678_s21 = scalar_lea.sflag [#allocation5], %s8067_s9 }
 0x26a   : > { %4095 = vmatpush1.bf16.msra.mxu1 %v7055_v19  ;;  %v7156_v19 = vld [vmem:[%s8070_s27 + $0x6f0] ss:$24 sps:$4 sm:$0xff]   ;;  %s7710_s7 = scalar_lea.vmem %s10735_s23, 19200  ;;  %p11538_p1 = scmp.ne.s32.totalorder %s11045_s8, 0 }
 0x26b   : > { %4256 = vmatpush1.bf16.msra.mxu0 %v7056_v46  ;;  %4096 = vmatprep.subr.bf16.mxu1 %v7057_v9  ;;  %v9691_v46 = vld [vmem:[#allocation2 + $0x90] ss:$24 sps:$4 sm:$0xff]   ;;  %s10731_s4 = scalar_lea.hbm %s10796_s3, %s6355_s5  ;;  %p7711_p6 = scmp.ne.s32.totalorder %s10735_s23, %s7710_s7 }
 0x26c   : > { %4257 = vmatprep.subr.bf16.mxu0 %v7059_v24  ;;  %v7143_v9 = vld [vmem:[#allocation2 + $0x98] ss:$24 sps:$4 sm:$0xff]   ;;  %s7822_s24 = smov [#allocation9]  }
 0x26d   : > { %v7159_v24 = vld [vmem:[%s8070_s27 + $0xc8] ss:$24 sps:$4 sm:$0xff]   ;;  %p7712_p12 = pnand %p7711_p6, %p11538_p1  ;;  %s7714_s17 = sshll.u32 %s7822_s24, 4  ;;  %s7715_s17 = int_to_ptr.vmem [resolvable:$false] %s7714_s17 }
 0x26e   : > { %4097 = vmatpush1.bf16.msra.mxu1 %v7061_v62  ;;  %v9694_v62 = vld [vmem:[#allocation2 + $0xc4] ss:$24 sps:$4 sm:$0xff]   ;;  %s7716_s18 = scalar_lea.vmem %s7715_s17, 38400  ;;  %p7717_p9 = scmp.lt.s32.totalorder %s10735_s23, %s7715_s17 }
 0x26f   : > { %4258 = vmatpush1.bf16.msra.mxu0 %v7062_v14  ;;  %4098 = vmatprep.subr.bf16.mxu1 %v7063_v33  ;;  %v7168_v14 = vld [vmem:[%s8070_s27 + $0x724] ss:$24 sps:$4 sm:$0xff]   ;;  %p7713_p0 = pneg %p7712_p12  ;;  %p7718_p5 = scmp.lt.s32.totalorder %s7716_s18, %s7710_s7 }
 0x270   : > { %4259 = vmatprep.subr.bf16.mxu0 %v7065_v31  ;;  %v7173_v33 = vld [vmem:[%s8070_s27 + $0xfc] ss:$24 sps:$4 sm:$0xff]  }
 0x271   : > { %v7152_v31 = vld [vmem:[#allocation2 + $0xcc] ss:$24 sps:$4 sm:$0xff]   ;;  %p7719_p8 = por %p7718_p5, %p7717_p9 }
 0x272   : > { %4099 = vmatpush1.bf16.msra.mxu1 %v7067_v18  ;;  %v7166_v18 = vld [vmem:[%s8070_s27 + $0x720] ss:$24 sps:$4 sm:$0xff]  }
 0x273   : > { %4260 = vmatpush1.bf16.msra.mxu0 %v7068_v55  ;;  %4100 = vmatprep.subr.bf16.mxu1 %v7069_v39  ;;  %v7171_v55 = vld [vmem:[%s8070_s27 + $0xf8] ss:$24 sps:$4 sm:$0xff]   ;;  %v7176_v39 = vld [vmem:[%s8070_s27 + $0x754] ss:$24 sps:$4 sm:$0xff]   ;;  %p7720_p10 = pnand %p7719_p8, %p7713_p0 }
 0x274   : > { %4261 = vmatprep.subr.bf16.mxu0 %v7071_v29  ;;  %v7185_v29 = vld [vmem:[%s8070_s27 + $0x12c] ss:$24 sps:$4 sm:$0xff]  }
 0x276   : > { %4101 = vmatpush1.bf16.msra.mxu1 %v7073_v40  ;;  %v7174_v40 = vld [vmem:[%s8070_s27 + $0x750] ss:$24 sps:$4 sm:$0xff]  }
 0x277   : > { %4262 = vmatpush1.bf16.msra.mxu0 %v7074_v6  ;;  %4102 = vmatprep.subr.bf16.mxu1 %v7075_v42  ;;  %v9705_v6 = vld [vmem:[#allocation2 + $0xc0] ss:$24 sps:$4 sm:$0xff]  }
 0x278   : > { %4263 = vmatprep.subr.bf16.mxu0 %v7077_v43  ;;  %v7155_v42 = vld [vmem:[#allocation2 + $0xc8] ss:$24 sps:$4 sm:$0xff]   ;;  %v7188_v43 = vld [vmem:[%s8070_s27 + $0x784] ss:$24 sps:$4 sm:$0xff]  }
 0x27a   : > { %4103 = vmatpush1.bf16.msra.mxu1 %v7079_v54  ;;  %v7197_v54 = vld [vmem:[%s8070_s27 + $0x15c] ss:$24 sps:$4 sm:$0xff]  }
 0x27b   : > { %4264 = vmatpush1.bf16.msra.mxu0 %v7080_v59  ;;  %4104 = vmatprep.subr.bf16.mxu1 %v7081_v12  ;;  %v9710_v59 = vld [vmem:[#allocation2 + $0xf4] ss:$24 sps:$4 sm:$0xff]  }
 0x27c   : > { %4265 = vmatprep.subr.bf16.mxu0 %v7083_v53  ;;  %v7164_v12 = vld [vmem:[#allocation2 + $0xfc] ss:$24 sps:$4 sm:$0xff]   ;;  %v7186_v53 = vld [vmem:[%s8070_s27 + $0x780] ss:$24 sps:$4 sm:$0xff]  }
 0x27e   : > { %4105 = vmatpush1.bf16.msra.mxu1 %v7085_v11  ;;  %v7195_v11 = vld [vmem:[%s8070_s27 + $0x158] ss:$24 sps:$4 sm:$0xff]  }
 0x27f   : > { %4266 = vmatpush1.bf16.msra.mxu0 %v7086_v16  ;;  %4106 = vmatprep.subr.bf16.mxu1 %v7087_v49  ;;  %v7200_v16 = vld [vmem:[%s8070_s27 + $0x7b4] ss:$24 sps:$4 sm:$0xff]  }
 0x280   : > { %4267 = vmatprep.subr.bf16.mxu0 %v7089_v45  ;;  %v7203_v49 = vld [vmem:[%s8070_s27 + $0x18c] ss:$24 sps:$4 sm:$0xff]   ;;  %v7198_v45 = vld [vmem:[%s8070_s27 + $0x7b0] ss:$24 sps:$4 sm:$0xff]  }
 0x282   : > { %4107 = vmatpush1.bf16.msra.mxu1 %v7091_v30  ;;  %v7201_v30 = vld [vmem:[%s8070_s27 + $0x188] ss:$24 sps:$4 sm:$0xff]  }
 0x283   : > { %4268 = vmatpush1.bf16.msra.mxu0 %v7092_v41  ;;  %4108 = vmatprep.subr.bf16.mxu1 %v7093_v63  ;;  %v9720_v41 = vld [vmem:[#allocation2 + $0xf0] ss:$24 sps:$4 sm:$0xff]   ;;  %v7212_v63 = vld [vmem:[%s8070_s27 + $0x7e4] ss:$24 sps:$4 sm:$0xff]  }
 0x284   : > { %4269 = vmatprep.subr.bf16.mxu0 %v7095_v50  ;;  %v7215_v50 = vld [vmem:[%s8070_s27 + $0x1bc] ss:$24 sps:$4 sm:$0xff]  }
 0x286   : > { %4109 = vmatpush1.bf16.msra.mxu1 %v7097_v44  ;;  %v7170_v44 = vld [vmem:[#allocation2 + $0xf8] ss:$24 sps:$4 sm:$0xff]  }
 0x287   : > { %4270 = vmatpush1.bf16.msra.mxu0 %v7098_v13  ;;  %4561 = vmatprep.subr.bf16.mxu1 %v7119_v25  ;;  %v9724_v13 = vld [vmem:[#allocation2 + $0x124] ss:$24 sps:$4 sm:$0xff]   ;;  %v7210_v25 = vld [vmem:[%s8070_s27 + $0x7e0] ss:$24 sps:$4 sm:$0xff]  }
 0x288   : > { %4400 = vmatprep.subr.bf16.mxu0 %v7107_v4  ;;  %v7179_v4 = vld [vmem:[#allocation2 + $0x12c] ss:$24 sps:$4 sm:$0xff]  }
 0x289   : > { %4111 = vmatmul.mubr.bf16.vlgmr.msra.gmra.mrb[0].mxu1 %v9654_v1 }
 0x28a   : > { %4272 = vmatmul.mubr.bf16.vlgmr.msra.gmra.mrb[0].mxu0 %v7104_v51  ;;  %4120 = vmatprep.mubr.bf16.mxu1 %v9657_v36  ;;  %v7213_v51 = vld [vmem:[%s8070_s27 + $0x1b8] ss:$24 sps:$4 sm:$0xff]  }
 0x28b   : > { %4401 = vmatpush1.bf16.msra.mxu0 %v7105_v58  ;;  %4281 = vmatprep.mubr.bf16.mxu0 %v7110_v2  ;;  %v7224_v58 = vld [vmem:[%s8070_s27 + $0x814] ss:$24 sps:$4 sm:$0xff]  }
 0x28c   : > { %4402 = vmatprep.subr.bf16.mxu0 %v7114_v34  ;;  %4562 = vmatpush1.bf16.msra.mxu1 %v7117_v7  ;;  %v7227_v2 = vld [vmem:[%s8070_s27 + $0x1ec] ss:$24 sps:$4 sm:$0xff]   ;;  %v7222_v34 = vld [vmem:[%s8070_s27 + $0x810] ss:$24 sps:$4 sm:$0xff]  }
 0x28d   : > { %4563 = vmatprep.subr.bf16.mxu1 %v7131_v17  ;;  %v9733_v7 = vld [vmem:[#allocation2 + $0x120] ss:$24 sps:$4 sm:$0xff]   ;;  %v7225_v17 = vld [vmem:[%s8070_s27 + $0x1e8] ss:$24 sps:$4 sm:$0xff]  }
 0x28f   : > { %4403 = vmatpush1.bf16.msra.mxu0 %v7112_v10  ;;  %v7230_v10 = vld [vmem:[%s8070_s27 + $0x844] ss:$24 sps:$4 sm:$0xff]  }
 0x290   : > { %4404 = vmatprep.subr.bf16.mxu0 %v7122_v3  ;;  %4564 = vmatpush1.bf16.msra.mxu1 %v7129_v47  ;;  %v7239_v3 = vld [vmem:[%s8070_s27 + $0x21c] ss:$24 sps:$4 sm:$0xff]   ;;  %v9738_v47 = vld [vmem:[#allocation2 + $0x154] ss:$24 sps:$4 sm:$0xff]  }
 0x291   : > { %4121 = vmatmul.mubr.bf16.gmra.mrb[4].mxu1 %v9665_v21  ;;  %4565 = vmatprep.subr.bf16.mxu1 %v7141_v28  ;;  %v7242_v28 = vld [vmem:[%s8070_s27 + $0x874] ss:$24 sps:$4 sm:$0xff]  }
 0x292   : > { %4282 = vmatmul.mubr.bf16.gmra.mrb[4].mxu0 %v7116_v22  ;;  %4130 = vmatprep.mubr.bf16.mxu1 %v9670_v0  ;;  %v7182_v22 = vld [vmem:[#allocation2 + $0x128] ss:$24 sps:$4 sm:$0xff]  }
 0x293   : > { %4405 = vmatpush1.bf16.msra.mxu0 %v7120_v48  ;;  %4291 = vmatprep.mubr.bf16.mxu0 %v7125_v61  ;;  %v7191_v48 = vld [vmem:[#allocation2 + $0x15c] ss:$24 sps:$4 sm:$0xff]   ;;  %v7228_v61 = vld [vmem:[%s8070_s27 + $0x840] ss:$24 sps:$4 sm:$0xff]  }
 0x294   : > { %4406 = vmatprep.subr.bf16.mxu0 %v7134_v15  ;;  %4566 = vmatpush1.bf16.msra.mxu1 %v7139_v27  ;;  %v7237_v15 = vld [vmem:[%s8070_s27 + $0x218] ss:$24 sps:$4 sm:$0xff]  }
 0x295   : > { %4567 = vmatprep.subr.bf16.mxu1 %v7149_v38  ;;  %v7240_v27 = vld [vmem:[%s8070_s27 + $0x870] ss:$24 sps:$4 sm:$0xff]  }
 0x296   : > { %v9747_v38 = vld [vmem:[#allocation2 + $0x150] ss:$24 sps:$4 sm:$0xff]  }
 0x297   : > { %4407 = vmatpush1.bf16.msra.mxu0 %v7132_v5  ;;  %v7251_v5 = vld [vmem:[%s8070_s27 + $0x24c] ss:$24 sps:$4 sm:$0xff]  }
 0x298   : > { %4408 = vmatprep.subr.bf16.mxu0 %v7146_v56  ;;  %4568 = vmatpush1.bf16.msra.mxu1 %v7147_v32  ;;  %v7194_v56 = vld [vmem:[#allocation2 + $0x158] ss:$24 sps:$4 sm:$0xff]   ;;  %v9752_v32 = vld [vmem:[#allocation2 + $0x184] ss:$24 sps:$4 sm:$0xff]  }
 0x299   : > { %4131 = vmatmul.mubr.bf16.gmra.mrb[8].mxu1 %v9680_v20  ;;  %4569 = vmatprep.subr.bf16.mxu1 %v7161_v57  ;;  %v7252_v57 = vld [vmem:[%s8070_s27 + $0x8a0] ss:$24 sps:$4 sm:$0xff]  }
 0x29a   : > { %4292 = vmatmul.mubr.bf16.gmra.mrb[8].mxu0 %v7128_v37  ;;  %4140 = vmatprep.mubr.bf16.mxu1 %v9682_v8  ;;  %v7249_v37 = vld [vmem:[%s8070_s27 + $0x248] ss:$24 sps:$4 sm:$0xff]  }
 0x29b   : > { %4301 = vmatprep.mubr.bf16.mxu0 %v7137_v52  ;;  %4409 = vmatpush1.bf16.msra.mxu0 %v7144_v60  ;;  %v7254_v52 = vld [vmem:[%s8070_s27 + $0x8a4] ss:$24 sps:$4 sm:$0xff]  }
 0x29c   : > { %4410 = vmatprep.subr.bf16.mxu0 %v7158_v23  ;;  %4570 = vmatpush1.bf16.msra.mxu1 %v7159_v24  ;;  %v7257_v60 = vld [vmem:[%s8070_s27 + $0x27c] ss:$24 sps:$4 sm:$0xff]  }
 0x29d   : > { %4571 = vmatprep.subr.bf16.mxu1 %v7173_v33  ;;  %v7206_v23 = vld [vmem:[#allocation2 + $0x18c] ss:$24 sps:$4 sm:$0xff]   ;;  %v7267_v24 = vld [vmem:[%s8070_s27 + $0x8d4] ss:$24 sps:$4 sm:$0xff]   ;;  %v9761_v33 = vld [vmem:[#allocation2 + $0x180] ss:$24 sps:$4 sm:$0xff]  }
 0x29f   : > { %4411 = vmatpush1.bf16.msra.mxu0 %v7156_v19  ;;  %v7255_v19 = vld [vmem:[%s8070_s27 + $0x278] ss:$24 sps:$4 sm:$0xff]  }
 0x2a0   : > { %4412 = vmatprep.subr.bf16.mxu0 %v7168_v14  ;;  %4572 = vmatpush1.bf16.msra.mxu1 %v7171_v55  ;;  %v7262_v14 = vld [vmem:[%s8070_s27 + $0x2a8] ss:$24 sps:$4 sm:$0xff]   ;;  %v7276_v55 = vld [vmem:[%s8070_s27 + $0x14] ss:$24 sps:$4 sm:$0xff]  }
 0x2a1   : > { %4141 = vmatmul.mubr.bf16.gmra.mrb[12].mxu1 %v9691_v46  ;;  %4573 = vmatprep.subr.bf16.mxu1 %v7185_v29  ;;  %v9766_v29 = vld [vmem:[#allocation2 + $0x1b4] ss:$24 sps:$4 sm:$0xff]  }
 0x2a2   : > { %4302 = vmatmul.mubr.bf16.gmra.mrb[12].mxu0 %v7143_v9  ;;  %4150 = vmatprep.mubr.bf16.mxu1 %v9694_v62  ;;  %v7264_v9 = vld [vmem:[%s8070_s27 + $0x2ac] ss:$24 sps:$4 sm:$0xff]  }
 0x2a3   : > { %4311 = vmatprep.mubr.bf16.mxu0 %v7152_v31  ;;  %4413 = vmatpush1.bf16.msra.mxu0 %v7166_v18  ;;  %v7265_v31 = vld [vmem:[%s8070_s27 + $0x8d0] ss:$24 sps:$4 sm:$0xff]   ;;  %v7270_v18 = vld [vmem:[%s8070_s27 + $0x2dc] ss:$24 sps:$4 sm:$0xff]  }
 0x2a4   : > { %4414 = vmatprep.subr.bf16.mxu0 %v7176_v39  ;;  %4574 = vmatpush1.bf16.msra.mxu1 %v7183_v26  ;;  %v7209_v39 = vld [vmem:[#allocation2 + $0x188] ss:$24 sps:$4 sm:$0xff]   ;;  %v7285_v26 = vld [vmem:[%s8070_s27 + $0x30c] ss:$24 sps:$4 sm:$0xff]  }
 0x2a5   : > { %4575 = vmatprep.subr.bf16.mxu1 %v7197_v54  ;;  %v7221_v54 = vld [vmem:[#allocation2 + $0x1b8] ss:$24 sps:$4 sm:$0xff]  }
 0x2a7   : > { %4415 = vmatpush1.bf16.msra.mxu0 %v7174_v40  ;;  %v7218_v40 = vld [vmem:[#allocation2 + $0x1bc] ss:$24 sps:$4 sm:$0xff]  }
 0x2a8   : > { %4416 = vmatprep.subr.bf16.mxu0 %v7188_v43  ;;  %4576 = vmatpush1.bf16.msra.mxu1 %v7195_v11  ;;  %v9772_v43 = vld [vmem:[#allocation2 + $0x1b0] ss:$24 sps:$4 sm:$0xff]   ;;  %v9778_v11 = vld [vmem:[#allocation2 + $0x1e0] ss:$24 sps:$4 sm:$0xff]  }
 0x2a9   : > { %4151 = vmatmul.mubr.bf16.gmra.mrb[16].mxu1 %v9705_v6  ;;  %4577 = vmatprep.subr.bf16.mxu1 %v7203_v49  ;;  %v9780_v49 = vld [vmem:[#allocation2 + $0x214] ss:$24 sps:$4 sm:$0xff]  }
 0x2aa   : > { %4312 = vmatmul.mubr.bf16.gmra.mrb[16].mxu0 %v7155_v42  ;;  %4160 = vmatprep.mubr.bf16.mxu1 %v9710_v59  ;;  %v7268_v42 = vld [vmem:[%s8070_s27 + $0x2d8] ss:$24 sps:$4 sm:$0xff]  }
 0x2ab   : > { %4321 = vmatprep.mubr.bf16.mxu0 %v7164_v12  ;;  %4417 = vmatpush1.bf16.msra.mxu0 %v7186_v53  ;;  %v9774_v12 = vld [vmem:[#allocation2 + $0x1e4] ss:$24 sps:$4 sm:$0xff]  }
 0x2ac   : > { %4418 = vmatprep.subr.bf16.mxu0 %v7200_v16  ;;  %4578 = vmatpush1.bf16.msra.mxu1 %v7201_v30  ;;  %v7233_v53 = vld [vmem:[#allocation2 + $0x1ec] ss:$24 sps:$4 sm:$0xff]   ;;  %v7236_v16 = vld [vmem:[#allocation2 + $0x1e8] ss:$24 sps:$4 sm:$0xff]  }
 0x2ad   : > { %4579 = vmatprep.subr.bf16.mxu1 %v7215_v50  ;;  %v1934_v30 = vld [vmem:[#allocation2 + $0x240] sm:$0xff]  ;;  %v9784_v50 = vld [vmem:[#allocation2 + $0x210] ss:$24 sps:$4 sm:$0xff]  }
 0x2af   : > { %4419 = vmatpush1.bf16.msra.mxu0 %v7198_v45  ;;  %v7245_v45 = vld [vmem:[#allocation2 + $0x21c] ss:$24 sps:$4 sm:$0xff]  }
 0x2b0   : > { %4420 = vmatprep.subr.bf16.mxu0 %v7212_v63  ;;  %4580 = vmatpush1.bf16.msra.mxu1 %v7213_v51  ;;  %v1935_v63 = vld [vmem:[#allocation2 + $0x248] sm:$0xff]  ;;  %v9793_v51 = vcombine.low %v1934_v30, %v1934_v30 }
 0x2b1   : > { %4161 = vmatmul.mubr.bf16.gmra.mrb[20].mxu1 %v9720_v41  ;;  %4581 = vmatprep.subr.bf16.mxu1 %v7227_v2  ;;  %v7273_v2 = vld [vmem:[#allocation2 + $0x14] ss:$24 sps:$4 sm:$0xff]  }
 0x2b2   : > { %4322 = vmatmul.mubr.bf16.gmra.mrb[20].mxu0 %v7170_v44  ;;  %4170 = vmatprep.mubr.bf16.mxu1 %v9724_v13  ;;  %v7248_v44 = vld [vmem:[#allocation2 + $0x218] ss:$24 sps:$4 sm:$0xff]  }
 0x2b3   : > { %4331 = vmatprep.mubr.bf16.mxu0 %v7179_v4  ;;  %4421 = vmatpush1.bf16.msra.mxu0 %v7210_v25  ;;  %v9786_v4 = vcombine.high %v1934_v30, %v1934_v30  ;;  %v9788_v25 = vcombine.high %v1935_v63, %v1935_v63  ;;  %v7345_v30 = vld [vmem:[%s8070_s27 + $0x45c] ss:$24 sps:$4 sm:$0xff]  }
 0x2b4   : > { %4422 = vmatprep.subr.bf16.mxu0 %v7224_v58  ;;  %4582 = vmatpush1.bf16.msra.mxu1 %v7225_v17  ;;  %v9795_v58 = vcombine.low %v1935_v63, %v1935_v63  ;;  %v7274_v17 = vld [vmem:[%s8070_s27 + $0x10] ss:$24 sps:$4 sm:$0xff]  }
 0x2b5   : > { %4583 = vmatprep.subr.bf16.mxu1 %v7239_v3  ;;  %11474 = vst [vmem:[#allocation136_spill] sm:$0xff] %v9788_v25  ;;  %v7281_v3 = vld [vmem:[%s8070_s27 + $0x44] ss:$24 sps:$4 sm:$0xff]   ;;  %v7337_v63 = vld [vmem:[%s8070_s27 + $0x190] ss:$24 sps:$4 sm:$0xff]  }
 0x2b6   : > { %11475 = vst [vmem:[#allocation137_spill] sm:$0xff] %v9795_v58 }
 0x2b7   : > { %4423 = vmatpush1.bf16.msra.mxu0 %v7222_v34  ;;  %v7271_v34 = vld [vmem:[#allocation2 + $0x10] ss:$24 sps:$4 sm:$0xff]  }
 0x2b8   : > { %4424 = vmatprep.subr.bf16.mxu0 %v7230_v10  ;;  %4584 = vmatpush1.bf16.msra.mxu1 %v7237_v15  ;;  %v7277_v10 = vld [vmem:[#allocation2 + $0x44] ss:$24 sps:$4 sm:$0xff]   ;;  %v7292_v15 = vld [vmem:[%s8070_s27 + $0x338] ss:$24 sps:$4 sm:$0xff]  }
 0x2b9   : > { %4171 = vmatmul.mubr.bf16.gmra.mrb[24].mxu1 %v9733_v7  ;;  %4585 = vmatprep.subr.bf16.mxu1 %v7251_v5  ;;  %v7289_v5 = vld [vmem:[#allocation2 + $0x74] ss:$24 sps:$4 sm:$0xff]  }
 0x2ba   : > { %4332 = vmatmul.mubr.bf16.gmra.mrb[24].mxu0 %v7182_v22  ;;  %4180 = vmatprep.mubr.bf16.mxu1 %v9738_v47  ;;  %v7283_v22 = vld [vmem:[%s8070_s27 + $0x308] ss:$24 sps:$4 sm:$0xff]  }
 0x2bb   : > { %4341 = vmatprep.mubr.bf16.mxu0 %v7191_v48  ;;  %4425 = vmatpush1.bf16.msra.mxu0 %v7228_v61  ;;  %v7294_v48 = vld [vmem:[%s8070_s27 + $0x33c] ss:$24 sps:$4 sm:$0xff]   ;;  %v7279_v61 = vld [vmem:[%s8070_s27 + $0x40] ss:$24 sps:$4 sm:$0xff]  }
 0x2bc   : > { %4426 = vmatprep.subr.bf16.mxu0 %v7242_v28  ;;  %4586 = vmatpush1.bf16.msra.mxu1 %v7249_v37  ;;  %v7282_v28 = vld [vmem:[#allocation2 + $0x40] ss:$24 sps:$4 sm:$0xff]  }
 0x2bd   : > { %4587 = vmatprep.subr.bf16.mxu1 %v7257_v60  ;;  %v7295_v37 = vld [vmem:[%s8070_s27 + $0xa0] ss:$24 sps:$4 sm:$0xff]   ;;  %v7306_v60 = vld [vmem:[%s8070_s27 + $0xd4] ss:$24 sps:$4 sm:$0xff]  }
 0x2bf   : > { %4427 = vmatpush1.bf16.msra.mxu0 %v7240_v27  ;;  %v7297_v27 = vld [vmem:[%s8070_s27 + $0xa4] ss:$24 sps:$4 sm:$0xff]  }
 0x2c0   : > { %4428 = vmatprep.subr.bf16.mxu0 %v7254_v52  ;;  %4588 = vmatpush1.bf16.msra.mxu1 %v7255_v19  ;;  %v7309_v52 = vld [vmem:[%s8070_s27 + $0x39c] ss:$24 sps:$4 sm:$0xff]   ;;  %v7307_v19 = vld [vmem:[%s8070_s27 + $0x398] ss:$24 sps:$4 sm:$0xff]  }
 0x2c1   : > { %4181 = vmatmul.mubr.bf16.gmra.mrb[28].mxu1 %v9747_v38  ;;  %4589 = vmatprep.subr.bf16.mxu1 %v7264_v9  ;;  %v7315_v9 = vld [vmem:[%s8070_s27 + $0x104] ss:$24 sps:$4 sm:$0xff]  }
 0x2c2   : > { %4342 = vmatmul.mubr.bf16.gmra.mrb[28].mxu0 %v7194_v56  ;;  %4190 = vmatprep.mubr.bf16.mxu1 %v9752_v32  ;;  %v7302_v56 = vld [vmem:[%s8070_s27 + $0x36c] ss:$24 sps:$4 sm:$0xff]  }
 0x2c3   : > { %4351 = vmatprep.mubr.bf16.mxu0 %v7206_v23  ;;  %4429 = vmatpush1.bf16.msra.mxu0 %v7252_v57  ;;  %v7291_v23 = vld [vmem:[#allocation2 + $0x70] ss:$24 sps:$4 sm:$0xff]   ;;  %v7298_v57 = vld [vmem:[#allocation2 + $0xa4] ss:$24 sps:$4 sm:$0xff]  }
 0x2c4   : > { %4430 = vmatprep.subr.bf16.mxu0 %v7267_v24  ;;  %4590 = vmatpush1.bf16.msra.mxu1 %v7262_v14  ;;  %v7318_v24 = vld [vmem:[%s8070_s27 + $0x3cc] ss:$24 sps:$4 sm:$0xff]   ;;  %v7316_v14 = vld [vmem:[%s8070_s27 + $0x3c8] ss:$24 sps:$4 sm:$0xff]  }
 0x2c5   : > { %4591 = vmatprep.subr.bf16.mxu1 %v7270_v18  ;;  %v7327_v18 = vld [vmem:[%s8070_s27 + $0x3fc] ss:$24 sps:$4 sm:$0xff]  }
 0x2c7   : > { %4431 = vmatpush1.bf16.msra.mxu0 %v7265_v31  ;;  %v7323_v31 = vld [vmem:[%s8070_s27 + $0x134] ss:$24 sps:$4 sm:$0xff]  }
 0x2c8   : > { %5044 = vmatprep.subr.bf16.mxu0 %v7276_v55  ;;  %4592 = vmatpush1.bf16.msra.mxu1 %v7268_v42  ;;  %v7303_v55 = vld [vmem:[#allocation2 + $0xa0] ss:$24 sps:$4 sm:$0xff]   ;;  %v7336_v42 = vld [vmem:[%s8070_s27 + $0x42c] ss:$24 sps:$4 sm:$0xff]  }
 0x2c9   : > { %4191 = vmatmul.mubr.bf16.gmra.mrb[32].mxu1 %v9761_v33  ;;  %4722 = vmatprep.subr.bf16.mxu1 %v7285_v26  ;;  %v7328_v26 = vld [vmem:[%s8070_s27 + $0x160] ss:$24 sps:$4 sm:$0xff]  }
 0x2ca   : > { %4352 = vmatmul.mubr.bf16.gmra.mrb[32].mxu0 %v7209_v39  ;;  %4200 = vmatprep.mubr.bf16.mxu1 %v9766_v29  ;;  %v7310_v39 = vld [vmem:[#allocation2 + $0xd4] ss:$24 sps:$4 sm:$0xff]  }
 0x2cb   : > { %4361 = vmatprep.mubr.bf16.mxu0 %v7218_v40  ;;  %v7321_v40 = vld [vmem:[%s8070_s27 + $0x130] ss:$24 sps:$4 sm:$0xff]  }
 0x2d1   : > { %4201 = vmatmul.mubr.bf16.gmra.mrb[36].mxu1 %v9772_v43 }
 0x2d2   : > { %4362 = vmatmul.mubr.bf16.gmra.mrb[36].mxu0 %v7221_v54  ;;  %4210 = vmatprep.mubr.bf16.mxu1 %v9774_v12  ;;  %v7312_v54 = vld [vmem:[#allocation2 + $0xd0] ss:$24 sps:$4 sm:$0xff]  }
 0x2d3   : > { %4371 = vmatprep.mubr.bf16.mxu0 %v7233_v53  ;;  %v7334_v53 = vld [vmem:[%s8070_s27 + $0x428] ss:$24 sps:$4 sm:$0xff]  }
 0x2d9   : > { %4211 = vmatmul.mubr.bf16.gmra.mrb[40].mxu1 %v9778_v11 }
 0x2da   : > { %4372 = vmatmul.mubr.bf16.gmra.mrb[40].mxu0 %v7236_v16  ;;  %4220 = vmatprep.mubr.bf16.mxu1 %v9780_v49  ;;  %v7319_v16 = vld [vmem:[#allocation2 + $0x104] ss:$24 sps:$4 sm:$0xff]  }
 0x2db   : > { %4381 = vmatprep.mubr.bf16.mxu0 %v7245_v45  ;;  %v7339_v45 = vld [vmem:[%s8070_s27 + $0x194] ss:$24 sps:$4 sm:$0xff]  }
 0x2e1   : > { %4221 = vmatmul.mubr.bf16.gmra.mrb[44].mxu1 %v9784_v50 }
 0x2e2   : > { %4382 = vmatmul.mubr.bf16.gmra.mrb[44].mxu0 %v7248_v44  ;;  %4230 = vmatprep.mubr.bf16.mxu1 %v9786_v4  ;;  %v7348_v44 = vld [vmem:[%s8070_s27 + $0x1c4] ss:$24 sps:$4 sm:$0xff]  }
 0x2e3   : > { %4391 = vmatprep.mubr.bf16.mxu0 %v9788_v25 }
 0x2e9   : > { %4231 = vmatmul.mubr.bf16.gmra.mrb[48].mxu1 %v9793_v51 }
 0x2ea   : > { %4392 = vmatmul.mubr.bf16.gmra.mrb[48].mxu0 %v9795_v58  ;;  %4593 = vmatprep.mubr.bf16.mxu1 %v9633_v35  ;;  %v7288_v35 = vld [vmem:[%s8070_s27 + $0x74] ss:$24 sps:$4 sm:$0xff]  }
 0x2eb   : > { %4432 = vmatprep.mubr.bf16.mxu0 %v7273_v2  ;;  %v7351_v2 = vld [vmem:[%s8070_s27 + $0x48c] ss:$24 sps:$4 sm:$0xff]  }
 0x2f1   : > { %4594 = vmatmul.mubr.bf16.vlgmr.msra.gmra.mrb[52].mxu1 %v9654_v1  ;;  %v7286_v1 = vld [vmem:[%s8070_s27 + $0x70] ss:$24 sps:$4 sm:$0xff]  }
 0x2f2   : > { %4433 = vmatmul.mubr.bf16.vlgmr.msra.gmra.mrb[0].mxu0 %v7271_v34  ;;  %4603 = vmatprep.mubr.bf16.mxu1 %v9657_v36  ;;  %v7300_v36 = vld [vmem:[%s8070_s27 + $0x368] ss:$24 sps:$4 sm:$0xff]  }
 0x2f3   : > { %5045 = vmatpush1.bf16.msra.mxu0 %v7274_v17  ;;  %4442 = vmatprep.mubr.bf16.mxu0 %v7277_v10  ;;  %v7349_v34 = vld [vmem:[%s8070_s27 + $0x488] ss:$24 sps:$4 sm:$0xff]   ;;  %v7357_v17 = vld [vmem:[%s8070_s27 + $0x1f4] ss:$24 sps:$4 sm:$0xff]  }
 0x2f4   : > { %5046 = vmatprep.subr.bf16.mxu0 %v7281_v3  ;;  %4723 = vmatpush1.bf16.msra.mxu1 %v7283_v22  ;;  %v7360_v10 = vld [vmem:[%s8070_s27 + $0x4bc] ss:$24 sps:$4 sm:$0xff]   ;;  %v7324_v3 = vld [vmem:[#allocation2 + $0x100] ss:$24 sps:$4 sm:$0xff]   ;;  %v7331_v22 = vld [vmem:[#allocation2 + $0x134] ss:$24 sps:$4 sm:$0xff]  }
 0x2f5   : > { %4724 = vmatprep.subr.bf16.mxu1 %v7294_v48  ;;  %v7355_v48 = vld [vmem:[%s8070_s27 + $0x1f0] ss:$24 sps:$4 sm:$0xff]  }
 0x2f7   : > { %5047 = vmatpush1.bf16.msra.mxu0 %v7279_v61  ;;  %v7366_v61 = vld [vmem:[%s8070_s27 + $0x224] ss:$24 sps:$4 sm:$0xff]  }
 0x2f8   : > { %5048 = vmatprep.subr.bf16.mxu0 %v7288_v35  ;;  %4725 = vmatpush1.bf16.msra.mxu1 %v7292_v15  ;;  %v7369_v35 = vld [vmem:[%s8070_s27 + $0x4ec] ss:$24 sps:$4 sm:$0xff]   ;;  %v7367_v15 = vld [vmem:[%s8070_s27 + $0x4e8] ss:$24 sps:$4 sm:$0xff]  }
 0x2f9   : > { %4604 = vmatmul.mubr.bf16.gmra.mrb[56].mxu1 %v9665_v21  ;;  %4726 = vmatprep.subr.bf16.mxu1 %v7302_v56  ;;  %v7304_v21 = vld [vmem:[%s8070_s27 + $0xd0] ss:$24 sps:$4 sm:$0xff]  }
 0x2fa   : > { %4443 = vmatmul.mubr.bf16.gmra.mrb[4].mxu0 %v7282_v28  ;;  %4613 = vmatprep.mubr.bf16.mxu1 %v9670_v0  ;;  %v7313_v0 = vld [vmem:[%s8070_s27 + $0x100] ss:$24 sps:$4 sm:$0xff]   ;;  %v7372_v28 = vld [vmem:[%s8070_s27 + $0x254] ss:$24 sps:$4 sm:$0xff]   ;;  %v7370_v56 = vld [vmem:[%s8070_s27 + $0x250] ss:$24 sps:$4 sm:$0xff]  }
 0x2fb   : > { %5049 = vmatpush1.bf16.msra.mxu0 %v7286_v1  ;;  %4452 = vmatprep.mubr.bf16.mxu0 %v7289_v5  ;;  %v7378_v1 = vld [vmem:[%s8070_s27 + $0x51c] ss:$24 sps:$4 sm:$0xff]   ;;  %v7333_v5 = vld [vmem:[#allocation2 + $0x130] ss:$24 sps:$4 sm:$0xff]  }
 0x2fc   : > { %5050 = vmatprep.subr.bf16.mxu0 %v7297_v27  ;;  %4727 = vmatpush1.bf16.msra.mxu1 %v7300_v36  ;;  %v7340_v27 = vld [vmem:[#allocation2 + $0x164] ss:$24 sps:$4 sm:$0xff]  }
 0x2fd   : > { %4728 = vmatprep.subr.bf16.mxu1 %v7309_v52  ;;  %v7381_v36 = vld [vmem:[%s8070_s27 + $0x284] ss:$24 sps:$4 sm:$0xff]   ;;  %v7385_v52 = vld [vmem:[%s8070_s27 + $0x548] ss:$24 sps:$4 sm:$0xff]  }
 0x2ff   : > { %5051 = vmatpush1.bf16.msra.mxu0 %v7295_v37  ;;  %v7387_v37 = vld [vmem:[%s8070_s27 + $0x54c] ss:$24 sps:$4 sm:$0xff]  }
 0x300   : > { %5052 = vmatprep.subr.bf16.mxu0 %v7306_v60  ;;  %4729 = vmatpush1.bf16.msra.mxu1 %v7307_v19  ;;  %v7390_v60 = vld [vmem:[%s8070_s27 + $0x2b4] ss:$24 sps:$4 sm:$0xff]   ;;  %v7391_v19 = vld [vmem:[%s8070_s27 + $0x578] ss:$24 sps:$4 sm:$0xff]  }
 0x301   : > { %4614 = vmatmul.mubr.bf16.gmra.mrb[60].mxu1 %v9680_v20  ;;  %4730 = vmatprep.subr.bf16.mxu1 %v7318_v24  ;;  %v7325_v20 = vld [vmem:[%s8070_s27 + $0x3f8] ss:$24 sps:$4 sm:$0xff]   ;;  %v7396_v24 = vld [vmem:[%s8070_s27 + $0x5a8] ss:$24 sps:$4 sm:$0xff]  }
 0x302   : > { %4453 = vmatmul.mubr.bf16.gmra.mrb[8].mxu0 %v7291_v23  ;;  %4623 = vmatprep.mubr.bf16.mxu1 %v9682_v8  ;;  %v7330_v8 = vld [vmem:[%s8070_s27 + $0x164] ss:$24 sps:$4 sm:$0xff]  }
 0x303   : > { %4462 = vmatprep.mubr.bf16.mxu0 %v7298_v57  ;;  %5053 = vmatpush1.bf16.msra.mxu0 %v7304_v21  ;;  %v7393_v23 = vld [vmem:[%s8070_s27 + $0x57c] ss:$24 sps:$4 sm:$0xff]   ;;  %v7342_v57 = vld [vmem:[#allocation2 + $0x160] ss:$24 sps:$4 sm:$0xff]   ;;  %v7352_v21 = vld [vmem:[#allocation2 + $0x194] ss:$24 sps:$4 sm:$0xff]  }
 0x304   : > { %5054 = vmatprep.subr.bf16.mxu0 %v7315_v9  ;;  %4731 = vmatpush1.bf16.msra.mxu1 %v7316_v14  ;;  %v7401_v9 = vld [vmem:[%s8070_s27 + $0x2e4] ss:$24 sps:$4 sm:$0xff]  }
 0x305   : > { %4732 = vmatprep.subr.bf16.mxu1 %v7327_v18  ;;  %v7404_v14 = vld [vmem:[%s8070_s27 + $0x5dc] ss:$24 sps:$4 sm:$0xff]   ;;  %v7354_v18 = vld [vmem:[#allocation2 + $0x190] ss:$24 sps:$4 sm:$0xff]  }
 0x307   : > { %5055 = vmatpush1.bf16.msra.mxu0 %v7313_v0  ;;  %v7399_v0 = vld [vmem:[%s8070_s27 + $0x2e0] ss:$24 sps:$4 sm:$0xff]  }
 0x308   : > { %5056 = vmatprep.subr.bf16.mxu0 %v7323_v31  ;;  %4733 = vmatpush1.bf16.msra.mxu1 %v7325_v20  ;;  %v7407_v31 = vld [vmem:[%s8070_s27 + $0x314] ss:$24 sps:$4 sm:$0xff]   ;;  %v7375_v20 = vld [vmem:[#allocation2 + $0x1f0] ss:$24 sps:$4 sm:$0xff]  }
 0x309   : > { %4624 = vmatmul.mubr.bf16.gmra.mrb[64].mxu1 %v9691_v46  ;;  %4734 = vmatprep.subr.bf16.mxu1 %v7336_v42  ;;  %v7343_v46 = vld [vmem:[%s8070_s27 + $0x458] ss:$24 sps:$4 sm:$0xff]  }
 0x30a   : > { %4463 = vmatmul.mubr.bf16.gmra.mrb[12].mxu0 %v7303_v55  ;;  %4633 = vmatprep.mubr.bf16.mxu1 %v9694_v62  ;;  %v7346_v62 = vld [vmem:[%s8070_s27 + $0x1c0] ss:$24 sps:$4 sm:$0xff]   ;;  %v7361_v55 = vld [vmem:[#allocation2 + $0x1c4] ss:$24 sps:$4 sm:$0xff]  }
 0x30b   : > { %4472 = vmatprep.mubr.bf16.mxu0 %v7310_v39  ;;  %5057 = vmatpush1.bf16.msra.mxu0 %v7321_v40  ;;  %v7402_v39 = vld [vmem:[%s8070_s27 + $0x5d8] ss:$24 sps:$4 sm:$0xff]   ;;  %v7373_v40 = vld [vmem:[#allocation2 + $0x1f4] ss:$24 sps:$4 sm:$0xff]  }
 0x30c   : > { %5058 = vmatprep.subr.bf16.mxu0 %v7330_v8  ;;  %4735 = vmatpush1.bf16.msra.mxu1 %v7334_v53  ;;  %v7382_v8 = vld [vmem:[#allocation2 + $0x224] ss:$24 sps:$4 sm:$0xff]   ;;  %v7552_v53 = vld [vmem:[#allocation2] ss:$24 sps:$4 sm:$0xff]  }
 0x30d   : > { %4736 = vmatprep.subr.bf16.mxu1 %v7345_v30  ;;  %v7408_v30 = vld [vmem:[%s8070_s27 + $0x340] ss:$24 sps:$4 sm:$0xff]  }
 0x30f   : > { %5059 = vmatpush1.bf16.msra.mxu0 %v7328_v26  ;;  %v7411_v26 = vld [vmem:[%s8070_s27 + $0x608] ss:$24 sps:$4 sm:$0xff]  }
 0x310   : > { %5060 = vmatprep.subr.bf16.mxu0 %v7339_v45  ;;  %4737 = vmatpush1.bf16.msra.mxu1 %v7343_v46  ;;  %v9905_v45 = vld [vmem:[#allocation2 + $0x3c] ss:$24 sps:$4 sm:$0xff]  }
 0x311   : > { %4634 = vmatmul.mubr.bf16.gmra.mrb[68].mxu1 %v9705_v6  ;;  %4738 = vmatprep.subr.bf16.mxu1 %v7351_v2  ;;  %v7358_v6 = vld [vmem:[%s8070_s27 + $0x4b8] ss:$24 sps:$4 sm:$0xff]   ;;  %v7416_v46 = vld [vmem:[%s8070_s27 + $0x374] ss:$24 sps:$4 sm:$0xff]  }
 0x312   : > { %4473 = vmatmul.mubr.bf16.gmra.mrb[16].mxu0 %v7312_v54  ;;  %4643 = vmatprep.mubr.bf16.mxu1 %v9710_v59  ;;  %v7364_v59 = vld [vmem:[%s8070_s27 + $0x220] ss:$24 sps:$4 sm:$0xff]  }
 0x313   : > { %4482 = vmatprep.mubr.bf16.mxu0 %v7319_v16  ;;  %5061 = vmatpush1.bf16.msra.mxu0 %v7337_v63  ;;  %v9901_v54 = vld [vmem:[#allocation2 + $0x8] ss:$24 sps:$4 sm:$0xff]   ;;  %v7419_v16 = vld [vmem:[%s8070_s27 + $0x63c] ss:$24 sps:$4 sm:$0xff]   ;;  %v7554_v63 = vld [vmem:[#allocation2 + $0x34] ss:$24 sps:$4 sm:$0xff]  }
 0x314   : > { %5062 = vmatprep.subr.bf16.mxu0 %v7348_v44  ;;  %4739 = vmatpush1.bf16.msra.mxu1 %v7349_v34  ;;  %v7417_v2 = vld [vmem:[%s8070_s27 + $0x638] ss:$24 sps:$4 sm:$0xff]  }
 0x315   : > { %4740 = vmatprep.subr.bf16.mxu1 %v7360_v10 }
 0x317   : > { %5063 = vmatpush1.bf16.msra.mxu0 %v7346_v62 }
 0x318   : > { %5064 = vmatprep.subr.bf16.mxu0 %v7357_v17  ;;  %4741 = vmatpush1.bf16.msra.mxu1 %v7358_v6  ;;  %v7414_v17 = vld [vmem:[%s8070_s27 + $0x370] ss:$24 sps:$4 sm:$0xff]  }
 0x319   : > { %4644 = vmatmul.mubr.bf16.gmra.mrb[72].mxu1 %v9720_v41  ;;  %4742 = vmatprep.subr.bf16.mxu1 %v7369_v35  ;;  %v7376_v41 = vld [vmem:[%s8070_s27 + $0x518] ss:$24 sps:$4 sm:$0xff]   ;;  %v7556_v6 = vld [vmem:[#allocation2 + $0x30] ss:$24 sps:$4 sm:$0xff]   ;;  %v9926_v35 = vld [vmem:[#allocation2 + $0x6c] ss:$24 sps:$4 sm:$0xff]  }
 0x31a   : > { %4483 = vmatmul.mubr.bf16.gmra.mrb[20].mxu0 %v7324_v3  ;;  %4653 = vmatprep.mubr.bf16.mxu1 %v9724_v13  ;;  %v7379_v13 = vld [vmem:[%s8070_s27 + $0x280] ss:$24 sps:$4 sm:$0xff]   ;;  %v7422_v3 = vld [vmem:[%s8070_s27 + $0x3a4] ss:$24 sps:$4 sm:$0xff]  }
 0x31b   : > { %4492 = vmatprep.mubr.bf16.mxu0 %v7331_v22  ;;  %5065 = vmatpush1.bf16.msra.mxu0 %v7355_v48  ;;  %v7425_v22 = vld [vmem:[%s8070_s27 + $0x66c] ss:$24 sps:$4 sm:$0xff]   ;;  %v9922_v48 = vld [vmem:[#allocation2 + $0x38] ss:$24 sps:$4 sm:$0xff]  }
 0x31c   : > { %5066 = vmatprep.subr.bf16.mxu0 %v7366_v61  ;;  %4743 = vmatpush1.bf16.msra.mxu1 %v7367_v15  ;;  %v7423_v61 = vld [vmem:[%s8070_s27 + $0x668] ss:$24 sps:$4 sm:$0xff]   ;;  %v7431_v15 = vld [vmem:[%s8070_s27 + $0x69c] ss:$24 sps:$4 sm:$0xff]  }
 0x31d   : > { %4744 = vmatprep.subr.bf16.mxu1 %v7378_v1  ;;  %v7428_v1 = vld [vmem:[%s8070_s27 + $0x3d4] ss:$24 sps:$4 sm:$0xff]  }
 0x31f   : > { %5067 = vmatpush1.bf16.msra.mxu0 %v7364_v59  ;;  %v7420_v59 = vld [vmem:[%s8070_s27 + $0x3a0] ss:$24 sps:$4 sm:$0xff]  }
 0x320   : > { %5068 = vmatprep.subr.bf16.mxu0 %v7372_v28  ;;  %4745 = vmatpush1.bf16.msra.mxu1 %v7376_v41  ;;  %v7558_v28 = vld [vmem:[#allocation2 + $0x64] ss:$24 sps:$4 sm:$0xff]  }
 0x321   : > { %4654 = vmatmul.mubr.bf16.gmra.mrb[76].mxu1 %v9733_v7  ;;  %4746 = vmatprep.subr.bf16.mxu1 %v7387_v37  ;;  %v7388_v7 = vld [vmem:[%s8070_s27 + $0x2b0] ss:$24 sps:$4 sm:$0xff]  }
 0x322   : > { %4493 = vmatmul.mubr.bf16.gmra.mrb[24].mxu0 %v7333_v5  ;;  %4663 = vmatprep.mubr.bf16.mxu1 %v9738_v47  ;;  %v7398_v47 = vld [vmem:[%s8070_s27 + $0x5ac] ss:$24 sps:$4 sm:$0xff]   ;;  %v7429_v37 = vld [vmem:[%s8070_s27 + $0x698] ss:$24 sps:$4 sm:$0xff]  }
 0x323   : > { %4502 = vmatprep.mubr.bf16.mxu0 %v7340_v27  ;;  %5069 = vmatpush1.bf16.msra.mxu0 %v7370_v56 }
 0x324   : > { %5070 = vmatprep.subr.bf16.mxu0 %v7381_v36  ;;  %4747 = vmatpush1.bf16.msra.mxu1 %v7385_v52  ;;  %v7426_v36 = vld [vmem:[%s8070_s27 + $0x3d0] ss:$24 sps:$4 sm:$0xff]   ;;  %v7437_v52 = vld [vmem:[%s8070_s27 + $0x6cc] ss:$24 sps:$4 sm:$0xff]  }
 0x325   : > { %4748 = vmatprep.subr.bf16.mxu1 %v7393_v23  ;;  %v7560_v23 = vld [vmem:[#allocation2 + $0x60] ss:$24 sps:$4 sm:$0xff]  }
 0x327   : > { %5071 = vmatpush1.bf16.msra.mxu0 %v7379_v13  ;;  %v7434_v13 = vld [vmem:[%s8070_s27 + $0x404] ss:$24 sps:$4 sm:$0xff]  }
 0x328   : > { %5072 = vmatprep.subr.bf16.mxu0 %v7390_v60  ;;  %4749 = vmatpush1.bf16.msra.mxu1 %v7391_v19  ;;  %v9944_v60 = vld [vmem:[#allocation2 + $0x68] ss:$24 sps:$4 sm:$0xff]  }
 0x329   : > { %4664 = vmatmul.mubr.bf16.gmra.mrb[80].mxu1 %v9747_v38  ;;  %4750 = vmatprep.subr.bf16.mxu1 %v7398_v47  ;;  %v7413_v38 = vld [vmem:[%s8070_s27 + $0x60c] ss:$24 sps:$4 sm:$0xff]   ;;  %v7435_v19 = vld [vmem:[%s8070_s27 + $0x6c8] ss:$24 sps:$4 sm:$0xff]  }
 0x32a   : > { %4503 = vmatmul.mubr.bf16.gmra.mrb[28].mxu0 %v7342_v57  ;;  %4673 = vmatprep.mubr.bf16.mxu1 %v9752_v32  ;;  %v7363_v32 = vld [vmem:[#allocation2 + $0x1c0] ss:$24 sps:$4 sm:$0xff]   ;;  %v9947_v57 = vld [vmem:[#allocation2 + $0x9c] ss:$24 sps:$4 sm:$0xff]  }
 0x32b   : > { %4512 = vmatprep.mubr.bf16.mxu0 %v7352_v21  ;;  %5073 = vmatpush1.bf16.msra.mxu0 %v7388_v7  ;;  %v7562_v21 = vld [vmem:[#allocation2 + $0x94] ss:$24 sps:$4 sm:$0xff]   ;;  %v7432_v7 = vld [vmem:[%s8070_s27 + $0x400] ss:$24 sps:$4 sm:$0xff]  }
 0x32c   : > { %5074 = vmatprep.subr.bf16.mxu0 %v7401_v9  ;;  %4751 = vmatpush1.bf16.msra.mxu1 %v7396_v24  ;;  %v7440_v9 = vld [vmem:[%s8070_s27 + $0x434] ss:$24 sps:$4 sm:$0xff]  }
 0x32d   : > { %4752 = vmatprep.subr.bf16.mxu1 %v7404_v14  ;;  %v7443_v24 = vld [vmem:[%s8070_s27 + $0x6fc] ss:$24 sps:$4 sm:$0xff]  }
 0x32f   : > { %5075 = vmatpush1.bf16.msra.mxu0 %v7399_v0 }
 0x330   : > { %5205 = vmatprep.subr.bf16.mxu0 %v7407_v31  ;;  %4753 = vmatpush1.bf16.msra.mxu1 %v7402_v39  ;;  %v7446_v39 = vld [vmem:[%s8070_s27 + $0x464] ss:$24 sps:$4 sm:$0xff]  }
 0x331   : > { %4674 = vmatmul.mubr.bf16.gmra.mrb[84].mxu1 %v9761_v33  ;;  %4883 = vmatprep.subr.bf16.mxu1 %v7413_v38  ;;  %v1936_v33 = vld [vmem:[#allocation2 + $0x250] sm:$0xff] }
 0x332   : > { %4513 = vmatmul.mubr.bf16.gmra.mrb[32].mxu0 %v7354_v18  ;;  %4683 = vmatprep.mubr.bf16.mxu1 %v9766_v29  ;;  %v7384_v29 = vld [vmem:[#allocation2 + $0x220] ss:$24 sps:$4 sm:$0xff]   ;;  %v9886_v42 = vcombine.high %v1936_v33, %v1936_v33  ;;  %v7449_v38 = vld [vmem:[%s8070_s27 + $0x72c] ss:$24 sps:$4 sm:$0xff]  }
 0x333   : > { %4522 = vmatprep.mubr.bf16.mxu0 %v7361_v55  ;;  %v7438_v18 = vld [vmem:[%s8070_s27 + $0x430] ss:$24 sps:$4 sm:$0xff]  }
 0x334   : > { %11476 = vst [vmem:[#allocation138_spill] sm:$0xff] %v9886_v42  ;;  %v7441_v55 = vld [vmem:[%s8070_s27 + $0x6f8] ss:$24 sps:$4 sm:$0xff]  }
 0x339   : > { %4684 = vmatmul.mubr.bf16.gmra.mrb[88].mxu1 %v9772_v43  ;;  %v9891_v43 = vcombine.low %v1936_v33, %v1936_v33  ;;  %v7444_v33 = vld [vmem:[%s8070_s27 + $0x460] ss:$24 sps:$4 sm:$0xff]  }
 0x33a   : > { %4523 = vmatmul.mubr.bf16.gmra.mrb[36].mxu0 %v7363_v32  ;;  %4693 = vmatprep.mubr.bf16.mxu1 %v9774_v12  ;;  %v9895_v12 = vld [vmem:[#allocation2 + $0xc] ss:$24 sps:$4 sm:$0xff]   ;;  %v9966_v32 = vld [vmem:[#allocation2 + $0x98] ss:$24 sps:$4 sm:$0xff]  }
 0x33b   : > { %4532 = vmatprep.mubr.bf16.mxu0 %v7373_v40  ;;  %11477 = vst [vmem:[#allocation139_spill] sm:$0xff] %v9891_v43  ;;  %v7564_v40 = vld [vmem:[#allocation2 + $0x90] ss:$24 sps:$4 sm:$0xff]  }
 0x341   : > { %4694 = vmatmul.mubr.bf16.gmra.mrb[92].mxu1 %v9778_v11  ;;  %v7550_v11 = vld [vmem:[#allocation2 + $0x4] ss:$24 sps:$4 sm:$0xff]  }
 0x342   : > { %4533 = vmatmul.mubr.bf16.gmra.mrb[40].mxu0 %v7375_v20  ;;  %4703 = vmatprep.mubr.bf16.mxu1 %v9780_v49  ;;  %v7405_v49 = vld [vmem:[%s8070_s27 + $0x310] ss:$24 sps:$4 sm:$0xff]   ;;  %v9969_v20 = vld [vmem:[#allocation2 + $0xcc] ss:$24 sps:$4 sm:$0xff]  }
 0x343   : > { %4542 = vmatprep.mubr.bf16.mxu0 %v7382_v8  ;;  %v7566_v8 = vld [vmem:[#allocation2 + $0xc4] ss:$24 sps:$4 sm:$0xff]  }
 0x349   : > { %4704 = vmatmul.mubr.bf16.gmra.mrb[96].mxu1 %v9784_v50  ;;  %v7410_v50 = vld [vmem:[%s8070_s27 + $0x344] ss:$24 sps:$4 sm:$0xff]  }
 0x34a   : > { %4543 = vmatmul.mubr.bf16.gmra.mrb[44].mxu0 %v7384_v29  ;;  %4713 = vmatprep.mubr.bf16.mxu1 %v9786_v4  ;;  %v7447_v29 = vld [vmem:[%s8070_s27 + $0x728] ss:$24 sps:$4 sm:$0xff]  }
 0x34b   : > { %4552 = vmatprep.mubr.bf16.mxu0 %v9886_v42  ;;  %v10087_v42 = vld [vmem:[#allocation2 + $0x1b8] ss:$24 sps:$4 sm:$0xff]  }
 0x34c   : > { %11482 = vst [vmem:[#allocation144_spill] sm:$0xff] %v10087_v42 }
 0x351   : > { %4714 = vmatmul.mubr.bf16.gmra.mrb[100].mxu1 %v9793_v51 }
 0x352   : > { %4553 = vmatmul.mubr.bf16.gmra.mrb[48].mxu0 %v9891_v43  ;;  %4754 = vmatprep.mubr.bf16.mxu1 %v9895_v12  ;;  %v7498_v43 = vld [vmem:[%s8070_s27 + $0x8d8] ss:$24 sps:$4 sm:$0xff]  }
 0x353   : > { %5076 = vmatprep.mubr.bf16.mxu0 %v7550_v11 }
 0x359   : > { %4755 = vmatmul.mubr.bf16.vlgmr.msra.gmra.mrb[52].mxu1 %v9901_v54 }
 0x35a   : > { %5077 = vmatmul.mubr.bf16.vlgmr.msra.gmra.mrb[52].mxu0 %v7552_v53  ;;  %4764 = vmatprep.mubr.bf16.mxu1 %v9905_v45 }
 0x35b   : > { %5206 = vmatpush1.bf16.msra.mxu0 %v7405_v49  ;;  %5086 = vmatprep.mubr.bf16.mxu0 %v7554_v63  ;;  %v7452_v49 = vld [vmem:[%s8070_s27 + $0x494] ss:$24 sps:$4 sm:$0xff]   ;;  %v7453_v63 = vld [vmem:[%s8070_s27 + $0x758] ss:$24 sps:$4 sm:$0xff]  }
 0x35c   : > { %5207 = vmatprep.subr.bf16.mxu0 %v7410_v50  ;;  %v9910_v44 = vpop.f32.mrb[0].mxu1  ;;  %4884 = vmatpush1.bf16.msra.mxu1 %v7411_v26  ;;  %v7455_v50 = vld [vmem:[%s8070_s27 + $0x75c] ss:$24 sps:$4 sm:$0xff]  }
 0x35d   : > { %v9913_v62 = vpop.f32.mrb[1].mxu1  ;;  %4885 = vmatprep.subr.bf16.mxu1 %v7419_v16 }
 0x35e   : > { %v9915_v34 = vpop.f32.mrb[2].mxu1 }
 0x35f   : > { %5208 = vmatpush1.bf16.msra.mxu0 %v7408_v30  ;;  %v9918_v10 = vpop.f32.mrb[3].mxu1  ;;  %v7450_v30 = vld [vmem:[%s8070_s27 + $0x490] ss:$24 sps:$4 sm:$0xff]  }
 0x360   : > { %5209 = vmatprep.subr.bf16.mxu0 %v7416_v46  ;;  %4886 = vmatpush1.bf16.msra.mxu1 %v7417_v2  ;;  %v7458_v46 = vld [vmem:[%s8070_s27 + $0x4c4] ss:$24 sps:$4 sm:$0xff]  }
 0x361   : > { %4765 = vmatmul.mubr.bf16.gmra.mrb[56].mxu1 %v9922_v48  ;;  %4887 = vmatprep.subr.bf16.mxu1 %v7425_v22  ;;  %v7461_v2 = vld [vmem:[%s8070_s27 + $0x78c] ss:$24 sps:$4 sm:$0xff]  }
 0x362   : > { %5087 = vmatmul.mubr.bf16.gmra.mrb[56].mxu0 %v7556_v6  ;;  %4774 = vmatprep.mubr.bf16.mxu1 %v9926_v35  ;;  %v9991_v22 = vld [vmem:[#allocation2 + $0xfc] ss:$24 sps:$4 sm:$0xff]  }
 0x363   : > { %5210 = vmatpush1.bf16.msra.mxu0 %v7414_v17  ;;  %5096 = vmatprep.mubr.bf16.mxu0 %v7558_v28  ;;  %v9988_v17 = vld [vmem:[#allocation2 + $0xc8] ss:$24 sps:$4 sm:$0xff]   ;;  %v7570_v6 = vld [vmem:[#allocation2 + $0xf4] ss:$24 sps:$4 sm:$0xff]  }
 0x364   : > { %5211 = vmatprep.subr.bf16.mxu0 %v7422_v3  ;;  %v9932_v5 = vpop.f32.mrb[4].mxu1  ;;  %4888 = vmatpush1.bf16.msra.mxu1 %v7423_v61  ;;  %v7568_v3 = vld [vmem:[#allocation2 + $0xc0] ss:$24 sps:$4 sm:$0xff]   ;;  %v7464_v28 = vld [vmem:[%s8070_s27 + $0x4f4] ss:$24 sps:$4 sm:$0xff]  }
 0x365   : > { %v9934_v27 = vpop.f32.mrb[5].mxu1  ;;  %4889 = vmatprep.subr.bf16.mxu1 %v7431_v15  ;;  %v7456_v61 = vld [vmem:[%s8070_s27 + $0x4c0] ss:$24 sps:$4 sm:$0xff]  }
 0x366   : > { %v9936_v56 = vpop.f32.mrb[6].mxu1 }
 0x367   : > { %5212 = vmatpush1.bf16.msra.mxu0 %v7420_v59  ;;  %v9938_v41 = vpop.f32.mrb[7].mxu1  ;;  %v7459_v59 = vld [vmem:[%s8070_s27 + $0x788] ss:$24 sps:$4 sm:$0xff]  }
 0x368   : > { %5213 = vmatprep.subr.bf16.mxu0 %v7428_v1  ;;  %4890 = vmatpush1.bf16.msra.mxu1 %v7429_v37  ;;  %v7467_v1 = vld [vmem:[%s8070_s27 + $0x7bc] ss:$24 sps:$4 sm:$0xff]  }
 0x369   : > { %4775 = vmatmul.mubr.bf16.gmra.mrb[60].mxu1 %v9944_v60  ;;  %4891 = vmatprep.subr.bf16.mxu1 %v7437_v52  ;;  %v7462_v52 = vld [vmem:[%s8070_s27 + $0x4f0] ss:$24 sps:$4 sm:$0xff]  }
 0x36a   : > { %5097 = vmatmul.mubr.bf16.gmra.mrb[60].mxu0 %v7560_v23  ;;  %4784 = vmatprep.mubr.bf16.mxu1 %v9947_v57  ;;  %v7465_v23 = vld [vmem:[%s8070_s27 + $0x7b8] ss:$24 sps:$4 sm:$0xff]  }
 0x36b   : > { %5106 = vmatprep.mubr.bf16.mxu0 %v7562_v21  ;;  %5214 = vmatpush1.bf16.msra.mxu0 %v7426_v36  ;;  %v7470_v21 = vld [vmem:[%s8070_s27 + $0x524] ss:$24 sps:$4 sm:$0xff]  }
 0x36c   : > { %v9952_v47 = vpop.f32.mrb[8].mxu1  ;;  %5215 = vmatprep.subr.bf16.mxu0 %v7434_v13  ;;  %4892 = vmatpush1.bf16.msra.mxu1 %v7435_v19  ;;  %v10010_v19 = vld [vmem:[#allocation2 + $0xf8] ss:$24 sps:$4 sm:$0xff]  }
 0x36d   : > { %v9956_v0 = vpop.f32.mrb[9].mxu1  ;;  %4893 = vmatprep.subr.bf16.mxu1 %v7443_v24  ;;  %v10013_v24 = vld [vmem:[#allocation2 + $0x12c] ss:$24 sps:$4 sm:$0xff]  }
 0x36e   : > { %v9958_v14 = vpop.f32.mrb[10].mxu1 }
 0x36f   : > { %v9960_v31 = vpop.f32.mrb[11].mxu1  ;;  %5216 = vmatpush1.bf16.msra.mxu0 %v7432_v7  ;;  %v7473_v7 = vld [vmem:[%s8070_s27 + $0x7ec] ss:$24 sps:$4 sm:$0xff]  }
 0x370   : > { %5217 = vmatprep.subr.bf16.mxu0 %v7440_v9  ;;  %4894 = vmatpush1.bf16.msra.mxu1 %v7441_v55  ;;  %v7572_v9 = vld [vmem:[#allocation2 + $0xf0] ss:$24 sps:$4 sm:$0xff]  }
 0x371   : > { %4785 = vmatmul.mubr.bf16.gmra.mrb[64].mxu1 %v9966_v32  ;;  %4895 = vmatprep.subr.bf16.mxu1 %v7449_v38  ;;  %v7468_v55 = vld [vmem:[%s8070_s27 + $0x520] ss:$24 sps:$4 sm:$0xff]  }
 0x372   : > { %5107 = vmatmul.mubr.bf16.gmra.mrb[64].mxu0 %v7564_v40  ;;  %4794 = vmatprep.mubr.bf16.mxu1 %v9969_v20  ;;  %v7476_v40 = vld [vmem:[%s8070_s27 + $0x554] ss:$24 sps:$4 sm:$0xff]  }
 0x373   : > { %5116 = vmatprep.mubr.bf16.mxu0 %v7566_v8  ;;  %5218 = vmatpush1.bf16.msra.mxu0 %v7438_v18  ;;  %v7574_v18 = vld [vmem:[#allocation2 + $0x124] ss:$24 sps:$4 sm:$0xff]  }
 0x374   : > { %v9974_v11 = vpop.f32.mrb[12].mxu1  ;;  %5219 = vmatprep.subr.bf16.mxu0 %v7446_v39  ;;  %4896 = vmatpush1.bf16.msra.mxu1 %v7447_v29  ;;  %v7471_v39 = vld [vmem:[%s8070_s27 + $0x7e8] ss:$24 sps:$4 sm:$0xff]   ;;  %v7479_v8 = vld [vmem:[%s8070_s27 + $0x81c] ss:$24 sps:$4 sm:$0xff]  }
 0x375   : > { %v9978_v26 = vpop.f32.mrb[13].mxu1  ;;  %4897 = vmatprep.subr.bf16.mxu1 %v7455_v50  ;;  %v7474_v50 = vld [vmem:[%s8070_s27 + $0x550] ss:$24 sps:$4 sm:$0xff]  }
 0x376   : > { %v9980_v53 = vpop.f32.mrb[14].mxu1 }
 0x377   : > { %v9982_v16 = vpop.f32.mrb[15].mxu1  ;;  %5220 = vmatpush1.bf16.msra.mxu0 %v7444_v33 }
 0x378   : > { %5221 = vmatprep.subr.bf16.mxu0 %v7452_v49  ;;  %4898 = vmatpush1.bf16.msra.mxu1 %v7453_v63  ;;  %v7482_v63 = vld [vmem:[%s8070_s27 + $0x584] ss:$24 sps:$4 sm:$0xff]  }
 0x379   : > { %4795 = vmatmul.mubr.bf16.gmra.mrb[68].mxu1 %v9988_v17  ;;  %4899 = vmatprep.subr.bf16.mxu1 %v7461_v2  ;;  %v10032_v2 = vld [vmem:[#allocation2 + $0x128] ss:$24 sps:$4 sm:$0xff]  }
 0x37a   : > { %5117 = vmatmul.mubr.bf16.gmra.mrb[68].mxu0 %v7568_v3  ;;  %4804 = vmatprep.mubr.bf16.mxu1 %v9991_v22  ;;  %v7576_v3 = vld [vmem:[#allocation2 + $0x120] ss:$24 sps:$4 sm:$0xff]  }
 0x37b   : > { %5126 = vmatprep.mubr.bf16.mxu0 %v7570_v6  ;;  %5222 = vmatpush1.bf16.msra.mxu0 %v7450_v30  ;;  %v7477_v30 = vld [vmem:[%s8070_s27 + $0x818] ss:$24 sps:$4 sm:$0xff]   ;;  %v10035_v6 = vld [vmem:[#allocation2 + $0x15c] ss:$24 sps:$4 sm:$0xff]  }
 0x37c   : > { %v9996_v15 = vpop.f32.mrb[16].mxu1  ;;  %5223 = vmatprep.subr.bf16.mxu0 %v7458_v46  ;;  %4900 = vmatpush1.bf16.msra.mxu1 %v7459_v59  ;;  %v7485_v46 = vld [vmem:[%s8070_s27 + $0x84c] ss:$24 sps:$4 sm:$0xff]   ;;  %v7480_v59 = vld [vmem:[%s8070_s27 + $0x580] ss:$24 sps:$4 sm:$0xff]  }
 0x37d   : > { %v10000_v36 = vpop.f32.mrb[17].mxu1  ;;  %4901 = vmatprep.subr.bf16.mxu1 %v7467_v1 }
 0x37e   : > { %v10002_v37 = vpop.f32.mrb[18].mxu1 }
 0x37f   : > { %v10004_v13 = vpop.f32.mrb[19].mxu1  ;;  %5224 = vmatpush1.bf16.msra.mxu0 %v7456_v61  ;;  %v7578_v61 = vld [vmem:[#allocation2 + $0x154] ss:$24 sps:$4 sm:$0xff]  }
 0x380   : > { %5225 = vmatprep.subr.bf16.mxu0 %v7464_v28  ;;  %4902 = vmatpush1.bf16.msra.mxu1 %v7465_v23  ;;  %v7483_v28 = vld [vmem:[%s8070_s27 + $0x848] ss:$24 sps:$4 sm:$0xff]   ;;  %v7491_v23 = vld [vmem:[%s8070_s27 + $0x87c] ss:$24 sps:$4 sm:$0xff]  }
 0x381   : > { %4805 = vmatmul.mubr.bf16.gmra.mrb[72].mxu1 %v10010_v19  ;;  %4903 = vmatprep.subr.bf16.mxu1 %v7473_v7 }
 0x382   : > { %5127 = vmatmul.mubr.bf16.gmra.mrb[72].mxu0 %v7572_v9  ;;  %4814 = vmatprep.mubr.bf16.mxu1 %v10013_v24 }
 0x383   : > { %5136 = vmatprep.mubr.bf16.mxu0 %v7574_v18  ;;  %5226 = vmatpush1.bf16.msra.mxu0 %v7462_v52  ;;  %v7488_v52 = vld [vmem:[%s8070_s27 + $0x5b4] ss:$24 sps:$4 sm:$0xff]   ;;  %v7486_v18 = vld [vmem:[%s8070_s27 + $0x5b0] ss:$24 sps:$4 sm:$0xff]  }
 0x384   : > { %v10018_v38 = vpop.f32.mrb[20].mxu1  ;;  %5227 = vmatprep.subr.bf16.mxu0 %v7470_v21  ;;  %4904 = vmatpush1.bf16.msra.mxu1 %v7471_v39  ;;  %v7494_v39 = vld [vmem:[%s8070_s27 + $0x8ac] ss:$24 sps:$4 sm:$0xff]  }
 0x385   : > { %v10022_v33 = vpop.f32.mrb[21].mxu1  ;;  %4905 = vmatprep.subr.bf16.mxu1 %v7479_v8  ;;  %v10054_v8 = vld [vmem:[#allocation2 + $0x158] ss:$24 sps:$4 sm:$0xff]  }
 0x386   : > { %v10024_v29 = vpop.f32.mrb[22].mxu1 }
 0x387   : > { %v10026_v49 = vpop.f32.mrb[23].mxu1  ;;  %5228 = vmatpush1.bf16.msra.mxu0 %v7468_v55  ;;  %v7489_v55 = vld [vmem:[%s8070_s27 + $0x878] ss:$24 sps:$4 sm:$0xff]  }
 0x388   : > { %5229 = vmatprep.subr.bf16.mxu0 %v7476_v40  ;;  %4906 = vmatpush1.bf16.msra.mxu1 %v7477_v30  ;;  %v7497_v40 = vld [vmem:[%s8070_s27 + $0x5e4] ss:$24 sps:$4 sm:$0xff]  }
 0x389   : > { %4815 = vmatmul.mubr.bf16.gmra.mrb[76].mxu1 %v10032_v2  ;;  %4907 = vmatprep.subr.bf16.mxu1 %v7485_v46  ;;  %v10057_v30 = vld [vmem:[#allocation2 + $0x18c] ss:$24 sps:$4 sm:$0xff]   ;;  %v7492_v46 = vld [vmem:[%s8070_s27 + $0x8a8] ss:$24 sps:$4 sm:$0xff]  }
 0x38a   : > { %5137 = vmatmul.mubr.bf16.gmra.mrb[76].mxu0 %v7576_v3  ;;  %4824 = vmatprep.mubr.bf16.mxu1 %v10035_v6  ;;  %v7495_v3 = vld [vmem:[%s8070_s27 + $0x5e0] ss:$24 sps:$4 sm:$0xff]  }
 0x38b   : > { %5146 = vmatprep.mubr.bf16.mxu0 %v7578_v61  ;;  %5230 = vmatpush1.bf16.msra.mxu0 %v7474_v50  ;;  %v7580_v50 = vld [vmem:[#allocation2 + $0x150] ss:$24 sps:$4 sm:$0xff]  }
 0x38c   : > { %v10040_v1 = vpop.f32.mrb[24].mxu1  ;;  %5231 = vmatprep.subr.bf16.mxu0 %v7482_v63  ;;  %4908 = vmatpush1.bf16.msra.mxu1 %v7483_v28  ;;  %v7582_v63 = vld [vmem:[#allocation2 + $0x184] ss:$24 sps:$4 sm:$0xff]  }
 0x38d   : > { %v10044_v21 = vpop.f32.mrb[25].mxu1  ;;  %4909 = vmatprep.subr.bf16.mxu1 %v7491_v23  ;;  %v7503_v28 = vld [vmem:[%s8070_s27 + $0x614] ss:$24 sps:$4 sm:$0xff]  }
 0x38e   : > { %v10046_v7 = vpop.f32.mrb[26].mxu1 }
 0x38f   : > { %v10048_v9 = vpop.f32.mrb[27].mxu1  ;;  %5232 = vmatpush1.bf16.msra.mxu0 %v7480_v59  ;;  %v7500_v59 = vld [vmem:[%s8070_s27 + $0x8dc] ss:$24 sps:$4 sm:$0xff]  }
 0x390   : > { %5233 = vmatprep.subr.bf16.mxu0 %v7488_v52  ;;  %4910 = vmatpush1.bf16.msra.mxu1 %v7489_v55  ;;  %v7584_v55 = vld [vmem:[#allocation2 + $0x180] ss:$24 sps:$4 sm:$0xff]  }
 0x391   : > { %4825 = vmatmul.mubr.bf16.gmra.mrb[80].mxu1 %v10054_v8  ;;  %4911 = vmatprep.subr.bf16.mxu1 %v7494_v39  ;;  %v10076_v39 = vld [vmem:[#allocation2 + $0x1bc] ss:$24 sps:$4 sm:$0xff]  }
 0x392   : > { %5147 = vmatmul.mubr.bf16.gmra.mrb[80].mxu0 %v7580_v50  ;;  %4834 = vmatprep.mubr.bf16.mxu1 %v10057_v30 }
 0x393   : > { %5156 = vmatprep.mubr.bf16.mxu0 %v7582_v63  ;;  %5234 = vmatpush1.bf16.msra.mxu0 %v7486_v18  ;;  %v10073_v18 = vld [vmem:[#allocation2 + $0x188] ss:$24 sps:$4 sm:$0xff]  }
 0x394   : > { %v10062_v61 = vpop.f32.mrb[28].mxu1  ;;  %5235 = vmatprep.subr.bf16.mxu0 %v7497_v40  ;;  %4912 = vmatpush1.bf16.msra.mxu1 %v7492_v46  ;;  %11478 = vst [vmem:[#allocation140_spill] sm:$0xff] %v10073_v18  ;;  %v7586_v40 = vld [vmem:[#allocation2 + $0x1b4] ss:$24 sps:$4 sm:$0xff]  }
 0x395   : > { %v10066_v52 = vpop.f32.mrb[29].mxu1  ;;  %4913 = vmatprep.subr.bf16.mxu1 %v7500_v59 }
 0x396   : > { %v10068_v23 = vpop.f32.mrb[30].mxu1 }
 0x397   : > { %v10070_v50 = vpop.f32.mrb[31].mxu1  ;;  %5236 = vmatpush1.bf16.msra.mxu0 %v7495_v3 }
 0x398   : > { %5366 = vmatprep.subr.bf16.mxu0 %v7503_v28  ;;  %4914 = vmatpush1.bf16.msra.mxu1 %v7498_v43  ;;  %v7590_v43 = vld [vmem:[#allocation2 + $0x1e4] ss:$24 sps:$4 sm:$0xff]  }
 0x399   : > { %4835 = vmatmul.mubr.bf16.gmra.mrb[84].mxu1 %v10073_v18  ;;  %6356 = vmatprep.subr.bf16.mxu1 %v7503_v28  ;;  %v10090_v18 = vld [vmem:[#allocation2 + $0x1ec] ss:$24 sps:$4 sm:$0xff]  }
 0x39a   : > { %5157 = vmatmul.mubr.bf16.gmra.mrb[84].mxu0 %v7584_v55  ;;  %4844 = vmatprep.mubr.bf16.mxu1 %v10076_v39  ;;  %v7588_v55 = vld [vmem:[#allocation2 + $0x1b0] ss:$24 sps:$4 sm:$0xff]   ;;  %11483 = vst [vmem:[#allocation145_spill] sm:$0xff] %v10090_v18 }
 0x39b   : > { %5166 = vmatprep.mubr.bf16.mxu0 %v7586_v40 }
 0x39c   : > { %v10079_v63 = vpop.f32.mrb[32].mxu1 }
 0x39d   : > { %v10081_v46 = vpop.f32.mrb[33].mxu1 }
 0x39e   : > { %11479 = vst [vmem:[#allocation141_spill] sm:$0xff] %v10081_v46  ;;  %v10083_v3 = vpop.f32.mrb[34].mxu1 }
 0x39f   : > { %11480 = vst [vmem:[#allocation142_spill] sm:$0xff] %v10083_v3  ;;  %v10085_v59 = vpop.f32.mrb[35].mxu1 }
 0x3a0   : > { %11481 = vst [vmem:[#allocation143_spill] sm:$0xff] %v10085_v59  ;;  %v10101_v59 = vld [vmem:[#allocation2 + $0x1e8] ss:$24 sps:$4 sm:$0xff]  }
 0x3a1   : > { %4845 = vmatmul.mubr.bf16.gmra.mrb[88].mxu1 %v10087_v42  ;;  %11488 = vst [vmem:[#allocation150_spill] sm:$0xff] %v10101_v59  ;;  %v7592_v42 = vld [vmem:[#allocation2 + $0x1e0] ss:$24 sps:$4 sm:$0xff]  }
 0x3a2   : > { %5167 = vmatmul.mubr.bf16.gmra.mrb[88].mxu0 %v7588_v55  ;;  %4854 = vmatprep.mubr.bf16.mxu1 %v10090_v18  ;;  %v10104_v55 = vld [vmem:[#allocation2 + $0x21c] ss:$24 sps:$4 sm:$0xff]  }
 0x3a3   : > { %5176 = vmatprep.mubr.bf16.mxu0 %v7590_v43  ;;  %11489 = vst [vmem:[#allocation151_spill] sm:$0xff] %v10104_v55  ;;  %v7594_v18 = vld [vmem:[#allocation2 + $0x214] ss:$24 sps:$4 sm:$0xff]  }
 0x3a4   : > { %v10093_v40 = vpop.f32.mrb[36].mxu1 }
 0x3a5   : > { %11484 = vst [vmem:[#allocation146_spill] sm:$0xff] %v10093_v40  ;;  %v10095_v28 = vpop.f32.mrb[37].mxu1 }
 0x3a6   : > { %11485 = vst [vmem:[#allocation147_spill] sm:$0xff] %v10095_v28  ;;  %v10097_v46 = vpop.f32.mrb[38].mxu1 }
 0x3a7   : > { %11486 = vst [vmem:[#allocation148_spill] sm:$0xff] %v10097_v46  ;;  %v10099_v3 = vpop.f32.mrb[39].mxu1 }
 0x3a8   : > { %11487 = vst [vmem:[#allocation149_spill] sm:$0xff] %v10099_v3  ;;  %v10115_v3 = vld [vmem:[#allocation2 + $0x218] ss:$24 sps:$4 sm:$0xff]  }
 0x3a9   : > { %4855 = vmatmul.mubr.bf16.gmra.mrb[92].mxu1 %v10101_v59  ;;  %11494 = vst [vmem:[#allocation156_spill] sm:$0xff] %v10115_v3  ;;  %v7596_v59 = vld [vmem:[#allocation2 + $0x210] ss:$24 sps:$4 sm:$0xff]  }
 0x3aa   : > { %5177 = vmatmul.mubr.bf16.gmra.mrb[92].mxu0 %v7592_v42  ;;  %4864 = vmatprep.mubr.bf16.mxu1 %v10104_v55  ;;  %v2227_v42 = vlaneseq }
 0x3ab   : > { %5186 = vmatprep.mubr.bf16.mxu0 %v7594_v18 }
 0x3ac   : > { %v10107_v43 = vpop.f32.mrb[40].mxu1 }
 0x3ad   : > { %11490 = vst [vmem:[#allocation152_spill] sm:$0xff] %v10107_v43  ;;  %v10109_v40 = vpop.f32.mrb[41].mxu1 }
 0x3ae   : > { %11491 = vst [vmem:[#allocation153_spill] sm:$0xff] %v10109_v40  ;;  %v10111_v28 = vpop.f32.mrb[42].mxu1 }
 0x3af   : > { %11492 = vst [vmem:[#allocation154_spill] sm:$0xff] %v10111_v28  ;;  %v10113_v46 = vpop.f32.mrb[43].mxu1 }
 0x3b0   : > { %11493 = vst [vmem:[#allocation155_spill] sm:$0xff] %v10113_v46  ;;  %v10126_v46 = vshrl.u32 %v2227_v42, 7 }
 0x3b1   : > { %4865 = vmatmul.mubr.bf16.gmra.mrb[96].mxu1 %v10115_v3  ;;  %v10153_v3 = vld [vmem:[#allocation2 + $0x10] ss:$24 sps:$4 sm:$0xff]  }
 0x3b2   : > { %5187 = vmatmul.mubr.bf16.gmra.mrb[96].mxu0 %v7596_v59  ;;  %4874 = vmatprep.mubr.bf16.mxu1 %v9788_v25  ;;  %11498 = vst [vmem:[#allocation160_spill] sm:$0xff] %v10126_v46  ;;  %v10132_v59 = vld [vmem:[#allocation2 + $0x14] ss:$24 sps:$4 sm:$0xff]   ;;  %v2233_v42 = vsub.s32 1, %v10126_v46  ;;  %11504 = vst [vmem:[#allocation166_spill] sm:$0xff] %v10153_v3 }
 0x3b3   : > { %5196 = vmatprep.mubr.bf16.mxu0 %v9786_v4  ;;  %11500 = vst [vmem:[#allocation162_spill] sm:$0xff] %v10132_v59  ;;  %v2229_v4 = vsub.s32 0, %v10126_v46  ;;  %v7506_v25 = vld [vmem:[%s8070_s27 + $0x644] ss:$24 sps:$4 sm:$0xff]  }
 0x3b4   : > { %v10120_v18 = vpop.f32.mrb[44].mxu1  ;;  %v10157_v46 = vld [vmem:[#allocation2 + $0x44] ss:$24 sps:$4 sm:$0xff]  }
 0x3b5   : > { %11495 = vst [vmem:[#allocation157_spill] sm:$0xff] %v10120_v18  ;;  %v10122_v40 = vpop.f32.mrb[45].mxu1  ;;  %11505 = vst [vmem:[#allocation167_spill] sm:$0xff] %v10157_v46 }
 0x3b6   : > { %11496 = vst [vmem:[#allocation158_spill] sm:$0xff] %v10122_v40  ;;  %v10124_v28 = vpop.f32.mrb[46].mxu1  ;;  %v10138_v40 = vld [vmem:[%s8078_s26] sm:$0x3f] }
 0x3b7   : > { %11497 = vst [vmem:[#allocation159_spill] sm:$0xff] %v10124_v28  ;;  %v10128_v43 = vpop.f32.mrb[47].mxu1  ;;  %11501 = vst [vmem:[#allocation163_spill] sm:$0xff] %v10138_v40  ;;  %v10147_v18 = vrot.slane %v10138_v40, %v2229_v4  ;;  %v7509_v4 = vld [vmem:[%s8070_s27 + $0x674] ss:$24 sps:$4 sm:$0xff]  }
 0x3b8   : > { %11499 = vst [vmem:[#allocation161_spill] sm:$0xff] %v10128_v43 }
 0x3b9   : > { %4875 = vmatmul.mubr.bf16.gmra.mrb[100].mxu1 %v9795_v58  ;;  %v7501_v58 = vld [vmem:[%s8070_s27 + $0x610] ss:$24 sps:$4 sm:$0xff]  }
 0x3ba   : > { %5197 = vmatmul.mubr.bf16.gmra.mrb[100].mxu0 %v9793_v51  ;;  %4915 = vmatprep.mubr.bf16.mxu1 %v10132_v59 }
 0x3bb   : > { %5237 = vmatprep.mubr.bf16.mxu0 %v9895_v12  ;;  %v10151_v12 = vrot.slane %v10138_v40, %v2233_v42  ;;  %v4117_v40 = vadd.f32 %v9915_v34, %v10147_v18 }
 0x3bc   : > { %v10141_v28 = vpop.f32.mrb[48].mxu1 }
 0x3bd   : > { %11502 = vst [vmem:[#allocation164_spill] sm:$0xff] %v10141_v28  ;;  %v10143_v43 = vpop.f32.mrb[49].mxu1  ;;  %v4115_v42 = vadd.f32 %v9913_v62, %v10151_v12  ;;  %v7507_v28 = vld [vmem:[%s8070_s27 + $0x670] ss:$24 sps:$4 sm:$0xff]  }
 0x3be   : > { %11503 = vst [vmem:[#allocation165_spill] sm:$0xff] %v10143_v43  ;;  %v4236_v51 = vpop.f32.mrb[50].mxu1 }
 0x3bf   : > { %v4237_v59 = vpop.f32.mrb[51].mxu1  ;;  %v7504_v51 = vld [vmem:[%s8070_s27 + $0x640] ss:$24 sps:$4 sm:$0xff]  }
 0x3c0   : > { %v4113_v59 = vadd.f32 %v9910_v44, %v10147_v18  ;;  %v4119_v44 = vadd.f32 %v9918_v10, %v10151_v12  ;;  %v10181_v10 = vld [vmem:[#allocation2 + $0x74] ss:$24 sps:$4 sm:$0xff]  }
 0x3c1   : > { %4916 = vmatmul.mubr.bf16.vlgmr.msra.gmra.mrb[52].mxu1 %v10153_v3 }
 0x3c2   : > { %5238 = vmatmul.mubr.bf16.vlgmr.msra.gmra.mrb[52].mxu0 %v9901_v54  ;;  %4925 = vmatprep.mubr.bf16.mxu1 %v10157_v46 }
 0x3c3   : > { %5367 = vmatpush1.bf16.msra.mxu0 %v7501_v58  ;;  %5247 = vmatprep.mubr.bf16.mxu0 %v9905_v45 }
 0x3c4   : > { %5368 = vmatprep.subr.bf16.mxu0 %v7506_v25  ;;  %6372 = vmatpush1.bf16.msra.mxu1 %v7501_v58  ;;  %v7512_v58 = vld [vmem:[%s8070_s27 + $0x6a4] ss:$24 sps:$4 sm:$0xff]  }
 0x3c5   : > { %v4434_v54 = vpop.f32.mrb[0].mxu0  ;;  %6357 = vmatprep.subr.bf16.mxu1 %v7506_v25  ;;  %v10176_v25 = vld [vmem:[#allocation2 + $0x40] ss:$24 sps:$4 sm:$0xff]  }
 0x3c6   : > { %v6389_v46 = vadd.f32 %v4434_v54, %v4113_v59  ;;  %v4436_v3 = vpop.f32.mrb[1].mxu0 }
 0x3c7   : > { %v6391_v45 = vadd.f32 %v4436_v3, %v4115_v42  ;;  %v4438_v43 = vpop.f32.mrb[2].mxu0  ;;  %5369 = vmatpush1.bf16.msra.mxu0 %v7504_v51  ;;  %v4123_v3 = vadd.f32 %v9932_v5, %v10147_v18 }
 0x3c8   : > { %5527 = vst [vmem:[%s8080_s6] sm:$0xff] %v6389_v46  ;;  %v6393_v62 = vadd.f32 %v4438_v43, %v4117_v40  ;;  %v4440_v55 = vpop.f32.mrb[3].mxu0  ;;  %5370 = vmatprep.subr.bf16.mxu0 %v7509_v4  ;;  %6373 = vmatpush1.bf16.msra.mxu1 %v7504_v51  ;;  %v7510_v46 = vld [vmem:[%s8070_s27 + $0x6a0] ss:$24 sps:$4 sm:$0xff]   ;;  %v7515_v40 = vld [vmem:[%s8070_s27 + $0x6d4] ss:$24 sps:$4 sm:$0xff]   ;;  %v4127_v43 = vadd.f32 %v9936_v56, %v10147_v18 }
 0x3c9   : > { %5528 = vst [vmem:[%s8080_s6 + $0x8] sm:$0xff] %v6391_v45  ;;  %v6395_v34 = vadd.f32 %v4440_v55, %v4119_v44  ;;  %4926 = vmatmul.mubr.bf16.gmra.mrb[56].mxu1 %v10176_v25  ;;  %v4125_v55 = vadd.f32 %v9934_v27, %v10151_v12  ;;  %6358 = vmatprep.subr.bf16.mxu1 %v7509_v4  ;;  %v7513_v4 = vld [vmem:[%s8070_s27 + $0x6d0] ss:$24 sps:$4 sm:$0xff]   ;;  %v7518_v44 = vld [vmem:[%s8070_s27 + $0x704] ss:$24 sps:$4 sm:$0xff]  }
 0x3ca   : > { %5533 = vst [vmem:[%s8080_s6 + $0x30] sm:$0xff] %v6393_v62  ;;  %5248 = vmatmul.mubr.bf16.gmra.mrb[56].mxu0 %v9922_v48  ;;  %4935 = vmatprep.mubr.bf16.mxu1 %v10181_v10  ;;  %v4133_v45 = vadd.f32 %v9952_v47, %v10147_v18  ;;  %v7516_v62 = vld [vmem:[%s8070_s27 + $0x700] ss:$24 sps:$4 sm:$0xff]   ;;  %v4139_v47 = vadd.f32 %v9960_v31, %v10151_v12  ;;  %v10229_v31 = vld [vmem:[#allocation2 + $0xd4] ss:$24 sps:$4 sm:$0xff]  }
 0x3cb   : > { %5534 = vst [vmem:[%s8080_s6 + $0x38] sm:$0xff] %v6395_v34  ;;  %5371 = vmatpush1.bf16.msra.mxu0 %v7507_v28  ;;  %5257 = vmatprep.mubr.bf16.mxu0 %v9926_v35  ;;  %v4129_v35 = vadd.f32 %v9938_v41, %v10151_v12  ;;  %v10205_v41 = vld [vmem:[#allocation2 + $0xa4] ss:$24 sps:$4 sm:$0xff]  }
 0x3cc   : > { %5372 = vmatprep.subr.bf16.mxu0 %v7512_v58  ;;  %6374 = vmatpush1.bf16.msra.mxu1 %v7507_v28  ;;  %v10200_v28 = vld [vmem:[#allocation2 + $0x70] ss:$24 sps:$4 sm:$0xff]  }
 0x3cd   : > { %v4444_v48 = vpop.f32.mrb[4].mxu0  ;;  %6359 = vmatprep.subr.bf16.mxu1 %v7512_v58  ;;  %v4135_v58 = vadd.f32 %v9956_v0, %v10151_v12 }
 0x3ce   : > { %v6397_v51 = vadd.f32 %v4444_v48, %v4123_v3  ;;  %v4446_v59 = vpop.f32.mrb[5].mxu0  ;;  %v4137_v3 = vadd.f32 %v9958_v14, %v10147_v18  ;;  %v7524_v14 = vld [vmem:[%s8070_s27 + $0x764] ss:$24 sps:$4 sm:$0xff]  }
 0x3cf   : > { %v6399_v5 = vadd.f32 %v4446_v59, %v4125_v55  ;;  %v4448_v42 = vpop.f32.mrb[6].mxu0  ;;  %5373 = vmatpush1.bf16.msra.mxu0 %v7510_v46  ;;  %v10224_v59 = vld [vmem:[#allocation2 + $0xa0] ss:$24 sps:$4 sm:$0xff]  }
 0x3d0   : > { %5539 = vst [vmem:[%s8080_s6 + $0x60] sm:$0xff] %v6397_v51  ;;  %v6401_v27 = vadd.f32 %v4448_v42, %v4127_v43  ;;  %v4450_v54 = vpop.f32.mrb[7].mxu0  ;;  %5374 = vmatprep.subr.bf16.mxu0 %v7515_v40  ;;  %6375 = vmatpush1.bf16.msra.mxu1 %v7510_v46  ;;  %v4145_v42 = vadd.f32 %v9978_v26, %v10151_v12 }
 0x3d1   : > { %5540 = vst [vmem:[%s8080_s6 + $0x68] sm:$0xff] %v6399_v5  ;;  %v6403_v56 = vadd.f32 %v4450_v54, %v4129_v35  ;;  %4936 = vmatmul.mubr.bf16.gmra.mrb[60].mxu1 %v10200_v28  ;;  %6360 = vmatprep.subr.bf16.mxu1 %v7515_v40  ;;  %v7519_v40 = vld [vmem:[%s8070_s27 + $0x730] ss:$24 sps:$4 sm:$0xff]   ;;  %v4143_v35 = vadd.f32 %v9974_v11, %v10147_v18  ;;  %v7522_v5 = vld [vmem:[%s8070_s27 + $0x760] ss:$24 sps:$4 sm:$0xff]  }
 0x3d2   : > { %5545 = vst [vmem:[%s8080_s6 + $0x90] sm:$0xff] %v6401_v27  ;;  %5258 = vmatmul.mubr.bf16.gmra.mrb[60].mxu0 %v9944_v60  ;;  %4945 = vmatprep.mubr.bf16.mxu1 %v10205_v41  ;;  %v7521_v60 = vld [vmem:[%s8070_s27 + $0x734] ss:$24 sps:$4 sm:$0xff]   ;;  %v4147_v54 = vadd.f32 %v9980_v53, %v10147_v18  ;;  %v4149_v11 = vadd.f32 %v9982_v16, %v10151_v12  ;;  %v7530_v53 = vld [vmem:[%s8070_s27 + $0x7c4] ss:$24 sps:$4 sm:$0xff]  }
 0x3d3   : > { %5546 = vst [vmem:[%s8080_s6 + $0x98] sm:$0xff] %v6403_v56  ;;  %5267 = vmatprep.mubr.bf16.mxu0 %v9947_v57  ;;  %5375 = vmatpush1.bf16.msra.mxu0 %v7513_v4  ;;  %v10253_v16 = vld [vmem:[#allocation2 + $0x104] ss:$24 sps:$4 sm:$0xff]  }
 0x3d4   : > { %5376 = vmatprep.subr.bf16.mxu0 %v7518_v44  ;;  %6376 = vmatpush1.bf16.msra.mxu1 %v7513_v4 }
 0x3d5   : > { %v4454_v34 = vpop.f32.mrb[8].mxu0  ;;  %6361 = vmatprep.subr.bf16.mxu1 %v7518_v44 }
 0x3d6   : > { %v6405_v57 = vadd.f32 %v4454_v34, %v4133_v45  ;;  %v4456_v55 = vpop.f32.mrb[9].mxu0  ;;  %v10248_v34 = vld [vmem:[#allocation2 + $0xd0] ss:$24 sps:$4 sm:$0xff]  }
 0x3d7   : > { %v6407_v46 = vadd.f32 %v4456_v55, %v4135_v58  ;;  %v4458_v48 = vpop.f32.mrb[10].mxu0  ;;  %5377 = vmatpush1.bf16.msra.mxu0 %v7516_v62 }
 0x3d8   : > { %5551 = vst [vmem:[%s8080_s6 + $0xc0] sm:$0xff] %v6405_v57  ;;  %v6409_v0 = vadd.f32 %v4458_v48, %v4137_v3  ;;  %v4460_v43 = vpop.f32.mrb[11].mxu0  ;;  %5378 = vmatprep.subr.bf16.mxu0 %v7521_v60  ;;  %6377 = vmatpush1.bf16.msra.mxu1 %v7516_v62  ;;  %v7525_v62 = vld [vmem:[%s8070_s27 + $0x790] ss:$24 sps:$4 sm:$0xff]   ;;  %v7528_v3 = vld [vmem:[%s8070_s27 + $0x7c0] ss:$24 sps:$4 sm:$0xff]   ;;  %v4155_v57 = vadd.f32 %v10000_v36, %v10151_v12 }
 0x3d9   : > { %5552 = vst [vmem:[%s8080_s6 + $0xc8] sm:$0xff] %v6407_v46  ;;  %v6411_v51 = vadd.f32 %v4460_v43, %v4139_v47  ;;  %4946 = vmatmul.mubr.bf16.gmra.mrb[64].mxu1 %v10224_v59  ;;  %6362 = vmatprep.subr.bf16.mxu1 %v7521_v60  ;;  %v4153_v60 = vadd.f32 %v9996_v15, %v10147_v18 }
 0x3da   : > { %5557 = vst [vmem:[%s8080_s6 + $0xf0] sm:$0xff] %v6409_v0  ;;  %5268 = vmatmul.mubr.bf16.gmra.mrb[64].mxu0 %v9966_v32  ;;  %4955 = vmatprep.mubr.bf16.mxu1 %v10229_v31  ;;  %v7527_v32 = vld [vmem:[%s8070_s27 + $0x794] ss:$24 sps:$4 sm:$0xff]   ;;  %v4157_v47 = vadd.f32 %v10002_v37, %v10147_v18  ;;  %v4159_v15 = vadd.f32 %v10004_v13, %v10151_v12  ;;  %v7536_v37 = vld [vmem:[%s8070_s27 + $0x824] ss:$24 sps:$4 sm:$0xff]  }
 0x3db   : > { %5558 = vst [vmem:[%s8080_s6 + $0xf8] sm:$0xff] %v6411_v51  ;;  %5277 = vmatprep.mubr.bf16.mxu0 %v9969_v20  ;;  %5379 = vmatpush1.bf16.msra.mxu0 %v7519_v40  ;;  %v10277_v13 = vld [vmem:[#allocation2 + $0x134] ss:$24 sps:$4 sm:$0xff]  }
 0x3dc   : > { %5380 = vmatprep.subr.bf16.mxu0 %v7524_v14  ;;  %6378 = vmatpush1.bf16.msra.mxu1 %v7519_v40  ;;  %v7531_v40 = vld [vmem:[%s8070_s27 + $0x7f0] ss:$24 sps:$4 sm:$0xff]  }
 0x3dd   : > { %v4464_v27 = vpop.f32.mrb[12].mxu0  ;;  %6363 = vmatprep.subr.bf16.mxu1 %v7524_v14  ;;  %v10272_v14 = vld [vmem:[#allocation2 + $0x100] ss:$24 sps:$4 sm:$0xff]  }
 0x3de   : > { %v6413_v20 = vadd.f32 %v4464_v27, %v4143_v35  ;;  %v4466_v4 = vpop.f32.mrb[13].mxu0  ;;  %v4163_v35 = vadd.f32 %v10018_v38, %v10147_v18  ;;  %v4169_v38 = vadd.f32 %v10026_v49, %v10151_v12  ;;  %v10301_v49 = vld [vmem:[#allocation2 + $0x164] ss:$24 sps:$4 sm:$0xff]  }
 0x3df   : > { %v6415_v56 = vadd.f32 %v4466_v4, %v4145_v42  ;;  %v4468_v44 = vpop.f32.mrb[14].mxu0  ;;  %5381 = vmatpush1.bf16.msra.mxu0 %v7522_v5  ;;  %v4165_v42 = vadd.f32 %v10022_v33, %v10151_v12 }
 0x3e0   : > { %5563 = vst [vmem:[%s8080_s6 + $0x120] sm:$0xff] %v6413_v20  ;;  %v6417_v26 = vadd.f32 %v4468_v44, %v4147_v54  ;;  %v4470_v45 = vpop.f32.mrb[15].mxu0  ;;  %5382 = vmatprep.subr.bf16.mxu0 %v7527_v32  ;;  %6379 = vmatpush1.bf16.msra.mxu1 %v7522_v5  ;;  %v7534_v5 = vld [vmem:[%s8070_s27 + $0x820] ss:$24 sps:$4 sm:$0xff]  }
 0x3e1   : > { %5564 = vst [vmem:[%s8080_s6 + $0x128] sm:$0xff] %v6415_v56  ;;  %v6419_v58 = vadd.f32 %v4470_v45, %v4149_v11  ;;  %4956 = vmatmul.mubr.bf16.gmra.mrb[68].mxu1 %v10248_v34  ;;  %6364 = vmatprep.subr.bf16.mxu1 %v7527_v32  ;;  %v4167_v32 = vadd.f32 %v10024_v29, %v10147_v18  ;;  %v7537_v56 = vld [vmem:[%s8070_s27 + $0x850] ss:$24 sps:$4 sm:$0xff]   ;;  %v7542_v29 = vld [vmem:[%s8070_s27 + $0x884] ss:$24 sps:$4 sm:$0xff]  }
 0x3e2   : > { %5569 = vst [vmem:[%s8080_s6 + $0x150] sm:$0xff] %v6417_v26  ;;  %5278 = vmatmul.mubr.bf16.gmra.mrb[68].mxu0 %v9988_v17  ;;  %4965 = vmatprep.mubr.bf16.mxu1 %v10253_v16  ;;  %v7533_v17 = vld [vmem:[%s8070_s27 + $0x7f4] ss:$24 sps:$4 sm:$0xff]   ;;  %v10296_v26 = vld [vmem:[#allocation2 + $0x130] ss:$24 sps:$4 sm:$0xff]   ;;  %v4173_v45 = vadd.f32 %v10040_v1, %v10147_v18  ;;  %v4179_v1 = vadd.f32 %v10048_v9, %v10151_v12 }
 0x3e3   : > { %5570 = vst [vmem:[%s8080_s6 + $0x158] sm:$0xff] %v6419_v58  ;;  %5287 = vmatprep.mubr.bf16.mxu0 %v9991_v22  ;;  %5383 = vmatpush1.bf16.msra.mxu0 %v7525_v62  ;;  %v4175_v58 = vadd.f32 %v10044_v21, %v10151_v12  ;;  %v10325_v9 = vld [vmem:[#allocation2 + $0x194] ss:$24 sps:$4 sm:$0xff]  }
 0x3e4   : > { %5384 = vmatprep.subr.bf16.mxu0 %v7530_v53  ;;  %6380 = vmatpush1.bf16.msra.mxu1 %v7525_v62  ;;  %v7540_v62 = vld [vmem:[%s8070_s27 + $0x880] ss:$24 sps:$4 sm:$0xff]  }
 0x3e5   : > { %v4474_v55 = vpop.f32.mrb[16].mxu0  ;;  %6365 = vmatprep.subr.bf16.mxu1 %v7530_v53 }
 0x3e6   : > { %v6421_v22 = vadd.f32 %v4474_v55, %v4153_v60  ;;  %v4476_v46 = vpop.f32.mrb[17].mxu0  ;;  %v4177_v60 = vadd.f32 %v10046_v7, %v10147_v18  ;;  %v7548_v7 = vld [vmem:[%s8070_s27 + $0x8e4] ss:$24 sps:$4 sm:$0xff]  }
 0x3e7   : > { %v6423_v48 = vadd.f32 %v4476_v46, %v4155_v57  ;;  %v4478_v0 = vpop.f32.mrb[18].mxu0  ;;  %5385 = vmatpush1.bf16.msra.mxu0 %v7528_v3  ;;  %v10320_v46 = vld [vmem:[#allocation2 + $0x160] ss:$24 sps:$4 sm:$0xff]  }
 0x3e8   : > { %5575 = vst [vmem:[%s8080_s6 + $0x180] sm:$0xff] %v6421_v22  ;;  %v6425_v36 = vadd.f32 %v4478_v0, %v4157_v47  ;;  %v4480_v43 = vpop.f32.mrb[19].mxu0  ;;  %5386 = vmatprep.subr.bf16.mxu0 %v7533_v17  ;;  %6381 = vmatpush1.bf16.msra.mxu1 %v7528_v3  ;;  %v7543_v47 = vld [vmem:[%s8070_s27 + $0x8b0] ss:$24 sps:$4 sm:$0xff]   ;;  %v4185_v0 = vadd.f32 %v10066_v52, %v10151_v12 }
 0x3e9   : > { %5576 = vst [vmem:[%s8080_s6 + $0x188] sm:$0xff] %v6423_v48  ;;  %v6427_v51 = vadd.f32 %v4480_v43, %v4159_v15  ;;  %4966 = vmatmul.mubr.bf16.gmra.mrb[72].mxu1 %v10272_v14  ;;  %6366 = vmatprep.subr.bf16.mxu1 %v7533_v17  ;;  %v4183_v15 = vadd.f32 %v10062_v61, %v10147_v18  ;;  %v7546_v48 = vld [vmem:[%s8070_s27 + $0x8e0] ss:$24 sps:$4 sm:$0xff]  }
 0x3ea   : > { %5581 = vst [vmem:[%s8080_s6 + $0x1b0] sm:$0xff] %v6425_v36  ;;  %5288 = vmatmul.mubr.bf16.gmra.mrb[72].mxu0 %v10010_v19  ;;  %4975 = vmatprep.mubr.bf16.mxu1 %v10277_v13  ;;  %v7539_v19 = vld [vmem:[%s8070_s27 + $0x854] ss:$24 sps:$4 sm:$0xff]  }
 0x3eb   : > { %5582 = vst [vmem:[%s8080_s6 + $0x1b8] sm:$0xff] %v6427_v51  ;;  %5297 = vmatprep.mubr.bf16.mxu0 %v10013_v24  ;;  %5387 = vmatpush1.bf16.msra.mxu0 %v7531_v40 }
 0x3ec   : > { %5388 = vmatprep.subr.bf16.mxu0 %v7536_v37  ;;  %6382 = vmatpush1.bf16.msra.mxu1 %v7531_v40 }
 0x3ed   : > { %v4484_v27 = vpop.f32.mrb[20].mxu0  ;;  %6367 = vmatprep.subr.bf16.mxu1 %v7536_v37 }
 0x3ee   : > { %v6429_v24 = vadd.f32 %v4484_v27, %v4163_v35  ;;  %v4486_v54 = vpop.f32.mrb[21].mxu0  ;;  %v11507_v27 = vld [vmem:[#allocation141_spill] sm:$0xff] }
 0x3ef   : > { %v6431_v20 = vadd.f32 %v4486_v54, %v4165_v42  ;;  %v4488_v4 = vpop.f32.mrb[22].mxu0  ;;  %5389 = vmatpush1.bf16.msra.mxu0 %v7534_v5  ;;  %v4193_v42 = vadd.f32 %v10079_v63, %v10147_v18 }
 0x3f0   : > { %5587 = vst [vmem:[%s8080_s6 + $0x1e0] sm:$0xff] %v6429_v24  ;;  %v6433_v33 = vadd.f32 %v4488_v4, %v4167_v32  ;;  %v4490_v11 = vpop.f32.mrb[23].mxu0  ;;  %5390 = vmatprep.subr.bf16.mxu0 %v7539_v19  ;;  %6383 = vmatpush1.bf16.msra.mxu1 %v7534_v5  ;;  %v10341_v5 = vld [vmem:[#allocation2 + $0x190] ss:$24 sps:$4 sm:$0xff]  }
 0x3f1   : > { %5588 = vst [vmem:[%s8080_s6 + $0x1e8] sm:$0xff] %v6431_v20  ;;  %v6435_v44 = vadd.f32 %v4490_v11, %v4169_v38  ;;  %4976 = vmatmul.mubr.bf16.gmra.mrb[76].mxu1 %v10296_v26  ;;  %6368 = vmatprep.subr.bf16.mxu1 %v7539_v19  ;;  %v4195_v19 = vadd.f32 %v11507_v27, %v10151_v12  ;;  %v11508_v24 = vld [vmem:[#allocation142_spill] sm:$0xff]  ;;  %v11509_v4 = vld [vmem:[#allocation143_spill] sm:$0xff] }
 0x3f2   : > { %5593 = vst [vmem:[%s8080_s6 + $0x210] sm:$0xff] %v6433_v33  ;;  %5298 = vmatmul.mubr.bf16.gmra.mrb[76].mxu0 %v10032_v2  ;;  %4985 = vmatprep.mubr.bf16.mxu1 %v10301_v49  ;;  %v7545_v2 = vld [vmem:[%s8070_s27 + $0x8b4] ss:$24 sps:$4 sm:$0xff]   ;;  %v4197_v54 = vadd.f32 %v11508_v24, %v10147_v18  ;;  %v4199_v33 = vadd.f32 %v11509_v4, %v10151_v12 }
 0x3f3   : > { %5594 = vst [vmem:[%s8080_s6 + $0x218] sm:$0xff] %v6435_v44  ;;  %5307 = vmatprep.mubr.bf16.mxu0 %v10035_v6  ;;  %5391 = vmatpush1.bf16.msra.mxu0 %v7537_v56 }
 0x3f4   : > { %5392 = vmatprep.subr.bf16.mxu0 %v7542_v29  ;;  %6384 = vmatpush1.bf16.msra.mxu1 %v7537_v56 }
 0x3f5   : > { %v4494_v53 = vpop.f32.mrb[24].mxu0  ;;  %6369 = vmatprep.subr.bf16.mxu1 %v7542_v29  ;;  %v10361_v29 = vld [vmem:[#allocation2 + $0x1c0] ss:$24 sps:$4 sm:$0xff]  }
 0x3f6   : > { %v6437_v6 = vadd.f32 %v4494_v53, %v4173_v45  ;;  %v4496_v3 = vpop.f32.mrb[25].mxu0  ;;  %v11510_v45 = vld [vmem:[#allocation144_spill] sm:$0xff]  ;;  %v11512_v53 = vld [vmem:[#allocation146_spill] sm:$0xff] }
 0x3f7   : > { %v6439_v57 = vadd.f32 %v4496_v3, %v4175_v58  ;;  %v4498_v55 = vpop.f32.mrb[26].mxu0  ;;  %5393 = vmatpush1.bf16.msra.mxu0 %v7540_v62  ;;  %v11511_v58 = vld [vmem:[#allocation145_spill] sm:$0xff] }
 0x3f8   : > { %5599 = vst [vmem:[%s8080_s6 + $0x240] sm:$0xff] %v6437_v6  ;;  %v6441_v21 = vadd.f32 %v4498_v55, %v4177_v60  ;;  %v4500_v17 = vpop.f32.mrb[27].mxu0  ;;  %5394 = vmatprep.subr.bf16.mxu0 %v7545_v2  ;;  %6385 = vmatpush1.bf16.msra.mxu1 %v7540_v62  ;;  %v10366_v62 = vld [vmem:[#allocation2 + $0x1f4] ss:$24 sps:$4 sm:$0xff]  }
 0x3f9   : > { %5600 = vst [vmem:[%s8080_s6 + $0x248] sm:$0xff] %v6439_v57  ;;  %v6443_v22 = vadd.f32 %v4500_v17, %v4179_v1  ;;  %4986 = vmatmul.mubr.bf16.gmra.mrb[80].mxu1 %v10320_v46  ;;  %6370 = vmatprep.subr.bf16.mxu1 %v7545_v2  ;;  %v4203_v2 = vadd.f32 %v11512_v53, %v10147_v18  ;;  %v11513_v60 = vld [vmem:[#allocation147_spill] sm:$0xff]  ;;  %v11514_v1 = vld [vmem:[#allocation148_spill] sm:$0xff]  ;;  %v11515_v17 = vld [vmem:[#allocation149_spill] sm:$0xff] }
 0x3fa   : > { %5605 = vst [vmem:[%s8080_s6 + $0x270] sm:$0xff] %v6441_v21  ;;  %5308 = vmatmul.mubr.bf16.gmra.mrb[80].mxu0 %v10054_v8  ;;  %4995 = vmatprep.mubr.bf16.mxu1 %v10325_v9  ;;  %v4187_v8 = vadd.f32 %v10068_v23, %v10147_v18  ;;  %v11506_v23 = vld [vmem:[#allocation140_spill] sm:$0xff]  ;;  %v4205_v6 = vadd.f32 %v11513_v60, %v10151_v12 }
 0x3fb   : > { %5606 = vst [vmem:[%s8080_s6 + $0x278] sm:$0xff] %v6443_v22  ;;  %5317 = vmatprep.mubr.bf16.mxu0 %v10057_v30  ;;  %5395 = vmatpush1.bf16.msra.mxu0 %v7543_v47  ;;  %v4189_v30 = vadd.f32 %v10070_v50, %v10151_v12  ;;  %v10346_v50 = vld [vmem:[#allocation2 + $0x1c4] ss:$24 sps:$4 sm:$0xff]   ;;  %v4207_v57 = vadd.f32 %v11514_v1, %v10147_v18 }
 0x3fc   : > { %5396 = vmatprep.subr.bf16.mxu0 %v7548_v7  ;;  %6386 = vmatpush1.bf16.msra.mxu1 %v7543_v47  ;;  %v4209_v47 = vadd.f32 %v11515_v17, %v10151_v12  ;;  %v11528_v1 = vld [vmem:[#allocation161_spill] sm:$0xff] }
 0x3fd   : > { %v4504_v36 = vpop.f32.mrb[28].mxu0  ;;  %6371 = vmatprep.subr.bf16.mxu1 %v7548_v7 }
 0x3fe   : > { %v6445_v43 = vadd.f32 %v4504_v36, %v4183_v15  ;;  %v4506_v40 = vpop.f32.mrb[29].mxu0  ;;  %v10381_v36 = vld [vmem:[#allocation2 + $0x1f0] ss:$24 sps:$4 sm:$0xff]  }
 0x3ff   : > { %v6447_v61 = vadd.f32 %v4506_v40, %v4185_v0  ;;  %v4508_v51 = vpop.f32.mrb[30].mxu0  ;;  %5397 = vmatpush1.bf16.msra.mxu0 %v7546_v48  ;;  %v11517_v40 = vld [vmem:[#allocation151_spill] sm:$0xff] }
 0x400   : > { %5611 = vst [vmem:[%s8080_s6 + $0x2a0] sm:$0xff] %v6445_v43  ;;  %v6449_v37 = vadd.f32 %v4508_v51, %v4187_v8  ;;  %v4510_v35 = vpop.f32.mrb[31].mxu0  ;;  %6387 = vmatpush1.bf16.msra.mxu1 %v7546_v48  ;;  %v11516_v8 = vld [vmem:[#allocation150_spill] sm:$0xff]  ;;  %v11519_v51 = vld [vmem:[#allocation153_spill] sm:$0xff] }
 0x401   : > { %5612 = vst [vmem:[%s8080_s6 + $0x2a8] sm:$0xff] %v6447_v61  ;;  %v6451_v52 = vadd.f32 %v4510_v35, %v4189_v30  ;;  %4996 = vmatmul.mubr.bf16.gmra.mrb[84].mxu1 %v10341_v5  ;;  %v10386_v43 = vld [vmem:[#allocation2 + $0x224] ss:$24 sps:$4 sm:$0xff]   ;;  %v11518_v30 = vld [vmem:[#allocation152_spill] sm:$0xff] }
 0x402   : > { %5617 = vst [vmem:[%s8080_s6 + $0x2d0] sm:$0xff] %v6449_v37  ;;  %5318 = vmatmul.mubr.bf16.gmra.mrb[84].mxu0 %v11506_v23  ;;  %5005 = vmatprep.mubr.bf16.mxu1 %v10346_v50  ;;  %v4213_v61 = vadd.f32 %v11518_v30, %v10147_v18  ;;  %v4215_v37 = vadd.f32 %v11519_v51, %v10151_v12 }
 0x403   : > { %5618 = vst [vmem:[%s8080_s6 + $0x2d8] sm:$0xff] %v6451_v52  ;;  %5327 = vmatprep.mubr.bf16.mxu0 %v10076_v39  ;;  %v11520_v52 = vld [vmem:[#allocation154_spill] sm:$0xff] }
 0x404   : > { %v4217_v23 = vadd.f32 %v11520_v52, %v10147_v18 }
 0x405   : > { %v4514_v32 = vpop.f32.mrb[32].mxu0 }
 0x406   : > { %v6453_v38 = vadd.f32 %v4514_v32, %v4193_v42  ;;  %v4516_v20 = vpop.f32.mrb[33].mxu0 }
 0x407   : > { %v6455_v11 = vadd.f32 %v4516_v20, %v4195_v19  ;;  %v4518_v39 = vpop.f32.mrb[34].mxu0  ;;  %v11521_v19 = vld [vmem:[#allocation155_spill] sm:$0xff] }
 0x408   : > { %5623 = vst [vmem:[%s8080_s6 + $0x300] sm:$0xff] %v6453_v38  ;;  %v6457_v56 = vadd.f32 %v4518_v39, %v4197_v54  ;;  %v4520_v44 = vpop.f32.mrb[35].mxu0  ;;  %v4219_v32 = vadd.f32 %v11521_v19, %v10151_v12  ;;  %v11523_v39 = vld [vmem:[#allocation138_spill] sm:$0xff] }
 0x409   : > { %5624 = vst [vmem:[%s8080_s6 + $0x308] sm:$0xff] %v6455_v11  ;;  %v6459_v63 = vadd.f32 %v4520_v44, %v4199_v33  ;;  %5006 = vmatmul.mubr.bf16.gmra.mrb[88].mxu1 %v10361_v29  ;;  %v7620_v33 = vld [vmem:[#allocation2 + $0x220] ss:$24 sps:$4 sm:$0xff]  }
 0x40a   : > { %5629 = vst [vmem:[%s8080_s6 + $0x330] sm:$0xff] %v6457_v56  ;;  %5328 = vmatmul.mubr.bf16.gmra.mrb[88].mxu0 %v11510_v45  ;;  %5015 = vmatprep.mubr.bf16.mxu1 %v10366_v62  ;;  %v11522_v11 = vld [vmem:[#allocation156_spill] sm:$0xff]  ;;  %v11525_v44 = vld [vmem:[#allocation157_spill] sm:$0xff]  ;;  %v11526_v45 = vld [vmem:[#allocation158_spill] sm:$0xff] }
 0x40b   : > { %5630 = vst [vmem:[%s8080_s6 + $0x338] sm:$0xff] %v6459_v63  ;;  %5337 = vmatprep.mubr.bf16.mxu0 %v11511_v58  ;;  %v11524_v56 = vld [vmem:[#allocation136_spill] sm:$0xff]  ;;  %v4223_v63 = vadd.f32 %v11525_v44, %v10147_v18  ;;  %v4225_v58 = vadd.f32 %v11526_v45, %v10151_v12 }
 0x40d   : > { %v4524_v3 = vpop.f32.mrb[36].mxu0 }
 0x40e   : > { %v6461_v55 = vadd.f32 %v4524_v3, %v4203_v2  ;;  %v4526_v21 = vpop.f32.mrb[37].mxu0  ;;  %v11527_v2 = vld [vmem:[#allocation159_spill] sm:$0xff] }
 0x40f   : > { %v6463_v22 = vadd.f32 %v4526_v21, %v4205_v6  ;;  %v4528_v7 = vpop.f32.mrb[38].mxu0  ;;  %v4227_v60 = vadd.f32 %v11527_v2, %v10147_v18 }
 0x410   : > { %5635 = vst [vmem:[%s8080_s6 + $0x360] sm:$0xff] %v6461_v55  ;;  %v6465_v15 = vadd.f32 %v4528_v7, %v4207_v57  ;;  %v4530_v48 = vpop.f32.mrb[39].mxu0  ;;  %v4229_v57 = vadd.f32 %v11528_v1, %v10151_v12  ;;  %v11529_v7 = vld [vmem:[#allocation139_spill] sm:$0xff] }
 0x411   : > { %5636 = vst [vmem:[%s8080_s6 + $0x368] sm:$0xff] %v6463_v22  ;;  %v6467_v0 = vadd.f32 %v4530_v48, %v4209_v47  ;;  %5016 = vmatmul.mubr.bf16.gmra.mrb[92].mxu1 %v10381_v36  ;;  %v11531_v48 = vld [vmem:[#allocation162_spill] sm:$0xff] }
 0x412   : > { %5641 = vst [vmem:[%s8080_s6 + $0x390] sm:$0xff] %v6465_v15  ;;  %5338 = vmatmul.mubr.bf16.gmra.mrb[92].mxu0 %v11516_v8  ;;  %5025 = vmatprep.mubr.bf16.mxu1 %v10386_v43  ;;  %v11530_v15 = vld [vmem:[#allocation137_spill] sm:$0xff] }
 0x413   : > { %5642 = vst [vmem:[%s8080_s6 + $0x398] sm:$0xff] %v6467_v0  ;;  %5347 = vmatprep.mubr.bf16.mxu0 %v11517_v40  ;;  %v11532_v0 = vld [vmem:[#allocation164_spill] sm:$0xff]  ;;  %v11533_v40 = vld [vmem:[#allocation165_spill] sm:$0xff] }
 0x414   : > { %v4233_v8 = vadd.f32 %v11532_v0, %v10147_v18  ;;  %v4235_v30 = vadd.f32 %v11533_v40, %v10151_v12  ;;  %v11536_v18 = vld [vmem:[#allocation160_spill] sm:$0xff] }
 0x415   : > { %v4534_v35 = vpop.f32.mrb[40].mxu0  ;;  %v2237_v12 = vsub.s32 2, %v11536_v18 }
 0x416   : > { %v6469_v42 = vadd.f32 %v4534_v35, %v4213_v61  ;;  %v4536_v27 = vpop.f32.mrb[41].mxu0 }
 0x417   : > { %v6471_v24 = vadd.f32 %v4536_v27, %v4215_v37  ;;  %v4538_v54 = vpop.f32.mrb[42].mxu0  ;;  %v11535_v27 = vld [vmem:[#allocation167_spill] sm:$0xff] }
 0x418   : > { %5647 = vst [vmem:[%s8080_s6 + $0x3c0] sm:$0xff] %v6469_v42  ;;  %v6473_v38 = vadd.f32 %v4538_v54, %v4217_v23  ;;  %v4540_v20 = vpop.f32.mrb[43].mxu0  ;;  %v11534_v42 = vld [vmem:[#allocation166_spill] sm:$0xff] }
 0x419   : > { %5648 = vst [vmem:[%s8080_s6 + $0x3c8] sm:$0xff] %v6471_v24  ;;  %v6475_v4 = vadd.f32 %v4540_v20, %v4219_v32  ;;  %5026 = vmatmul.mubr.bf16.gmra.mrb[96].mxu1 %v7620_v33 }
 0x41a   : > { %5653 = vst [vmem:[%s8080_s6 + $0x3f0] sm:$0xff] %v6473_v38  ;;  %5348 = vmatmul.mubr.bf16.gmra.mrb[96].mxu0 %v11522_v11  ;;  %5035 = vmatprep.mubr.bf16.mxu1 %v11523_v39 }
 0x41b   : > { %5654 = vst [vmem:[%s8080_s6 + $0x3f8] sm:$0xff] %v6475_v4  ;;  %5357 = vmatprep.mubr.bf16.mxu0 %v11524_v56 }
 0x41d   : > { %v4544_v53 = vpop.f32.mrb[44].mxu0 }
 0x41e   : > { %v6477_v6 = vadd.f32 %v4544_v53, %v4223_v63  ;;  %v4546_v3 = vpop.f32.mrb[45].mxu0 }
 0x41f   : > { %v6479_v55 = vadd.f32 %v4546_v3, %v4225_v58  ;;  %v4548_v21 = vpop.f32.mrb[46].mxu0 }
 0x420   : > { %5659 = vst [vmem:[%s8080_s6 + $0x420] sm:$0xff] %v6477_v6  ;;  %v6481_v17 = vadd.f32 %v4548_v21, %v4227_v60  ;;  %v4550_v47 = vpop.f32.mrb[47].mxu0 }
 0x421   : > { %5660 = vst [vmem:[%s8080_s6 + $0x428] sm:$0xff] %v6479_v55  ;;  %v6483_v22 = vadd.f32 %v4550_v47, %v4229_v57  ;;  %5036 = vmatmul.mubr.bf16.gmra.mrb[100].mxu1 %v11529_v7 }
 0x422   : > { %5665 = vst [vmem:[%s8080_s6 + $0x450] sm:$0xff] %v6481_v17  ;;  %5358 = vmatmul.mubr.bf16.gmra.mrb[100].mxu0 %v11530_v15  ;;  %5468 = vmatprep.mubr.bf16.mxu1 %v10301_v49 }
 0x423   : > { %5666 = vst [vmem:[%s8080_s6 + $0x458] sm:$0xff] %v6483_v22  ;;  %5398 = vmatprep.mubr.bf16.mxu0 %v11531_v48 }
 0x425   : > { %v4554_v61 = vpop.f32.mrb[48].mxu0 }
 0x426   : > { %v6485_v51 = vadd.f32 %v4554_v61, %v4233_v8  ;;  %v4556_v37 = vpop.f32.mrb[49].mxu0 }
 0x427   : > { %v6487_v35 = vadd.f32 %v4556_v37, %v4235_v30  ;;  %v4558_v52 = vpop.f32.mrb[50].mxu0 }
 0x428   : > { %5671 = vst [vmem:[%s8080_s6 + $0x480] sm:$0xff] %v6485_v51  ;;  %v4559_v23 = vpop.f32.mrb[51].mxu0 }
 0x429   : > { %5672 = vst [vmem:[%s8080_s6 + $0x488] sm:$0xff] %v6487_v35  ;;  %5469 = vmatmul.mubr.bf16.vlgmr.msra.gmra.mrb[104].mxu1 %v10320_v46 }
 0x42a   : > { %5399 = vmatmul.mubr.bf16.vlgmr.msra.gmra.mrb[52].mxu0 %v11534_v42  ;;  %5478 = vmatprep.mubr.bf16.mxu1 %v10325_v9 }
 0x42b   : > { %5408 = vmatprep.mubr.bf16.mxu0 %v11535_v27 }
 0x431   : > { %5479 = vmatmul.mubr.bf16.gmra.mrb[108].mxu1 %v10341_v5 }
 0x432   : > { %5409 = vmatmul.mubr.bf16.gmra.mrb[56].mxu0 %v10176_v25  ;;  %5488 = vmatprep.mubr.bf16.mxu1 %v10346_v50  ;;  %v2241_v25 = vsub.s32 3, %v11536_v18 }
 0x433   : > { %5418 = vmatprep.mubr.bf16.mxu0 %v10181_v10  ;;  %v11537_v10 = vld [vmem:[#allocation163_spill] sm:$0xff] }
 0x439   : > { %5489 = vmatmul.mubr.bf16.gmra.mrb[112].mxu1 %v10361_v29 }
 0x43a   : > { %5419 = vmatmul.mubr.bf16.gmra.mrb[60].mxu0 %v10200_v28  ;;  %5498 = vmatprep.mubr.bf16.mxu1 %v10366_v62  ;;  %v10453_v28 = vrot.slane %v11537_v10, %v2237_v12 }
 0x43b   : > { %5428 = vmatprep.mubr.bf16.mxu0 %v10205_v41  ;;  %v10456_v41 = vrot.slane %v11537_v10, %v2241_v25 }
 0x441   : > { %5499 = vmatmul.mubr.bf16.gmra.mrb[116].mxu1 %v10381_v36 }
 0x442   : > { %5429 = vmatmul.mubr.bf16.gmra.mrb[64].mxu0 %v10224_v59  ;;  %5508 = vmatprep.mubr.bf16.mxu1 %v10386_v43 }
 0x443   : > { %5438 = vmatprep.mubr.bf16.mxu0 %v10229_v31 }
 0x449   : > { %5509 = vmatmul.mubr.bf16.gmra.mrb[120].mxu1 %v7620_v33 }
 0x44a   : > { %5439 = vmatmul.mubr.bf16.gmra.mrb[68].mxu0 %v10248_v34  ;;  %5518 = vmatprep.mubr.bf16.mxu1 %v11523_v39 }
 0x44b   : > { %5448 = vmatprep.mubr.bf16.mxu0 %v10253_v16 }
 0x451   : > { %5519 = vmatmul.mubr.bf16.gmra.mrb[124].mxu1 %v11529_v7 }
 0x452   : > { %5449 = vmatmul.mubr.bf16.gmra.mrb[72].mxu0 %v10272_v14 }
 0x453   : > { %5458 = vmatprep.mubr.bf16.mxu0 %v10277_v13 }
 0x45a   : > { %5459 = vmatmul.mubr.bf16.gmra.mrb[76].mxu0 %v10296_v26 }
 0x494   : > { %v4917_v59 = vpop.f32.mrb[52].mxu1 }
 0x495   : > { %v6488_v31 = vadd.f32 %v4917_v59, %v10453_v28  ;;  %v4919_v34 = vpop.f32.mrb[53].mxu1 }
 0x496   : > { %v6489_v16 = vadd.f32 %v4919_v34, %v10456_v41  ;;  %v4921_v14 = vpop.f32.mrb[54].mxu1 }
 0x497   : > { %5529 = vst [vmem:[%s8080_s6 + $0x10] sm:$0xff] %v6488_v31  ;;  %v6490_v13 = vadd.f32 %v4921_v14, %v10453_v28  ;;  %v4923_v26 = vpop.f32.mrb[55].mxu1 }
 0x498   : > { %5530 = vst [vmem:[%s8080_s6 + $0x18] sm:$0xff] %v6489_v16  ;;  %v6491_v49 = vadd.f32 %v4923_v26, %v10456_v41 }
 0x499   : > { %5535 = vst [vmem:[%s8080_s6 + $0x40] sm:$0xff] %v6490_v13 }
 0x49a   : > { %5536 = vst [vmem:[%s8080_s6 + $0x48] sm:$0xff] %v6491_v49 }
 0x49c   : > { %v4927_v46 = vpop.f32.mrb[56].mxu1 }
 0x49d   : > { %v6492_v9 = vadd.f32 %v4927_v46, %v10453_v28  ;;  %v4929_v5 = vpop.f32.mrb[57].mxu1 }
 0x49e   : > { %v6493_v50 = vadd.f32 %v4929_v5, %v10456_v41  ;;  %v4931_v29 = vpop.f32.mrb[58].mxu1 }
 0x49f   : > { %5541 = vst [vmem:[%s8080_s6 + $0x70] sm:$0xff] %v6492_v9  ;;  %v6494_v62 = vadd.f32 %v4931_v29, %v10453_v28  ;;  %v4933_v36 = vpop.f32.mrb[59].mxu1 }
 0x4a0   : > { %5542 = vst [vmem:[%s8080_s6 + $0x78] sm:$0xff] %v6493_v50  ;;  %v6495_v43 = vadd.f32 %v4933_v36, %v10456_v41 }
 0x4a1   : > { %5547 = vst [vmem:[%s8080_s6 + $0xa0] sm:$0xff] %v6494_v62 }
 0x4a2   : > { %5548 = vst [vmem:[%s8080_s6 + $0xa8] sm:$0xff] %v6495_v43 }
 0x4a4   : > { %v4937_v19 = vpop.f32.mrb[60].mxu1 }
 0x4a5   : > { %v6496_v32 = vadd.f32 %v4937_v19, %v10453_v28  ;;  %v4939_v24 = vpop.f32.mrb[61].mxu1 }
 0x4a6   : > { %v6497_v54 = vadd.f32 %v4939_v24, %v10456_v41  ;;  %v4941_v38 = vpop.f32.mrb[62].mxu1 }
 0x4a7   : > { %5553 = vst [vmem:[%s8080_s6 + $0xd0] sm:$0xff] %v6496_v32  ;;  %v6498_v20 = vadd.f32 %v4941_v38, %v10453_v28  ;;  %v4943_v4 = vpop.f32.mrb[63].mxu1 }
 0x4a8   : > { %5554 = vst [vmem:[%s8080_s6 + $0xd8] sm:$0xff] %v6497_v54  ;;  %v6499_v33 = vadd.f32 %v4943_v4, %v10456_v41 }
 0x4a9   : > { %5559 = vst [vmem:[%s8080_s6 + $0x100] sm:$0xff] %v6498_v20 }
 0x4aa   : > { %5560 = vst [vmem:[%s8080_s6 + $0x108] sm:$0xff] %v6499_v33 }
 0x4ac   : > { %v4947_v11 = vpop.f32.mrb[64].mxu1 }
 0x4ad   : > { %v6500_v39 = vadd.f32 %v4947_v11, %v10453_v28  ;;  %v4949_v56 = vpop.f32.mrb[65].mxu1 }
 0x4ae   : > { %v6501_v44 = vadd.f32 %v4949_v56, %v10456_v41  ;;  %v4951_v63 = vpop.f32.mrb[66].mxu1 }
 0x4af   : > { %5565 = vst [vmem:[%s8080_s6 + $0x130] sm:$0xff] %v6500_v39  ;;  %v6502_v45 = vadd.f32 %v4951_v63, %v10453_v28  ;;  %v4953_v58 = vpop.f32.mrb[67].mxu1 }
 0x4b0   : > { %5566 = vst [vmem:[%s8080_s6 + $0x138] sm:$0xff] %v6501_v44  ;;  %v6503_v53 = vadd.f32 %v4953_v58, %v10456_v41 }
 0x4b1   : > { %5571 = vst [vmem:[%s8080_s6 + $0x160] sm:$0xff] %v6502_v45 }
 0x4b2   : > { %5572 = vst [vmem:[%s8080_s6 + $0x168] sm:$0xff] %v6503_v53 }
 0x4b4   : > { %v4957_v2 = vpop.f32.mrb[68].mxu1 }
 0x4b5   : > { %v6504_v60 = vadd.f32 %v4957_v2, %v10453_v28  ;;  %v4959_v6 = vpop.f32.mrb[69].mxu1 }
 0x4b6   : > { %v6505_v3 = vadd.f32 %v4959_v6, %v10456_v41  ;;  %v4961_v1 = vpop.f32.mrb[70].mxu1 }
 0x4b7   : > { %5577 = vst [vmem:[%s8080_s6 + $0x190] sm:$0xff] %v6504_v60  ;;  %v6506_v57 = vadd.f32 %v4961_v1, %v10453_v28  ;;  %v4963_v55 = vpop.f32.mrb[71].mxu1 }
 0x4b8   : > { %5578 = vst [vmem:[%s8080_s6 + $0x198] sm:$0xff] %v6505_v3  ;;  %v6507_v21 = vadd.f32 %v4963_v55, %v10456_v41 }
 0x4b9   : > { %5583 = vst [vmem:[%s8080_s6 + $0x1c0] sm:$0xff] %v6506_v57 }
 0x4ba   : > { %5584 = vst [vmem:[%s8080_s6 + $0x1c8] sm:$0xff] %v6507_v21 }
 0x4bc   : > { %v4967_v17 = vpop.f32.mrb[72].mxu1 }
 0x4bd   : > { %v6508_v47 = vadd.f32 %v4967_v17, %v10453_v28  ;;  %v4969_v22 = vpop.f32.mrb[73].mxu1 }
 0x4be   : > { %v6509_v7 = vadd.f32 %v4969_v22, %v10456_v41  ;;  %v4971_v15 = vpop.f32.mrb[74].mxu1 }
 0x4bf   : > { %5589 = vst [vmem:[%s8080_s6 + $0x1f0] sm:$0xff] %v6508_v47  ;;  %v6510_v48 = vadd.f32 %v4971_v15, %v10453_v28  ;;  %v4973_v0 = vpop.f32.mrb[75].mxu1 }
 0x4c0   : > { %5590 = vst [vmem:[%s8080_s6 + $0x1f8] sm:$0xff] %v6509_v7  ;;  %v6511_v8 = vadd.f32 %v4973_v0, %v10456_v41 }
 0x4c1   : > { %5595 = vst [vmem:[%s8080_s6 + $0x220] sm:$0xff] %v6510_v48 }
 0x4c2   : > { %5596 = vst [vmem:[%s8080_s6 + $0x228] sm:$0xff] %v6511_v8 }
 0x4c4   : > { %v4977_v40 = vpop.f32.mrb[76].mxu1 }
 0x4c5   : > { %v6512_v30 = vadd.f32 %v4977_v40, %v10453_v28  ;;  %v4979_v61 = vpop.f32.mrb[77].mxu1 }
 0x4c6   : > { %v6513_v51 = vadd.f32 %v4979_v61, %v10456_v41  ;;  %v4981_v37 = vpop.f32.mrb[78].mxu1 }
 0x4c7   : > { %5601 = vst [vmem:[%s8080_s6 + $0x250] sm:$0xff] %v6512_v30  ;;  %v6514_v35 = vadd.f32 %v4981_v37, %v10453_v28  ;;  %v4983_v52 = vpop.f32.mrb[79].mxu1 }
 0x4c8   : > { %5602 = vst [vmem:[%s8080_s6 + $0x258] sm:$0xff] %v6513_v51  ;;  %v6515_v23 = vadd.f32 %v4983_v52, %v10456_v41 }
 0x4c9   : > { %5607 = vst [vmem:[%s8080_s6 + $0x280] sm:$0xff] %v6514_v35 }
 0x4ca   : > { %5608 = vst [vmem:[%s8080_s6 + $0x288] sm:$0xff] %v6515_v23  ;;  %v2245_v23 = vsub.s32 4, %v11536_v18 }
 0x4cc   : > { %v4987_v42 = vpop.f32.mrb[80].mxu1 }
 0x4cd   : > { %v10514_v27 = vpop.f32.mrb[80].mxu0  ;;  %v6516_v12 = vadd.f32 %v4987_v42, %v10453_v28  ;;  %v4989_v25 = vpop.f32.mrb[81].mxu1  ;;  %v2249_v42 = vsub.s32 5, %v11536_v18 }
 0x4ce   : > { %v10517_v10 = vpop.f32.mrb[81].mxu0  ;;  %v6517_v59 = vadd.f32 %v4989_v25, %v10456_v41  ;;  %v4991_v31 = vpop.f32.mrb[82].mxu1 }
 0x4cf   : > { %v10520_v34 = vpop.f32.mrb[82].mxu0  ;;  %5613 = vst [vmem:[%s8080_s6 + $0x2b0] sm:$0xff] %v6516_v12  ;;  %v6518_v16 = vadd.f32 %v4991_v31, %v10453_v28  ;;  %v4993_v14 = vpop.f32.mrb[83].mxu1 }
 0x4d0   : > { %v10524_v13 = vpop.f32.mrb[83].mxu0  ;;  %5614 = vst [vmem:[%s8080_s6 + $0x2b8] sm:$0xff] %v6517_v59  ;;  %v6519_v26 = vadd.f32 %v4993_v14, %v10456_v41 }
 0x4d1   : > { %5619 = vst [vmem:[%s8080_s6 + $0x2e0] sm:$0xff] %v6518_v16 }
 0x4d2   : > { %5620 = vst [vmem:[%s8080_s6 + $0x2e8] sm:$0xff] %v6519_v26 }
 0x4d4   : > { %v4997_v49 = vpop.f32.mrb[84].mxu1 }
 0x4d5   : > { %v10530_v46 = vpop.f32.mrb[84].mxu0  ;;  %v6520_v9 = vadd.f32 %v4997_v49, %v10453_v28  ;;  %v4999_v5 = vpop.f32.mrb[85].mxu1 }
 0x4d6   : > { %v10533_v50 = vpop.f32.mrb[85].mxu0  ;;  %v6521_v29 = vadd.f32 %v4999_v5, %v10456_v41  ;;  %v5001_v62 = vpop.f32.mrb[86].mxu1 }
 0x4d7   : > { %v10536_v36 = vpop.f32.mrb[86].mxu0  ;;  %5625 = vst [vmem:[%s8080_s6 + $0x310] sm:$0xff] %v6520_v9  ;;  %v6522_v43 = vadd.f32 %v5001_v62, %v10453_v28  ;;  %v5003_v19 = vpop.f32.mrb[87].mxu1  ;;  %v7621_v9 = vld [vmem:[%s8078_s26] sm:$0x3f] }
 0x4d8   : > { %v10540_v32 = vpop.f32.mrb[87].mxu0  ;;  %5626 = vst [vmem:[%s8080_s6 + $0x318] sm:$0xff] %v6521_v29  ;;  %v6523_v24 = vadd.f32 %v5003_v19, %v10456_v41  ;;  %v10603_v5 = vrot.slane %v7621_v9, %v2245_v23 }
 0x4d9   : > { %5631 = vst [vmem:[%s8080_s6 + $0x340] sm:$0xff] %v6522_v43  ;;  %v10606_v43 = vrot.slane %v7621_v9, %v2249_v42 }
 0x4da   : > { %5632 = vst [vmem:[%s8080_s6 + $0x348] sm:$0xff] %v6523_v24  ;;  %v6566_v18 = vadd.f32 %v10514_v27, %v10603_v5  ;;  %v6570_v24 = vadd.f32 %v10520_v34, %v10603_v5 }
 0x4dc   : > { %v5007_v54 = vpop.f32.mrb[88].mxu1 }
 0x4dd   : > { %v10546_v38 = vpop.f32.mrb[88].mxu0  ;;  %v6524_v20 = vadd.f32 %v5007_v54, %v10453_v28  ;;  %v5009_v4 = vpop.f32.mrb[89].mxu1 }
 0x4de   : > { %v10549_v33 = vpop.f32.mrb[89].mxu0  ;;  %v6525_v11 = vadd.f32 %v5009_v4, %v10456_v41  ;;  %v5011_v39 = vpop.f32.mrb[90].mxu1 }
 0x4df   : > { %v10552_v56 = vpop.f32.mrb[90].mxu0  ;;  %5637 = vst [vmem:[%s8080_s6 + $0x370] sm:$0xff] %v6524_v20  ;;  %v6526_v44 = vadd.f32 %v5011_v39, %v10453_v28  ;;  %v5013_v63 = vpop.f32.mrb[91].mxu1  ;;  %v6572_v39 = vadd.f32 %v10524_v13, %v10606_v43 }
 0x4e0   : > { %v10556_v45 = vpop.f32.mrb[91].mxu0  ;;  %5638 = vst [vmem:[%s8080_s6 + $0x378] sm:$0xff] %v6525_v11  ;;  %v6527_v58 = vadd.f32 %v5013_v63, %v10456_v41 }
 0x4e1   : > { %5643 = vst [vmem:[%s8080_s6 + $0x3a0] sm:$0xff] %v6526_v44 }
 0x4e2   : > { %5644 = vst [vmem:[%s8080_s6 + $0x3a8] sm:$0xff] %v6527_v58 }
 0x4e4   : > { %v5017_v53 = vpop.f32.mrb[92].mxu1 }
 0x4e5   : > { %v10562_v2 = vpop.f32.mrb[92].mxu0  ;;  %v6528_v60 = vadd.f32 %v5017_v53, %v10453_v28  ;;  %v5019_v6 = vpop.f32.mrb[93].mxu1 }
 0x4e6   : > { %v10565_v3 = vpop.f32.mrb[93].mxu0  ;;  %v6529_v1 = vadd.f32 %v5019_v6, %v10456_v41  ;;  %v5021_v57 = vpop.f32.mrb[94].mxu1 }
 0x4e7   : > { %v10568_v55 = vpop.f32.mrb[94].mxu0  ;;  %5649 = vst [vmem:[%s8080_s6 + $0x3d0] sm:$0xff] %v6528_v60  ;;  %v6530_v21 = vadd.f32 %v5021_v57, %v10453_v28  ;;  %v5023_v17 = vpop.f32.mrb[95].mxu1  ;;  %v6576_v57 = vadd.f32 %v10533_v50, %v10606_v43 }
 0x4e8   : > { %v10572_v47 = vpop.f32.mrb[95].mxu0  ;;  %5650 = vst [vmem:[%s8080_s6 + $0x3d8] sm:$0xff] %v6529_v1  ;;  %v6531_v22 = vadd.f32 %v5023_v17, %v10456_v41  ;;  %v6574_v1 = vadd.f32 %v10530_v46, %v10603_v5 }
 0x4e9   : > { %5655 = vst [vmem:[%s8080_s6 + $0x400] sm:$0xff] %v6530_v21 }
 0x4ea   : > { %5656 = vst [vmem:[%s8080_s6 + $0x408] sm:$0xff] %v6531_v22  ;;  %v6578_v22 = vadd.f32 %v10536_v36, %v10603_v5 }
 0x4ec   : > { %v5027_v7 = vpop.f32.mrb[96].mxu1 }
 0x4ed   : > { %v10578_v15 = vpop.f32.mrb[96].mxu0  ;;  %v6532_v48 = vadd.f32 %v5027_v7, %v10453_v28  ;;  %v5029_v0 = vpop.f32.mrb[97].mxu1 }
 0x4ee   : > { %v10581_v8 = vpop.f32.mrb[97].mxu0  ;;  %v6533_v40 = vadd.f32 %v5029_v0, %v10456_v41  ;;  %v5031_v30 = vpop.f32.mrb[98].mxu1 }
 0x4ef   : > { %v10584_v61 = vpop.f32.mrb[98].mxu0  ;;  %5661 = vst [vmem:[%s8080_s6 + $0x430] sm:$0xff] %v6532_v48  ;;  %v6534_v51 = vadd.f32 %v5031_v30, %v10453_v28  ;;  %v5033_v37 = vpop.f32.mrb[99].mxu1  ;;  %v6580_v30 = vadd.f32 %v10540_v32, %v10606_v43 }
 0x4f0   : > { %v10588_v35 = vpop.f32.mrb[99].mxu0  ;;  %5662 = vst [vmem:[%s8080_s6 + $0x438] sm:$0xff] %v6533_v40  ;;  %v6535_v52 = vadd.f32 %v5033_v37, %v10456_v41 }
 0x4f1   : > { %5667 = vst [vmem:[%s8080_s6 + $0x460] sm:$0xff] %v6534_v51 }
 0x4f2   : > { %5668 = vst [vmem:[%s8080_s6 + $0x468] sm:$0xff] %v6535_v52 }
 0x4f4   : > { %v5037_v12 = vpop.f32.mrb[100].mxu1 }
 0x4f5   : > { %v10596_v25 = vpop.f32.mrb[100].mxu0  ;;  %v6536_v59 = vadd.f32 %v5037_v12, %v10453_v28  ;;  %v5039_v31 = vpop.f32.mrb[101].mxu1  ;;  %v6568_v28 = vadd.f32 %v10517_v10, %v10606_v43 }
 0x4f6   : > { %v10599_v16 = vpop.f32.mrb[101].mxu0  ;;  %v6537_v14 = vadd.f32 %v5039_v31, %v10456_v41  ;;  %v5041_v26 = vpop.f32.mrb[102].mxu1  ;;  %v6584_v31 = vadd.f32 %v10549_v33, %v10606_v43 }
 0x4f7   : > { %v5363_v49 = vpop.f32.mrb[102].mxu0  ;;  %5673 = vst [vmem:[%s8080_s6 + $0x490] sm:$0xff] %v6536_v59  ;;  %v5042_v29 = vpop.f32.mrb[103].mxu1  ;;  %v6582_v59 = vadd.f32 %v10546_v38, %v10603_v5 }
 0x4f8   : > { %v5364_v62 = vpop.f32.mrb[103].mxu0  ;;  %5674 = vst [vmem:[%s8080_s6 + $0x498] sm:$0xff] %v6537_v14  ;;  %v6586_v49 = vadd.f32 %v10552_v56, %v10603_v5 }
 0x4fc   : > { %v5470_v19 = vpop.f32.mrb[104].mxu1 }
 0x4fd   : > { %v5400_v41 = vpop.f32.mrb[52].mxu0  ;;  %v6567_v20 = vadd.f32 %v6566_v18, %v5470_v19  ;;  %v5472_v11 = vpop.f32.mrb[105].mxu1 }
 0x4fe   : > { %v6538_v54 = vadd.f32 %v5400_v41, %v10603_v5  ;;  %v5402_v4 = vpop.f32.mrb[53].mxu0  ;;  %v6569_v10 = vadd.f32 %v6568_v28, %v5472_v11  ;;  %v5474_v63 = vpop.f32.mrb[106].mxu1  ;;  %v6588_v28 = vadd.f32 %v10556_v45, %v10606_v43  ;;  %v6590_v11 = vadd.f32 %v10562_v2, %v10603_v5 }
 0x4ff   : > { %v6539_v27 = vadd.f32 %v5402_v4, %v10606_v43  ;;  %v5404_v44 = vpop.f32.mrb[54].mxu0  ;;  %5615 = vst [vmem:[%s8080_s6 + $0x2c0] sm:$0xff] %v6567_v20  ;;  %v6571_v58 = vadd.f32 %v6570_v24, %v5474_v63  ;;  %v5476_v60 = vpop.f32.mrb[107].mxu1 }
 0x500   : > { %5531 = vst [vmem:[%s8080_s6 + $0x20] sm:$0xff] %v6538_v54  ;;  %v6540_v34 = vadd.f32 %v5404_v44, %v10603_v5  ;;  %v5406_v53 = vpop.f32.mrb[55].mxu0  ;;  %5616 = vst [vmem:[%s8080_s6 + $0x2c8] sm:$0xff] %v6569_v10  ;;  %v6573_v13 = vadd.f32 %v6572_v39, %v5476_v60  ;;  %v6592_v39 = vadd.f32 %v10565_v3, %v10606_v43 }
 0x501   : > { %5532 = vst [vmem:[%s8080_s6 + $0x28] sm:$0xff] %v6539_v27  ;;  %v6541_v6 = vadd.f32 %v5406_v53, %v10606_v43  ;;  %5621 = vst [vmem:[%s8080_s6 + $0x2f0] sm:$0xff] %v6571_v58  ;;  %v6594_v44 = vadd.f32 %v10568_v55, %v10603_v5  ;;  %v6596_v60 = vadd.f32 %v10572_v47, %v10606_v43 }
 0x502   : > { %5537 = vst [vmem:[%s8080_s6 + $0x50] sm:$0xff] %v6540_v34  ;;  %5622 = vst [vmem:[%s8080_s6 + $0x2f8] sm:$0xff] %v6573_v13 }
 0x503   : > { %5538 = vst [vmem:[%s8080_s6 + $0x58] sm:$0xff] %v6541_v6 }
 0x504   : > { %v5480_v17 = vpop.f32.mrb[108].mxu1 }
 0x505   : > { %v5410_v21 = vpop.f32.mrb[56].mxu0  ;;  %v6575_v48 = vadd.f32 %v6574_v1, %v5480_v17  ;;  %v5482_v40 = vpop.f32.mrb[109].mxu1 }
 0x506   : > { %v6542_v7 = vadd.f32 %v5410_v21, %v10603_v5  ;;  %v5412_v0 = vpop.f32.mrb[57].mxu0  ;;  %v6577_v50 = vadd.f32 %v6576_v57, %v5482_v40  ;;  %v5484_v37 = vpop.f32.mrb[110].mxu1  ;;  %v6602_v40 = vadd.f32 %v10584_v61, %v10603_v5 }
 0x507   : > { %v6543_v46 = vadd.f32 %v5412_v0, %v10606_v43  ;;  %v5414_v51 = vpop.f32.mrb[58].mxu0  ;;  %5627 = vst [vmem:[%s8080_s6 + $0x320] sm:$0xff] %v6575_v48  ;;  %v6579_v52 = vadd.f32 %v6578_v22, %v5484_v37  ;;  %v5486_v42 = vpop.f32.mrb[111].mxu1  ;;  %v6598_v22 = vadd.f32 %v10578_v15, %v10603_v5  ;;  %v6604_v37 = vadd.f32 %v10588_v35, %v10606_v43 }
 0x508   : > { %5543 = vst [vmem:[%s8080_s6 + $0x80] sm:$0xff] %v6542_v7  ;;  %v6544_v36 = vadd.f32 %v5414_v51, %v10603_v5  ;;  %v5416_v23 = vpop.f32.mrb[59].mxu0  ;;  %5628 = vst [vmem:[%s8080_s6 + $0x328] sm:$0xff] %v6577_v50  ;;  %v6581_v32 = vadd.f32 %v6580_v30, %v5486_v42  ;;  %v6600_v7 = vadd.f32 %v10581_v8, %v10606_v43 }
 0x509   : > { %5544 = vst [vmem:[%s8080_s6 + $0x88] sm:$0xff] %v6543_v46  ;;  %v6545_v12 = vadd.f32 %v5416_v23, %v10606_v43  ;;  %5633 = vst [vmem:[%s8080_s6 + $0x350] sm:$0xff] %v6579_v52 }
 0x50a   : > { %5549 = vst [vmem:[%s8080_s6 + $0xb0] sm:$0xff] %v6544_v36  ;;  %5634 = vst [vmem:[%s8080_s6 + $0x358] sm:$0xff] %v6581_v32 }
 0x50b   : > { %5550 = vst [vmem:[%s8080_s6 + $0xb8] sm:$0xff] %v6545_v12 }
 0x50c   : > { %v5490_v26 = vpop.f32.mrb[112].mxu1 }
 0x50d   : > { %v5420_v14 = vpop.f32.mrb[60].mxu0  ;;  %v6583_v29 = vadd.f32 %v6582_v59, %v5490_v26  ;;  %v5492_v18 = vpop.f32.mrb[113].mxu1  ;;  %v6606_v59 = vadd.f32 %v10596_v25, %v10603_v5 }
 0x50e   : > { %v6546_v9 = vadd.f32 %v5420_v14, %v10603_v5  ;;  %v5422_v62 = vpop.f32.mrb[61].mxu0  ;;  %v6585_v33 = vadd.f32 %v6584_v31, %v5492_v18  ;;  %v5494_v19 = vpop.f32.mrb[114].mxu1  ;;  %v6608_v31 = vadd.f32 %v10599_v16, %v10606_v43 }
 0x50f   : > { %v6547_v38 = vadd.f32 %v5422_v62, %v10606_v43  ;;  %v5424_v41 = vpop.f32.mrb[62].mxu0  ;;  %5639 = vst [vmem:[%s8080_s6 + $0x380] sm:$0xff] %v6583_v29  ;;  %v6587_v24 = vadd.f32 %v6586_v49, %v5494_v19  ;;  %v5496_v20 = vpop.f32.mrb[115].mxu1 }
 0x510   : > { %5555 = vst [vmem:[%s8080_s6 + $0xe0] sm:$0xff] %v6546_v9  ;;  %v6548_v56 = vadd.f32 %v5424_v41, %v10603_v5  ;;  %v5426_v54 = vpop.f32.mrb[63].mxu0  ;;  %5640 = vst [vmem:[%s8080_s6 + $0x388] sm:$0xff] %v6585_v33  ;;  %v6589_v45 = vadd.f32 %v6588_v28, %v5496_v20 }
 0x511   : > { %5556 = vst [vmem:[%s8080_s6 + $0xe8] sm:$0xff] %v6547_v38  ;;  %v6549_v4 = vadd.f32 %v5426_v54, %v10606_v43  ;;  %5645 = vst [vmem:[%s8080_s6 + $0x3b0] sm:$0xff] %v6587_v24 }
 0x512   : > { %5561 = vst [vmem:[%s8080_s6 + $0x110] sm:$0xff] %v6548_v56  ;;  %5646 = vst [vmem:[%s8080_s6 + $0x3b8] sm:$0xff] %v6589_v45 }
 0x513   : > { %5562 = vst [vmem:[%s8080_s6 + $0x118] sm:$0xff] %v6549_v4 }
 0x514   : > { %v5500_v10 = vpop.f32.mrb[116].mxu1 }
 0x515   : > { %v5430_v27 = vpop.f32.mrb[64].mxu0  ;;  %v6591_v34 = vadd.f32 %v6590_v11, %v5500_v10  ;;  %v5502_v53 = vpop.f32.mrb[117].mxu1 }
 0x516   : > { %v6550_v63 = vadd.f32 %v5430_v27, %v10603_v5  ;;  %v5432_v58 = vpop.f32.mrb[65].mxu0  ;;  %v6593_v3 = vadd.f32 %v6592_v39, %v5502_v53  ;;  %v5504_v13 = vpop.f32.mrb[118].mxu1 }
 0x517   : > { %v6551_v2 = vadd.f32 %v5432_v58, %v10606_v43  ;;  %v5434_v6 = vpop.f32.mrb[66].mxu0  ;;  %5651 = vst [vmem:[%s8080_s6 + $0x3e0] sm:$0xff] %v6591_v34  ;;  %v6595_v1 = vadd.f32 %v6594_v44, %v5504_v13  ;;  %v5506_v21 = vpop.f32.mrb[119].mxu1 }
 0x518   : > { %5567 = vst [vmem:[%s8080_s6 + $0x140] sm:$0xff] %v6550_v63  ;;  %v6552_v55 = vadd.f32 %v5434_v6, %v10603_v5  ;;  %v5436_v57 = vpop.f32.mrb[67].mxu0  ;;  %5652 = vst [vmem:[%s8080_s6 + $0x3e8] sm:$0xff] %v6593_v3  ;;  %v6597_v47 = vadd.f32 %v6596_v60, %v5506_v21 }
 0x519   : > { %5568 = vst [vmem:[%s8080_s6 + $0x148] sm:$0xff] %v6551_v2  ;;  %v6553_v17 = vadd.f32 %v5436_v57, %v10606_v43  ;;  %5657 = vst [vmem:[%s8080_s6 + $0x410] sm:$0xff] %v6595_v1 }
 0x51a   : > { %5573 = vst [vmem:[%s8080_s6 + $0x170] sm:$0xff] %v6552_v55  ;;  %5658 = vst [vmem:[%s8080_s6 + $0x418] sm:$0xff] %v6597_v47 }
 0x51b   : > { %5574 = vst [vmem:[%s8080_s6 + $0x178] sm:$0xff] %v6553_v17 }
 0x51c   : > { %v5510_v0 = vpop.f32.mrb[120].mxu1 }
 0x51d   : > { %v5440_v48 = vpop.f32.mrb[68].mxu0  ;;  %v6599_v46 = vadd.f32 %v6598_v22, %v5510_v0  ;;  %v5512_v51 = vpop.f32.mrb[121].mxu1 }
 0x51e   : > { %v6554_v30 = vadd.f32 %v5440_v48, %v10603_v5  ;;  %v5442_v50 = vpop.f32.mrb[69].mxu0  ;;  %v6601_v8 = vadd.f32 %v6600_v7, %v5512_v51  ;;  %v5514_v52 = vpop.f32.mrb[122].mxu1 }
 0x51f   : > { %v6555_v15 = vadd.f32 %v5442_v50, %v10606_v43  ;;  %v5444_v36 = vpop.f32.mrb[70].mxu0  ;;  %5663 = vst [vmem:[%s8080_s6 + $0x440] sm:$0xff] %v6599_v46  ;;  %v6603_v23 = vadd.f32 %v6602_v40, %v5514_v52  ;;  %v5516_v12 = vpop.f32.mrb[123].mxu1 }
 0x520   : > { %5579 = vst [vmem:[%s8080_s6 + $0x1a0] sm:$0xff] %v6554_v30  ;;  %v6556_v61 = vadd.f32 %v5444_v36, %v10603_v5  ;;  %v5446_v42 = vpop.f32.mrb[71].mxu0  ;;  %5664 = vst [vmem:[%s8080_s6 + $0x448] sm:$0xff] %v6601_v8  ;;  %v6605_v32 = vadd.f32 %v6604_v37, %v5516_v12 }
 0x521   : > { %5580 = vst [vmem:[%s8080_s6 + $0x1a8] sm:$0xff] %v6555_v15  ;;  %v6557_v35 = vadd.f32 %v5446_v42, %v10606_v43  ;;  %5669 = vst [vmem:[%s8080_s6 + $0x470] sm:$0xff] %v6603_v23 }
 0x522   : > { %5585 = vst [vmem:[%s8080_s6 + $0x1d0] sm:$0xff] %v6556_v61  ;;  %5670 = vst [vmem:[%s8080_s6 + $0x478] sm:$0xff] %v6605_v32 }
 0x523   : > { %5586 = vst [vmem:[%s8080_s6 + $0x1d8] sm:$0xff] %v6557_v35 }
 0x524   : > { %v5520_v26 = vpop.f32.mrb[124].mxu1 }
 0x525   : > { %v5450_v14 = vpop.f32.mrb[72].mxu0  ;;  %v6607_v9 = vadd.f32 %v6606_v59, %v5520_v26  ;;  %v5522_v62 = vpop.f32.mrb[125].mxu1 }
 0x526   : > { %v6558_v49 = vadd.f32 %v5450_v14, %v10603_v5  ;;  %v5452_v29 = vpop.f32.mrb[73].mxu0  ;;  %v6609_v28 = vadd.f32 %v6608_v31, %v5522_v62  ;;  %v5524_v38 = vpop.f32.mrb[126].mxu1 }
 0x527   : > { %v6559_v18 = vadd.f32 %v5452_v29, %v10606_v43  ;;  %v5454_v25 = vpop.f32.mrb[74].mxu0  ;;  %5675 = vst [vmem:[%s8080_s6 + $0x4a0] sm:$0xff] %v6607_v9  ;;  %v5525_v41 = vpop.f32.mrb[127].mxu1 }
 0x528   : > { %5591 = vst [vmem:[%s8080_s6 + $0x200] sm:$0xff] %v6558_v49  ;;  %v6560_v16 = vadd.f32 %v5454_v25, %v10603_v5  ;;  %v5456_v33 = vpop.f32.mrb[75].mxu0  ;;  %5676 = vst [vmem:[%s8080_s6 + $0x4a8] sm:$0xff] %v6609_v28 }
 0x529   : > { %5592 = vst [vmem:[%s8080_s6 + $0x208] sm:$0xff] %v6559_v18  ;;  %v6561_v19 = vadd.f32 %v5456_v33, %v10606_v43 }
 0x52a   : > { %5597 = vst [vmem:[%s8080_s6 + $0x230] sm:$0xff] %v6560_v16 }
 0x52b   : > { %5598 = vst [vmem:[%s8080_s6 + $0x238] sm:$0xff] %v6561_v19 }
 0x52d   : > { %v5460_v56 = vpop.f32.mrb[76].mxu0 }
 0x52e   : > { %v6562_v24 = vadd.f32 %v5460_v56, %v10603_v5  ;;  %v5462_v54 = vpop.f32.mrb[77].mxu0 }
 0x52f   : > { %v6563_v20 = vadd.f32 %v5462_v54, %v10606_v43  ;;  %v5464_v4 = vpop.f32.mrb[78].mxu0 }
 0x530   : > { %5603 = vst [vmem:[%s8080_s6 + $0x260] sm:$0xff] %v6562_v24  ;;  %v6564_v45 = vadd.f32 %v5464_v4, %v10603_v5  ;;  %v5466_v11 = vpop.f32.mrb[79].mxu0 }
 0x531   : > { %5604 = vst [vmem:[%s8080_s6 + $0x268] sm:$0xff] %v6563_v20  ;;  %v6565_v39 = vadd.f32 %v5466_v11, %v10606_v43 }
 0x532   : > { %5609 = vst [vmem:[%s8080_s6 + $0x290] sm:$0xff] %v6564_v45 }
 0x533   : > { %5610 = vst [vmem:[%s8080_s6 + $0x298] sm:$0xff] %v6565_v39 }
 0x534   : > { %7723 = shalt.err (!%p7720_p10)
}
 0x535   : > { %s7724_s20 = scalar_lea.hbm %s10731_s4, 19200  ;;  %s7728_s27 = scalar_lea.hbm %s10796_s3, 76800 }
 0x536   : > { %p7725_p13 = scmp.ne.s32.totalorder %s10731_s4, %s7724_s20  ;;  %p7729_p3 = scmp.lt.u32.totalorder %s10731_s4, %s10796_s3 }
 0x537   : > { %p7730_p2 = scmp.lt.u32.totalorder %s7728_s27, %s7724_s20  ;;  %p7732_p6 = scmp.lt.u32.totalorder %s7724_s20, %s10731_s4 }
 0x538   : > { %p7726_p7 = pnand %p7725_p13, %p11538_p1 }
 0x539   : > { %p7731_p4 = por %p7730_p2, %p7729_p3 }
 0x53a   : > { %p7727_p11 = pneg %p7726_p7 }
 0x53b   : > { %p7733_p12 = por %p7732_p6, %p7731_p4 }
 0x53d   : > { %p7734_p0 = pnand %p7733_p12, %p7727_p11 }
 0x53f   : > { %7737 = shalt.err (!%p7734_p0)
}
 0x540   : > { %s7823_s26 = smov 768   ;;  %s7824_s6 = smov 3072  }
 0x541   : > { %s7825_s25 = smov 48  }
 0x542   : > { %6859 = dma.vmem_to_hbm [thread:$0]  (%p11538_p1), %s10735_s23, 19200, %s10731_s4, %s5678_s21, %s7823_s26, %s7824_s6, %s7825_s25  }
 0x543 PF: > { %p6879_p9 = scmp.ge.s32.totalorder %s7812_s19, 2  ;;  %s5708_s16 = sand.u32 1, %s7784_s12  }
 0x544   : > { %p11539_p5 = scmp.ne.s32.totalorder %s11046_s10, 0  ;;  %s5709_s5 = scalar_lea.sflag [#allocation5], %s5708_s16 }
 0x546   : > { %p6873_p8 = pnand %p6879_p9, %p11539_p5 }
 0x548   : > { %7779 = dma.done.wait (!%p6873_p8), %s5709_s5, 19200  }
 0x549   : > { %7781 = vsyncadd (!%p6873_p8), %s5709_s5, 4294948096  ;;  %s20_s19 = sadd.s32 1, %s7812_s19   ;;  %s11540_s15 = sld [smem:[#allocation13_spill]] }
 0x54a   : > { %p17_p10 = scmp.ge.s32.totalorder %s20_s19, 6   ;;  %s11541_s16 = sld [smem:[#allocation14_spill]] }
 0x54b   : > { %s11542_s17 = sld [smem:[#allocation15_spill]]  ;;  %s11543_s18 = sld [smem:[#allocation16_spill]] }
 0x54c   : > { %s11544_s12 = smov %s7788_s13  ;;  %s11545_s13 = smov %s7792_s14 }
 0x54d   : > { %s11546_s14 = smov %s7923_s11  ;;  %19 = sbr.rel (!%p17_p10) target bundleno = 10 (0xa), region = 97 }
 0x554   :  { %5714 = vsyncpa [#allocation4], 1 }
 0x555   :  { %5716 = vsyncpa [#allocation4 + $0x1], 1 }
 0x556   :  { %5717 = vsyncpa [#allocation7], 1 }
 0x557   :  { %5719 = vsyncpa [#allocation7 + $0x1], 1 }
 0x558   :  { %5720 = vsyncpa [#allocation5], 1 }
 0x559   :  { %5722 = vsyncpa [#allocation5 + $0x1], 1 }

</bundles_post_ra>
